<compile_context>
chip_gen: v7x
topology: tpu7x:2x2x1
jax: 0.10.0
libtpu: 0.0.40
codegen_flags: <defaults>
</compile_context>

<pallas_src>
import jax
import jax.numpy as jnp
from jax.experimental import pallas as pl
from jax.experimental.pallas import tpu as pltpu

EPS = 1e-5  # nn.BatchNorm1d default eps


def _w_bf16(w_ref):
    # int8 -> f32 -> bf16.  int8 magnitudes (<=127) are exactly representable
    # in bf16; the two-step convert is the most portable lowering path.
    return w_ref[...].astype(jnp.float32).astype(jnp.bfloat16)


def _gen_block(x, w_ref, ws_ref, gamma_ref, beta_ref):
    """int8 Linear (no bias; cancels under BN) -> fused BatchNorm1d -> ReLU.

    The per-output-channel dequant scale `s` is folded into the BN affine:
      BN(acc*s) = acc * [gamma*s*rsqrt(var(acc)*s^2 + eps)]
                  + [beta - mean(acc) * (same)]
    so no per-element dequant multiply is needed.
    """
    acc = jnp.dot(x.astype(jnp.bfloat16), _w_bf16(w_ref),
                  preferred_element_type=jnp.float32)
    inv_n = 1.0 / acc.shape[0]
    mean = jnp.sum(acc, axis=0, keepdims=True) * inv_n            # per-feature
    m2 = jnp.sum(acc * acc, axis=0, keepdims=True) * inv_n        # E[acc^2]
    var = jnp.maximum(m2 - mean * mean, 0.0)                      # clamped
    s = ws_ref[...]                                               # (1, F) f32
    bn_scale = gamma_ref[...] * s * jax.lax.rsqrt(var * (s * s) + EPS)
    shift = beta_ref[...] - mean * bn_scale
    return jnp.maximum(acc * bn_scale + shift, 0.0)               # ReLU


def generator_kernel(z_ref,
                     w1, s1, g1, be1,
                     w2, s2, g2, be2,
                     w3, s3, g3, be3,
                     w4, s4, g4, be4,
                     w5, s5, b5,
                     out_ref):
    x = z_ref[...]
    x = _gen_block(x, w1, s1, g1, be1)
    x = _gen_block(x, w2, s2, g2, be2)
    x = _gen_block(x, w3, s3, g3, be3)
    x = _gen_block(x, w4, s4, g4, be4)
    acc = jnp.dot(x.astype(jnp.bfloat16), _w_bf16(w5),
                  preferred_element_type=jnp.float32)
    logits = acc * s5[...] + b5[...]                 # dequant + bias
    e = jnp.exp(-logits)                             # EUP
    out_ref[...] = pl.reciprocal(1.0 + e, approx=True)   # sigmoid via EUP recip


def _quantize_per_channel(w):
    """Symmetric int8 quantization with a per-output-channel scale."""
    s = jnp.max(jnp.abs(w), axis=0, keepdims=True) / 127.0
    s = jnp.maximum(s, 1e-8)
    w_q = jnp.clip(jnp.round(w / s), -127, 127).astype(jnp.int8)
    return w_q, s.astype(jnp.float32)


def make_params(key, z_dim=10, im_dim=784, hidden_dim=128):
    """PyTorch-style (uniform +-1/sqrt(fan_in)) init, then int8 quantization."""
    dims = [z_dim, hidden_dim, hidden_dim * 2, hidden_dim * 4, hidden_dim * 8, im_dim]
    keys = jax.random.split(key, 5)
    params = []
    for i in range(5):
        fan_in, fan_out = dims[i], dims[i + 1]
        bound = 1.0 / (fan_in ** 0.5)
        kw, kb = jax.random.split(keys[i])
        w = jax.random.uniform(kw, (fan_in, fan_out), jnp.float32, -bound, bound)
        b = jax.random.uniform(kb, (1, fan_out), jnp.float32, -bound, bound)
        w_q, w_scale = _quantize_per_channel(w)
        layer = {"w_q": w_q, "w_scale": w_scale, "b": b}
        if i < 4:
            layer["gamma"] = jnp.ones((1, fan_out), jnp.float32)   # BN weight
            layer["beta"] = jnp.zeros((1, fan_out), jnp.float32)   # BN bias
        params.append(layer)
    return params


def generator_forward(noise, params):
    batch = noise.shape[0]
    im_dim = params[-1]["w_q"].shape[1]

    # Linear biases for layers 1-4 are NOT passed: they cancel exactly under
    # training-mode BatchNorm (h - E[h] is invariant to a per-feature +b).
    kernel_args = []
    for layer in params[:4]:
        kernel_args += [layer["w_q"], layer["w_scale"], layer["gamma"], layer["beta"]]
    kernel_args += [params[4]["w_q"], params[4]["w_scale"], params[4]["b"]]

    weight_shapes = [layer["w_q"].shape for layer in params]
    flops = 2 * batch * sum(k * n for k, n in weight_shapes)
    bytes_accessed = (
        sum(int(a.size) * a.dtype.itemsize for a in kernel_args)
        + int(noise.size) * noise.dtype.itemsize
        + batch * im_dim * 4
    )
    transcendentals = (
        batch * im_dim * 2                              # exp + approx reciprocal
        + sum(n for _, n in weight_shapes[:4])          # per-feature rsqrt
    )

    # TODO(synk): for batch >= ~256, switch to a batch-tiled grid:
    #   grid=(cdiv(batch, TB),), noise/out BlockSpecs indexed by the batch tile,
    #   constant index_maps (lambda i: (0, 0)) for all weight/BN params so they
    #   stay VMEM-resident, a two-pass cross-tile BN (sum / sum-of-squares in
    #   VMEM scratch over an "arbitrary" pass, affine in a second pass), the
    #   batch axis marked "parallel" for the v7x second TensorCore, bf16 output,
    #   and TB capped ~512-1024 against v7x's 64 MiB VMEM.
    vmem = pl.BlockSpec(memory_space=pltpu.MemorySpace.VMEM)
    out = pl.pallas_call(
        generator_kernel,
        out_shape=jax.ShapeDtypeStruct((batch, im_dim), jnp.float32),
        in_specs=[vmem] * (1 + len(kernel_args)),
        out_specs=vmem,
        compiler_params=pltpu.CompilerParams(vmem_limit_bytes=16 << 20),
        cost_estimate=pl.CostEstimate(flops=flops,
                                      transcendentals=transcendentals,
                                      bytes_accessed=bytes_accessed),
    )(noise, *kernel_args)
    return out


def generator_reference(noise, params):
    """Pure-JAX reference mirroring the PyTorch forward (training-mode BN),
    using the same int8 weights / bf16 matmul inputs / f32 accumulation as the
    kernel (intentional precision tradeoff vs. a pure-f32 forward)."""
    x = noise
    for layer in params[:4]:
        acc = jnp.dot(x.astype(jnp.bfloat16), layer["w_q"].astype(jnp.bfloat16),
                      preferred_element_type=jnp.float32)
        h = acc * layer["w_scale"] + layer["b"]
        mean = jnp.mean(h, axis=0, keepdims=True)
        var = jnp.mean(jnp.square(h - mean), axis=0, keepdims=True)
        x = jnp.maximum((h - mean) * jax.lax.rsqrt(var + EPS) * layer["gamma"]
                        + layer["beta"], 0.0)
    last = params[4]
    acc = jnp.dot(x.astype(jnp.bfloat16), last["w_q"].astype(jnp.bfloat16),
                  preferred_element_type=jnp.float32)
    logits = acc * last["w_scale"] + last["b"]
    return jax.nn.sigmoid(logits)


if __name__ == "__main__":
    key = jax.random.PRNGKey(0)
    k_noise, k_params = jax.random.split(key)

    batch, z_dim, im_dim, hidden_dim = 8, 10, 784, 128
    noise = jax.random.normal(k_noise, (batch, z_dim), jnp.float32)
    params = make_params(k_params, z_dim=z_dim, im_dim=im_dim, hidden_dim=hidden_dim)

    out = jax.block_until_ready(generator_forward(noise, params))
    ref = generator_reference(noise, params)

    assert out.shape == (batch, im_dim)
    max_err = float(jnp.max(jnp.abs(out - ref)))
    assert jnp.allclose(out, ref, atol=2e-2, rtol=2e-2), max_err
    print("KERNEL_OK")
</pallas_src>

<mosaic_0001>
module attributes {stable_mosaic.version = 11 : i64} {
  func.func @generator_kernel(%arg0: memref<8x10xf32, #tpu.memory_space<vmem>>, %arg1: memref<10x128xi8, #tpu.memory_space<vmem>>, %arg2: memref<1x128xf32, #tpu.memory_space<vmem>>, %arg3: memref<1x128xf32, #tpu.memory_space<vmem>>, %arg4: memref<1x128xf32, #tpu.memory_space<vmem>>, %arg5: memref<128x256xi8, #tpu.memory_space<vmem>>, %arg6: memref<1x256xf32, #tpu.memory_space<vmem>>, %arg7: memref<1x256xf32, #tpu.memory_space<vmem>>, %arg8: memref<1x256xf32, #tpu.memory_space<vmem>>, %arg9: memref<256x512xi8, #tpu.memory_space<vmem>>, %arg10: memref<1x512xf32, #tpu.memory_space<vmem>>, %arg11: memref<1x512xf32, #tpu.memory_space<vmem>>, %arg12: memref<1x512xf32, #tpu.memory_space<vmem>>, %arg13: memref<512x1024xi8, #tpu.memory_space<vmem>>, %arg14: memref<1x1024xf32, #tpu.memory_space<vmem>>, %arg15: memref<1x1024xf32, #tpu.memory_space<vmem>>, %arg16: memref<1x1024xf32, #tpu.memory_space<vmem>>, %arg17: memref<1024x784xi8, #tpu.memory_space<vmem>>, %arg18: memref<1x784xf32, #tpu.memory_space<vmem>>, %arg19: memref<1x784xf32, #tpu.memory_space<vmem>>, %arg20: memref<8x784xf32, #tpu.memory_space<vmem>>) attributes {dimension_semantics = [], scalar_prefetch = 0 : i64, scratch_operands = 0 : i64, tpu.core_type = #tpu.core_type<tc>} {
    %c0 = arith.constant 0 : index
    %c0_0 = arith.constant 0 : index
    %0 = vector.load %arg0[%c0, %c0_0] : memref<8x10xf32, #tpu.memory_space<vmem>>, vector<8x10xf32>
    %1 = arith.truncf %0 : vector<8x10xf32> to vector<8x10xbf16>
    %c0_1 = arith.constant 0 : index
    %c0_2 = arith.constant 0 : index
    %2 = vector.load %arg1[%c0_1, %c0_2] : memref<10x128xi8, #tpu.memory_space<vmem>>, vector<10x128xi8>
    %3 = arith.sitofp %2 : vector<10x128xi8> to vector<10x128xf32>
    %4 = arith.truncf %3 : vector<10x128xf32> to vector<10x128xbf16>
    %cst = arith.constant dense<0.000000e+00> : vector<8x128xf32>
    %5 = tpu.matmul %1, %4, %cst {dimension_numbers = #tpu.dot_dimension_numbers<[1], [0], [0], [1], [0, 0, 1, 1], [], []>} : vector<8x10xbf16>, vector<10x128xbf16>, vector<8x128xf32> -> vector<8x128xf32>
    %cst_3 = arith.constant dense<0.000000e+00> : vector<128xf32>
    %6 = vector.multi_reduction <add>, %5, %cst_3 [0] : vector<8x128xf32> to vector<128xf32>
    %7 = vector.shape_cast %6 : vector<128xf32> to vector<1x128xf32>
    %cst_4 = arith.constant 1.250000e-01 : f32
    %8 = vector.broadcast %cst_4 : f32 to vector<1x128xf32>
    %9 = arith.mulf %7, %8 : vector<1x128xf32>
    %10 = arith.mulf %5, %5 : vector<8x128xf32>
    %cst_5 = arith.constant dense<0.000000e+00> : vector<128xf32>
    %11 = vector.multi_reduction <add>, %10, %cst_5 [0] : vector<8x128xf32> to vector<128xf32>
    %12 = vector.shape_cast %11 : vector<128xf32> to vector<1x128xf32>
    %cst_6 = arith.constant 1.250000e-01 : f32
    %13 = vector.broadcast %cst_6 : f32 to vector<1x128xf32>
    %14 = arith.mulf %12, %13 : vector<1x128xf32>
    %15 = arith.mulf %9, %9 : vector<1x128xf32>
    %16 = arith.subf %14, %15 : vector<1x128xf32>
    %cst_7 = arith.constant 0.000000e+00 : f32
    %17 = vector.broadcast %cst_7 : f32 to vector<1x128xf32>
    %18 = arith.maximumf %16, %17 : vector<1x128xf32>
    %c0_8 = arith.constant 0 : index
    %c0_9 = arith.constant 0 : index
    %19 = vector.load %arg2[%c0_8, %c0_9] : memref<1x128xf32, #tpu.memory_space<vmem>>, vector<1x128xf32>
    %c0_10 = arith.constant 0 : index
    %c0_11 = arith.constant 0 : index
    %20 = vector.load %arg3[%c0_10, %c0_11] : memref<1x128xf32, #tpu.memory_space<vmem>>, vector<1x128xf32>
    %21 = arith.mulf %20, %19 : vector<1x128xf32>
    %22 = arith.mulf %19, %19 : vector<1x128xf32>
    %23 = arith.mulf %18, %22 : vector<1x128xf32>
    %cst_12 = arith.constant 9.99999974E-6 : f32
    %24 = vector.broadcast %cst_12 : f32 to vector<1x128xf32>
    %25 = arith.addf %23, %24 : vector<1x128xf32>
    %26 = math.rsqrt %25 : vector<1x128xf32>
    %27 = arith.mulf %21, %26 : vector<1x128xf32>
    %c0_13 = arith.constant 0 : index
    %c0_14 = arith.constant 0 : index
    %28 = vector.load %arg4[%c0_13, %c0_14] : memref<1x128xf32, #tpu.memory_space<vmem>>, vector<1x128xf32>
    %29 = arith.mulf %9, %27 : vector<1x128xf32>
    %30 = arith.subf %28, %29 : vector<1x128xf32>
    %31 = vector.broadcast %27 : vector<1x128xf32> to vector<8x128xf32>
    %32 = arith.mulf %5, %31 : vector<8x128xf32>
    %33 = vector.broadcast %30 : vector<1x128xf32> to vector<8x128xf32>
    %34 = arith.addf %32, %33 : vector<8x128xf32>
    %cst_15 = arith.constant 0.000000e+00 : f32
    %35 = vector.broadcast %cst_15 : f32 to vector<8x128xf32>
    %36 = arith.maximumf %34, %35 : vector<8x128xf32>
    %37 = arith.truncf %36 : vector<8x128xf32> to vector<8x128xbf16>
    %c0_16 = arith.constant 0 : index
    %c0_17 = arith.constant 0 : index
    %38 = vector.load %arg5[%c0_16, %c0_17] : memref<128x256xi8, #tpu.memory_space<vmem>>, vector<128x256xi8>
    %39 = arith.sitofp %38 : vector<128x256xi8> to vector<128x256xf32>
    %40 = arith.truncf %39 : vector<128x256xf32> to vector<128x256xbf16>
    %cst_18 = arith.constant dense<0.000000e+00> : vector<8x256xf32>
    %41 = tpu.matmul %37, %40, %cst_18 {dimension_numbers = #tpu.dot_dimension_numbers<[1], [0], [0], [1], [0, 0, 1, 1], [], []>} : vector<8x128xbf16>, vector<128x256xbf16>, vector<8x256xf32> -> vector<8x256xf32>
    %cst_19 = arith.constant dense<0.000000e+00> : vector<256xf32>
    %42 = vector.multi_reduction <add>, %41, %cst_19 [0] : vector<8x256xf32> to vector<256xf32>
    %43 = vector.shape_cast %42 : vector<256xf32> to vector<1x256xf32>
    %cst_20 = arith.constant 1.250000e-01 : f32
    %44 = vector.broadcast %cst_20 : f32 to vector<1x256xf32>
    %45 = arith.mulf %43, %44 : vector<1x256xf32>
    %46 = arith.mulf %41, %41 : vector<8x256xf32>
    %cst_21 = arith.constant dense<0.000000e+00> : vector<256xf32>
    %47 = vector.multi_reduction <add>, %46, %cst_21 [0] : vector<8x256xf32> to vector<256xf32>
    %48 = vector.shape_cast %47 : vector<256xf32> to vector<1x256xf32>
    %cst_22 = arith.constant 1.250000e-01 : f32
    %49 = vector.broadcast %cst_22 : f32 to vector<1x256xf32>
    %50 = arith.mulf %48, %49 : vector<1x256xf32>
    %51 = arith.mulf %45, %45 : vector<1x256xf32>
    %52 = arith.subf %50, %51 : vector<1x256xf32>
    %cst_23 = arith.constant 0.000000e+00 : f32
    %53 = vector.broadcast %cst_23 : f32 to vector<1x256xf32>
    %54 = arith.maximumf %52, %53 : vector<1x256xf32>
    %c0_24 = arith.constant 0 : index
    %c0_25 = arith.constant 0 : index
    %55 = vector.load %arg6[%c0_24, %c0_25] : memref<1x256xf32, #tpu.memory_space<vmem>>, vector<1x256xf32>
    %c0_26 = arith.constant 0 : index
    %c0_27 = arith.constant 0 : index
    %56 = vector.load %arg7[%c0_26, %c0_27] : memref<1x256xf32, #tpu.memory_space<vmem>>, vector<1x256xf32>
    %57 = arith.mulf %56, %55 : vector<1x256xf32>
    %58 = arith.mulf %55, %55 : vector<1x256xf32>
    %59 = arith.mulf %54, %58 : vector<1x256xf32>
    %cst_28 = arith.constant 9.99999974E-6 : f32
    %60 = vector.broadcast %cst_28 : f32 to vector<1x256xf32>
    %61 = arith.addf %59, %60 : vector<1x256xf32>
    %62 = math.rsqrt %61 : vector<1x256xf32>
    %63 = arith.mulf %57, %62 : vector<1x256xf32>
    %c0_29 = arith.constant 0 : index
    %c0_30 = arith.constant 0 : index
    %64 = vector.load %arg8[%c0_29, %c0_30] : memref<1x256xf32, #tpu.memory_space<vmem>>, vector<1x256xf32>
    %65 = arith.mulf %45, %63 : vector<1x256xf32>
    %66 = arith.subf %64, %65 : vector<1x256xf32>
    %67 = vector.broadcast %63 : vector<1x256xf32> to vector<8x256xf32>
    %68 = arith.mulf %41, %67 : vector<8x256xf32>
    %69 = vector.broadcast %66 : vector<1x256xf32> to vector<8x256xf32>
    %70 = arith.addf %68, %69 : vector<8x256xf32>
    %cst_31 = arith.constant 0.000000e+00 : f32
    %71 = vector.broadcast %cst_31 : f32 to vector<8x256xf32>
    %72 = arith.maximumf %70, %71 : vector<8x256xf32>
    %73 = arith.truncf %72 : vector<8x256xf32> to vector<8x256xbf16>
    %c0_32 = arith.constant 0 : index
    %c0_33 = arith.constant 0 : index
    %74 = vector.load %arg9[%c0_32, %c0_33] : memref<256x512xi8, #tpu.memory_space<vmem>>, vector<256x512xi8>
    %75 = arith.sitofp %74 : vector<256x512xi8> to vector<256x512xf32>
    %76 = arith.truncf %75 : vector<256x512xf32> to vector<256x512xbf16>
    %cst_34 = arith.constant dense<0.000000e+00> : vector<8x512xf32>
    %77 = tpu.matmul %73, %76, %cst_34 {dimension_numbers = #tpu.dot_dimension_numbers<[1], [0], [0], [1], [0, 0, 1, 1], [], []>} : vector<8x256xbf16>, vector<256x512xbf16>, vector<8x512xf32> -> vector<8x512xf32>
    %cst_35 = arith.constant dense<0.000000e+00> : vector<512xf32>
    %78 = vector.multi_reduction <add>, %77, %cst_35 [0] : vector<8x512xf32> to vector<512xf32>
    %79 = vector.shape_cast %78 : vector<512xf32> to vector<1x512xf32>
    %cst_36 = arith.constant 1.250000e-01 : f32
    %80 = vector.broadcast %cst_36 : f32 to vector<1x512xf32>
    %81 = arith.mulf %79, %80 : vector<1x512xf32>
    %82 = arith.mulf %77, %77 : vector<8x512xf32>
    %cst_37 = arith.constant dense<0.000000e+00> : vector<512xf32>
    %83 = vector.multi_reduction <add>, %82, %cst_37 [0] : vector<8x512xf32> to vector<512xf32>
    %84 = vector.shape_cast %83 : vector<512xf32> to vector<1x512xf32>
    %cst_38 = arith.constant 1.250000e-01 : f32
    %85 = vector.broadcast %cst_38 : f32 to vector<1x512xf32>
    %86 = arith.mulf %84, %85 : vector<1x512xf32>
    %87 = arith.mulf %81, %81 : vector<1x512xf32>
    %88 = arith.subf %86, %87 : vector<1x512xf32>
    %cst_39 = arith.constant 0.000000e+00 : f32
    %89 = vector.broadcast %cst_39 : f32 to vector<1x512xf32>
    %90 = arith.maximumf %88, %89 : vector<1x512xf32>
    %c0_40 = arith.constant 0 : index
    %c0_41 = arith.constant 0 : index
    %91 = vector.load %arg10[%c0_40, %c0_41] : memref<1x512xf32, #tpu.memory_space<vmem>>, vector<1x512xf32>
    %c0_42 = arith.constant 0 : index
    %c0_43 = arith.constant 0 : index
    %92 = vector.load %arg11[%c0_42, %c0_43] : memref<1x512xf32, #tpu.memory_space<vmem>>, vector<1x512xf32>
    %93 = arith.mulf %92, %91 : vector<1x512xf32>
    %94 = arith.mulf %91, %91 : vector<1x512xf32>
    %95 = arith.mulf %90, %94 : vector<1x512xf32>
    %cst_44 = arith.constant 9.99999974E-6 : f32
    %96 = vector.broadcast %cst_44 : f32 to vector<1x512xf32>
    %97 = arith.addf %95, %96 : vector<1x512xf32>
    %98 = math.rsqrt %97 : vector<1x512xf32>
    %99 = arith.mulf %93, %98 : vector<1x512xf32>
    %c0_45 = arith.constant 0 : index
    %c0_46 = arith.constant 0 : index
    %100 = vector.load %arg12[%c0_45, %c0_46] : memref<1x512xf32, #tpu.memory_space<vmem>>, vector<1x512xf32>
    %101 = arith.mulf %81, %99 : vector<1x512xf32>
    %102 = arith.subf %100, %101 : vector<1x512xf32>
    %103 = vector.broadcast %99 : vector<1x512xf32> to vector<8x512xf32>
    %104 = arith.mulf %77, %103 : vector<8x512xf32>
    %105 = vector.broadcast %102 : vector<1x512xf32> to vector<8x512xf32>
    %106 = arith.addf %104, %105 : vector<8x512xf32>
    %cst_47 = arith.constant 0.000000e+00 : f32
    %107 = vector.broadcast %cst_47 : f32 to vector<8x512xf32>
    %108 = arith.maximumf %106, %107 : vector<8x512xf32>
    %109 = arith.truncf %108 : vector<8x512xf32> to vector<8x512xbf16>
    %c0_48 = arith.constant 0 : index
    %c0_49 = arith.constant 0 : index
    %110 = vector.load %arg13[%c0_48, %c0_49] : memref<512x1024xi8, #tpu.memory_space<vmem>>, vector<512x1024xi8>
    %111 = arith.sitofp %110 : vector<512x1024xi8> to vector<512x1024xf32>
    %112 = arith.truncf %111 : vector<512x1024xf32> to vector<512x1024xbf16>
    %cst_50 = arith.constant dense<0.000000e+00> : vector<8x1024xf32>
    %113 = tpu.matmul %109, %112, %cst_50 {dimension_numbers = #tpu.dot_dimension_numbers<[1], [0], [0], [1], [0, 0, 1, 1], [], []>} : vector<8x512xbf16>, vector<512x1024xbf16>, vector<8x1024xf32> -> vector<8x1024xf32>
    %cst_51 = arith.constant dense<0.000000e+00> : vector<1024xf32>
    %114 = vector.multi_reduction <add>, %113, %cst_51 [0] : vector<8x1024xf32> to vector<1024xf32>
    %115 = vector.shape_cast %114 : vector<1024xf32> to vector<1x1024xf32>
    %cst_52 = arith.constant 1.250000e-01 : f32
    %116 = vector.broadcast %cst_52 : f32 to vector<1x1024xf32>
    %117 = arith.mulf %115, %116 : vector<1x1024xf32>
    %118 = arith.mulf %113, %113 : vector<8x1024xf32>
    %cst_53 = arith.constant dense<0.000000e+00> : vector<1024xf32>
    %119 = vector.multi_reduction <add>, %118, %cst_53 [0] : vector<8x1024xf32> to vector<1024xf32>
    %120 = vector.shape_cast %119 : vector<1024xf32> to vector<1x1024xf32>
    %cst_54 = arith.constant 1.250000e-01 : f32
    %121 = vector.broadcast %cst_54 : f32 to vector<1x1024xf32>
    %122 = arith.mulf %120, %121 : vector<1x1024xf32>
    %123 = arith.mulf %117, %117 : vector<1x1024xf32>
    %124 = arith.subf %122, %123 : vector<1x1024xf32>
    %cst_55 = arith.constant 0.000000e+00 : f32
    %125 = vector.broadcast %cst_55 : f32 to vector<1x1024xf32>
    %126 = arith.maximumf %124, %125 : vector<1x1024xf32>
    %c0_56 = arith.constant 0 : index
    %c0_57 = arith.constant 0 : index
    %127 = vector.load %arg14[%c0_56, %c0_57] : memref<1x1024xf32, #tpu.memory_space<vmem>>, vector<1x1024xf32>
    %c0_58 = arith.constant 0 : index
    %c0_59 = arith.constant 0 : index
    %128 = vector.load %arg15[%c0_58, %c0_59] : memref<1x1024xf32, #tpu.memory_space<vmem>>, vector<1x1024xf32>
    %129 = arith.mulf %128, %127 : vector<1x1024xf32>
    %130 = arith.mulf %127, %127 : vector<1x1024xf32>
    %131 = arith.mulf %126, %130 : vector<1x1024xf32>
    %cst_60 = arith.constant 9.99999974E-6 : f32
    %132 = vector.broadcast %cst_60 : f32 to vector<1x1024xf32>
    %133 = arith.addf %131, %132 : vector<1x1024xf32>
    %134 = math.rsqrt %133 : vector<1x1024xf32>
    %135 = arith.mulf %129, %134 : vector<1x1024xf32>
    %c0_61 = arith.constant 0 : index
    %c0_62 = arith.constant 0 : index
    %136 = vector.load %arg16[%c0_61, %c0_62] : memref<1x1024xf32, #tpu.memory_space<vmem>>, vector<1x1024xf32>
    %137 = arith.mulf %117, %135 : vector<1x1024xf32>
    %138 = arith.subf %136, %137 : vector<1x1024xf32>
    %139 = vector.broadcast %135 : vector<1x1024xf32> to vector<8x1024xf32>
    %140 = arith.mulf %113, %139 : vector<8x1024xf32>
    %141 = vector.broadcast %138 : vector<1x1024xf32> to vector<8x1024xf32>
    %142 = arith.addf %140, %141 : vector<8x1024xf32>
    %cst_63 = arith.constant 0.000000e+00 : f32
    %143 = vector.broadcast %cst_63 : f32 to vector<8x1024xf32>
    %144 = arith.maximumf %142, %143 : vector<8x1024xf32>
    %145 = arith.truncf %144 : vector<8x1024xf32> to vector<8x1024xbf16>
    %c0_64 = arith.constant 0 : index
    %c0_65 = arith.constant 0 : index
    %146 = vector.load %arg17[%c0_64, %c0_65] : memref<1024x784xi8, #tpu.memory_space<vmem>>, vector<1024x784xi8>
    %147 = arith.sitofp %146 : vector<1024x784xi8> to vector<1024x784xf32>
    %148 = arith.truncf %147 : vector<1024x784xf32> to vector<1024x784xbf16>
    %cst_66 = arith.constant dense<0.000000e+00> : vector<8x784xf32>
    %149 = tpu.matmul %145, %148, %cst_66 {dimension_numbers = #tpu.dot_dimension_numbers<[1], [0], [0], [1], [0, 0, 1, 1], [], []>} : vector<8x1024xbf16>, vector<1024x784xbf16>, vector<8x784xf32> -> vector<8x784xf32>
    %c0_67 = arith.constant 0 : index
    %c0_68 = arith.constant 0 : index
    %150 = vector.load %arg18[%c0_67, %c0_68] : memref<1x784xf32, #tpu.memory_space<vmem>>, vector<1x784xf32>
    %151 = vector.broadcast %150 : vector<1x784xf32> to vector<8x784xf32>
    %152 = arith.mulf %149, %151 : vector<8x784xf32>
    %c0_69 = arith.constant 0 : index
    %c0_70 = arith.constant 0 : index
    %153 = vector.load %arg19[%c0_69, %c0_70] : memref<1x784xf32, #tpu.memory_space<vmem>>, vector<1x784xf32>
    %154 = vector.broadcast %153 : vector<1x784xf32> to vector<8x784xf32>
    %155 = arith.addf %152, %154 : vector<8x784xf32>
    %cst_71 = arith.constant 0.000000e+00 : f32
    %156 = vector.broadcast %cst_71 : f32 to vector<8x784xf32>
    %157 = arith.subf %156, %155 : vector<8x784xf32>
    %158 = math.exp %157 : vector<8x784xf32>
    %cst_72 = arith.constant 1.000000e+00 : f32
    %159 = vector.broadcast %cst_72 : f32 to vector<8x784xf32>
    %160 = arith.addf %159, %158 : vector<8x784xf32>
    %161 = tpu.reciprocal %160 {approx = true} : vector<8x784xf32> -> vector<8x784xf32>
    %c0_73 = arith.constant 0 : index
    %c0_74 = arith.constant 0 : index
    %162 = vector.load %arg20[%c0_73, %c0_74] : memref<8x784xf32, #tpu.memory_space<vmem>>, vector<8x784xf32>
    tpu.vector_store %arg20[%c0_73, %c0_74], %161 {strides = array<i32>} : memref<8x784xf32, #tpu.memory_space<vmem>>, vector<8x784xf32>,
    return
  }
}

</mosaic_0001>

<bundles_post_ra>
// kernel: tpu_custom_call.1
= control target key start
LH: loop header
LB: loop body
LE: loop exit
PB: predicated region body
PF: predicated region fallthrough
CT: control target
= control target key end

     0   :  { %s5426_s0 = inlined_call_operand.vmem [shape: f32[8,10], index: 0, kind: input, shape index: {}]   ;;  %s5427_s1 = inlined_call_operand.vmem [shape: s8[10,128], index: 1, kind: input, shape index: {}]   ;;  %s5428_s2 = inlined_call_operand.vmem [shape: f32[1,128], index: 2, kind: input, shape index: {}]   ;;  %s5429_s3 = inlined_call_operand.vmem [shape: f32[1,128], index: 3, kind: input, shape index: {}]   ;;  %s5430_s4 = inlined_call_operand.vmem [shape: f32[1,128], index: 4, kind: input, shape index: {}]   ;;  %s5431_s5 = inlined_call_operand.vmem [shape: s8[128,256], index: 5, kind: input, shape index: {}]   ;;  %s5432_s6 = inlined_call_operand.vmem [shape: f32[1,256], index: 6, kind: input, shape index: {}]   ;;  %s5433_s7 = inlined_call_operand.vmem [shape: f32[1,256], index: 7, kind: input, shape index: {}]   ;;  %s5434_s8 = inlined_call_operand.vmem [shape: f32[1,256], index: 8, kind: input, shape index: {}]   ;;  %s5435_s9 = inlined_call_operand.vmem [shape: s8[256,512], index: 9, kind: input, shape index: {}]   ;;  %s5436_s10 = inlined_call_operand.vmem [shape: f32[1,512], index: 10, kind: input, shape index: {}]   ;;  %s5437_s11 = inlined_call_operand.vmem [shape: f32[1,512], index: 11, kind: input, shape index: {}]   ;;  %s5438_s12 = inlined_call_operand.vmem [shape: f32[1,512], index: 12, kind: input, shape index: {}]   ;;  %s5439_s13 = inlined_call_operand.vmem [shape: s8[512,1024], index: 13, kind: input, shape index: {}]   ;;  %s5440_s14 = inlined_call_operand.vmem [shape: f32[1,1024], index: 14, kind: input, shape index: {}]   ;;  %s5441_s15 = inlined_call_operand.vmem [shape: f32[1,1024], index: 15, kind: input, shape index: {}]   ;;  %s5442_s16 = inlined_call_operand.vmem [shape: f32[1,1024], index: 16, kind: input, shape index: {}]   ;;  %s5443_s17 = inlined_call_operand.vmem [shape: s8[1024,784], index: 17, kind: input, shape index: {}]   ;;  %s5444_s18 = inlined_call_operand.vmem [shape: f32[1,784], index: 18, kind: input, shape index: {}]   ;;  %s5445_s19 = inlined_call_operand.vmem [shape: f32[1,784], index: 19, kind: input, shape index: {}]   ;;  %s5446_s20 = inlined_call_operand.hbm [shape: f32[8,784], index: 20, kind: output, shape index: {}]  }
   0x1   :  { %5448 = sst [smem:[#allocation5_spill]] %s5426_s0 }
   0x2   :  { %5449 = sst [smem:[#allocation6_spill]] %s5427_s1 }
   0x3   :  { %5450 = sst [smem:[#allocation7_spill]] %s5428_s2 }
   0x4   :  { %5451 = sst [smem:[#allocation8_spill]] %s5429_s3 }
   0x5   :  { %5452 = sst [smem:[#allocation9_spill]] %s5430_s4 }
   0x6   :  { %s5453_s23 = sld [smem:[#allocation6_spill]]  ;;  %v3646_v2 = vmov 0.0  }
   0x7   :  { %3501 = vmatprep.subr.bf16.mxu0 %v3646_v2 }
   0xc   :  { %v69_v0 = vld [vmem:[%s5453_s23] sm:$0x3]  ;;  %v70_v1 = vld [vmem:[%s5453_s23 + $0x2] sm:$0x1] }
   0xd   :  { %v71_v3 = vunpack.c.l.s8.bf16 %v69_v0  ;;  %v72_v4 = vunpack.c.l.s8.bf16 %v70_v1 }
   0xe   :  { %25 = vsyncpa [#allocation3], 0  ;;  %vm82_vm0 = vcmask 1044480   ;;  %vm3647_vm1 = vmmov 0   ;;  %s5454_s26 = sld [smem:[#allocation5_spill]]  ;;  %vm78_vm2 = vcmask 80896   ;;  %v156_v60 = vlaneseq }
   0xf   :  { %3503 = vmatprep.mubr.msk.bf16.mxu0 %vm3647_vm1, %v3646_v2  ;;  %v3409_v6 = vcombine.low %v71_v3, %v72_v4  ;;  %v172_v9 = vld [vmem:[%s5431_s5 + $0x8] sm:$0xff]  ;;  %v171_v11 = vld [vmem:[%s5431_s5] sm:$0xff]  ;;  %v174_v15 = vld [vmem:[%s5431_s5 + $0x18] sm:$0xff]  ;;  %v3648_v32 = vmov 0   ;;  %s5455_s4 = sld [smem:[#allocation7_spill]]  ;;  %s5456_s0 = sld [smem:[#allocation8_spill]] }
  0x10   :  { %v180_v10 = vunpack.c.l.s8.bf16 %v172_v9  ;;  %v179_v12 = vunpack.c.l.s8.bf16 %v171_v11  ;;  %v182_v13 = vunpack.c.h.s8.bf16 %v172_v9  ;;  %v181_v14 = vunpack.c.h.s8.bf16 %v171_v11  ;;  %v173_v17 = vld [vmem:[%s5431_s5 + $0x10] sm:$0xff]  ;;  %v176_v21 = vld [vmem:[%s5431_s5 + $0x28] sm:$0xff]  ;;  %v175_v23 = vld [vmem:[%s5431_s5 + $0x20] sm:$0xff]  ;;  %227 = vmatprep.mubr.bf16.mxu1 %v3648_v32  ;;  %s5457_s22 = sld [smem:[#allocation9_spill]] }
  0x11   :  { %v84_v7 = vsel %vm82_vm0, %v3409_v6, 0  ;;  %v184_v16 = vunpack.c.l.s8.bf16 %v174_v15  ;;  %v183_v18 = vunpack.c.l.s8.bf16 %v173_v17  ;;  %v186_v19 = vunpack.c.h.s8.bf16 %v174_v15  ;;  %v178_v27 = vld [vmem:[%s5431_s5 + $0x38] sm:$0xff]  ;;  %v177_v29 = vld [vmem:[%s5431_s5 + $0x30] sm:$0xff]  ;;  %v376_v32 = vld [vmem:[%s5435_s9 + $0x60] sm:$0xff] }
  0x12   :  { %3502 = vmatpush3.bf16.msra.mxu0 %v84_v7  ;;  %195 = vmatprep.subr.bf16.mxu1 %v180_v10  ;;  %v185_v20 = vunpack.c.h.s8.bf16 %v173_v17  ;;  %v188_v22 = vunpack.c.l.s8.bf16 %v176_v21  ;;  %v187_v24 = vunpack.c.l.s8.bf16 %v175_v23  ;;  %v190_v25 = vunpack.c.h.s8.bf16 %v176_v21 }
  0x13   :  { %196 = vmatpush1.bf16.msra.mxu1 %v179_v12  ;;  %v189_v26 = vunpack.c.h.s8.bf16 %v175_v23  ;;  %v192_v28 = vunpack.c.l.s8.bf16 %v178_v27  ;;  %v194_v30 = vunpack.c.h.s8.bf16 %v178_v27  ;;  %v191_v31 = vunpack.c.l.s8.bf16 %v177_v29  ;;  %v365_v12 = vld [vmem:[%s5435_s9 + $0x8] sm:$0xff] }
  0x14   :  { %v67_v5 = vld [vmem:[%s5454_s26] sm:$0xff]  ;;  %197 = vmatprep.subr.bf16.mxu1 %v182_v13  ;;  %v193_v33 = vunpack.c.h.s8.bf16 %v177_v29  ;;  %v3795_v62 = vshrl.u32 %v156_v60, 7  ;;  %v397_v13 = vunpack.c.l.s8.bf16 %v365_v12  ;;  %v3856_v60 = vld [vmem:[%s5435_s9 + $0x18] sm:$0xff]  ;;  %vm3393_vm3 = vcmask 130048  }
  0x15   :  { %v68_v8 = vpack.c.bf16 %v67_v5, %v67_v5  ;;  %v144_v52 = vld [vmem:[%s5455_s4] sm:$0x1] }
  0x16   :  { %v147_v56 = vmul.f32 %v144_v52, %v144_v52  ;;  %v145_v61 = vld [vmem:[%s5456_s0] sm:$0x1]  ;;  %v3798_v0 = vsub.s32 0, %v3795_v62 }
  0x17   :  { %3504 = vmatmul.mubr.msk.bf16.vlgmr.msra.gmra.mrb[0].mxu0 %vm78_vm2, %v68_v8  ;;  %198 = vmatpush1.bf16.msra.mxu1 %v181_v14  ;;  %v146_v63 = vmul.f32 %v145_v61, %v144_v52  ;;  %v152_v3 = vld [vmem:[%s5457_s22] sm:$0x1]  ;;  %v399_v61 = vunpack.c.l.s8.bf16 %v3856_v60 }
  0x18   :  { %199 = vmatprep.subr.bf16.mxu1 %v184_v16  ;;  %v364_v14 = vld [vmem:[%s5435_s9] sm:$0xff]  ;;  %v401_v16 = vunpack.c.h.s8.bf16 %v365_v12 }
  0x19   :  { %v396_v15 = vunpack.c.l.s8.bf16 %v364_v14  ;;  %v400_v17 = vunpack.c.h.s8.bf16 %v364_v14 }
  0x1b   :  { %200 = vmatpush1.bf16.msra.mxu1 %v183_v18  ;;  %v369_v18 = vld [vmem:[%s5435_s9 + $0x28] sm:$0xff] }
  0x1c   :  { %201 = vmatprep.subr.bf16.mxu1 %v186_v19  ;;  %v405_v19 = vunpack.c.l.s8.bf16 %v369_v18 }
  0x1f   :  { %202 = vmatpush1.bf16.msra.mxu1 %v185_v20  ;;  %v368_v20 = vld [vmem:[%s5435_s9 + $0x20] sm:$0xff] }
  0x20   :  { %203 = vmatprep.subr.bf16.mxu1 %v188_v22  ;;  %v404_v21 = vunpack.c.l.s8.bf16 %v368_v20  ;;  %v409_v22 = vunpack.c.h.s8.bf16 %v369_v18  ;;  %v408_v23 = vunpack.c.h.s8.bf16 %v368_v20 }
  0x23   :  { %204 = vmatpush1.bf16.msra.mxu1 %v187_v24  ;;  %v373_v24 = vld [vmem:[%s5435_s9 + $0x48] sm:$0xff] }
  0x24   :  { %205 = vmatprep.subr.bf16.mxu1 %v190_v25  ;;  %v413_v25 = vunpack.c.l.s8.bf16 %v373_v24 }
  0x27   :  { %206 = vmatpush1.bf16.msra.mxu1 %v189_v26  ;;  %v372_v26 = vld [vmem:[%s5435_s9 + $0x40] sm:$0xff] }
  0x28   :  { %207 = vmatprep.subr.bf16.mxu1 %v192_v28  ;;  %v412_v27 = vunpack.c.l.s8.bf16 %v372_v26  ;;  %v417_v28 = vunpack.c.h.s8.bf16 %v373_v24  ;;  %v416_v29 = vunpack.c.h.s8.bf16 %v372_v26  ;;  %v272_v24 = vld [vmem:[%s5432_s6] sm:$0x3] }
  0x2b   :  { %208 = vmatpush1.bf16.msra.mxu1 %v191_v31 }
  0x2c   :  { %209 = vmatprep.subr.bf16.mxu1 %v194_v30  ;;  %v377_v30 = vld [vmem:[%s5435_s9 + $0x68] sm:$0xff] }
  0x2d   :  { %v421_v31 = vunpack.c.l.s8.bf16 %v377_v30 }
  0x2f   :  { %210 = vmatpush1.bf16.msra.mxu1 %v193_v33  ;;  %v420_v33 = vunpack.c.l.s8.bf16 %v376_v32 }
  0x30   :  { %460 = vmatprep.subr.bf16.mxu1 %v397_v13 }
  0xea   :  { %v120_v34 = vpop.f32.mrb[0].mxu0 }
  0xeb   :  { %v126_v35 = vrot.slane %v120_v34, 4  ;;  %v133_v36 = vmul.f32 %v120_v34, %v120_v34  ;;  %v3505_v37 = vpop.f32.mrb[1].mxu0 }
  0xec   :  { %v123_v38 = vpop.f32.mrb[2].mxu0 }
  0xed   :  { %v127_v39 = vadd.f32 %v126_v35, %v120_v34  ;;  %v134_v40 = vrot.slane %v133_v36, 4  ;;  %v3506_v41 = vpop.f32.mrb[3].mxu0  ;;  %v424_v35 = vunpack.c.h.s8.bf16 %v376_v32  ;;  %v380_v38 = vld [vmem:[%s5435_s9 + $0x80] sm:$0xff] }
  0xee   :  { %v432_v41 = vunpack.c.h.s8.bf16 %v380_v38 }
  0xef   :  { %v128_v42 = vrot.slane %v127_v39, 2  ;;  %v135_v43 = vadd.f32 %v134_v40, %v133_v36  ;;  %v381_v36 = vld [vmem:[%s5435_s9 + $0x88] sm:$0xff] }
  0xf0   :  { %v429_v37 = vunpack.c.l.s8.bf16 %v381_v36  ;;  %v433_v40 = vunpack.c.h.s8.bf16 %v381_v36 }
  0xf1   :  { %v129_v44 = vadd.f32 %v128_v42, %v127_v39  ;;  %v136_v45 = vrot.slane %v135_v43, 2  ;;  %v428_v39 = vunpack.c.l.s8.bf16 %v380_v38  ;;  %v385_v42 = vld [vmem:[%s5435_s9 + $0xa8] sm:$0xff] }
  0xf3   :  { %v130_v46 = vrot.slane %v129_v44, 1  ;;  %v137_v47 = vadd.f32 %v136_v45, %v135_v43  ;;  %v437_v43 = vunpack.c.l.s8.bf16 %v385_v42 }
  0xf5   :  { %v131_v48 = vadd.f32 %v130_v46, %v129_v44  ;;  %v138_v49 = vrot.slane %v137_v47, 1  ;;  %v384_v44 = vld [vmem:[%s5435_s9 + $0xa0] sm:$0xff]  ;;  %v441_v46 = vunpack.c.h.s8.bf16 %v385_v42 }
  0xf6   :  { %v436_v45 = vunpack.c.l.s8.bf16 %v384_v44 }
  0xf7   :  { %v132_v50 = vmul.f32 0.125, %v131_v48  ;;  %v139_v51 = vadd.f32 %v138_v49, %v137_v47  ;;  %v440_v47 = vunpack.c.h.s8.bf16 %v384_v44  ;;  %v389_v48 = vld [vmem:[%s5435_s9 + $0xc8] sm:$0xff] }
  0xf8   :  { %v445_v49 = vunpack.c.l.s8.bf16 %v389_v48  ;;  %v449_v52 = vunpack.c.h.s8.bf16 %v389_v48 }
  0xf9   :  { %v140_v53 = vmul.f32 0.125, %v139_v51  ;;  %v141_v54 = vmul.f32 %v132_v50, %v132_v50 }
  0xfb   :  { %v142_v55 = vsub.f32 %v140_v53, %v141_v54  ;;  %v393_v53 = vld [vmem:[%s5435_s9 + $0xe8] sm:$0xff] }
  0xfd   :  { %v143_v57 = vmax.f32 %v142_v55, 0.0  ;;  %v453_v55 = vunpack.c.l.s8.bf16 %v393_v53 }
  0xff   :  { %v148_v58 = vmul.f32 %v147_v56, %v143_v57  ;;  %v392_v56 = vld [vmem:[%s5435_s9 + $0xe0] sm:$0xff] }
 0x100   :  { %v452_v57 = vunpack.c.l.s8.bf16 %v392_v56 }
 0x101   :  { %v149_v59 = vadd.f32 1e-05, %v148_v58  ;;  %v457_v58 = vunpack.c.h.s8.bf16 %v393_v53 }
 0x103   :  { %3564 = vrsqrt.f32 %v149_v59  ;;  %v456_v59 = vunpack.c.h.s8.bf16 %v392_v56 }
 0x10d   :  { %v3565_v1 = vpop.eup %3564 }
 0x10e   :  { %v151_v2 = vmul.f32 %v3565_v1, %v146_v63 }
 0x110   :  { %v159_v4 = vrot.slane %v151_v2, %v3798_v0  ;;  %v153_v5 = vmul.f32 %v151_v2, %v132_v50  ;;  %v388_v50 = vld [vmem:[%s5435_s9 + $0xc0] sm:$0xff] }
 0x111   :  { %v444_v51 = vunpack.c.l.s8.bf16 %v388_v50  ;;  %v448_v54 = vunpack.c.h.s8.bf16 %v388_v50 }
 0x112   :  { %v154_v6 = vsub.f32 %v152_v3, %v153_v5  ;;  %v161_v7 = vmul.f32 %v159_v4, %v120_v34  ;;  %v425_v34 = vunpack.c.h.s8.bf16 %v377_v30 }
 0x114   :  { %v166_v8 = vrot.slane %v154_v6, %v3798_v0 }
 0x116   :  { %v168_v9 = vadd.f32 %v166_v8, %v161_v7 }
 0x118   :  { %v169_v10 = vmax.f32 %v168_v9, 0.0 }
 0x11a   :  { %v170_v11 = vpack.c.bf16 %v169_v10, %v169_v10 }
 0x11c   :  { %228 = vmatmul.mubr.bf16.vlgmr.msra.gmra.mrb[0].mxu1 %v170_v11 }
 0x11d   :  { %461 = vmatpush1.bf16.msra.mxu1 %v396_v15 }
 0x11e   :  { %462 = vmatprep.subr.bf16.mxu1 %v401_v16 }
 0x121   :  { %463 = vmatpush1.bf16.msra.mxu1 %v400_v17 }
 0x122   :  { %464 = vmatprep.subr.bf16.mxu1 %v405_v19 }
 0x125   :  { %465 = vmatpush1.bf16.msra.mxu1 %v404_v21 }
 0x126   :  { %466 = vmatprep.subr.bf16.mxu1 %v409_v22 }
 0x129   :  { %467 = vmatpush1.bf16.msra.mxu1 %v408_v23 }
 0x12a   :  { %468 = vmatprep.subr.bf16.mxu1 %v413_v25 }
 0x12d   :  { %469 = vmatpush1.bf16.msra.mxu1 %v412_v27 }
 0x12e   :  { %470 = vmatprep.subr.bf16.mxu1 %v417_v28 }
 0x131   :  { %471 = vmatpush1.bf16.msra.mxu1 %v416_v29 }
 0x132   :  { %472 = vmatprep.subr.bf16.mxu1 %v421_v31  ;;  %v275_v31 = vmul.f32 %v272_v24, %v272_v24 }
 0x135   :  { %473 = vmatpush1.bf16.msra.mxu1 %v420_v33 }
 0x136   :  { %474 = vmatprep.subr.bf16.mxu1 %v425_v34  ;;  %v3875_v34 = vsub.s32 1, %v3795_v62 }
 0x138   :  { %v284_v42 = vrot.slane %v275_v31, %v3875_v34 }
 0x139   :  { %475 = vmatpush1.bf16.msra.mxu1 %v424_v35 }
 0x13a   :  { %476 = vmatprep.subr.bf16.mxu1 %v429_v37 }
 0x13d   :  { %477 = vmatpush1.bf16.msra.mxu1 %v428_v39 }
 0x13e   :  { %478 = vmatprep.subr.bf16.mxu1 %v433_v40  ;;  %v280_v40 = vrot.slane %v275_v31, %v3798_v0 }
 0x141   :  { %479 = vmatpush1.bf16.msra.mxu1 %v432_v41 }
 0x142   :  { %480 = vmatprep.subr.bf16.mxu1 %v437_v43 }
 0x145   :  { %481 = vmatpush1.bf16.msra.mxu1 %v436_v45 }
 0x146   :  { %482 = vmatprep.subr.bf16.mxu1 %v441_v46 }
 0x149   :  { %483 = vmatpush1.bf16.msra.mxu1 %v440_v47 }
 0x14a   :  { %484 = vmatprep.subr.bf16.mxu1 %v445_v49  ;;  %v3649_v49 = vmov 1966171168  }
 0x14b   :  { %v297_v50 = vunpack.c.l.s4 %v3649_v49  ;;  %v386_v49 = vld [vmem:[%s5435_s9 + $0xb0] sm:$0xff] }
 0x14d   :  { %485 = vmatpush1.bf16.msra.mxu1 %v444_v51  ;;  %v298_v51 = vunpack.c.0.s8 %v297_v50  ;;  %v438_v50 = vunpack.c.l.s8.bf16 %v386_v49 }
 0x14e   :  { %486 = vmatprep.subr.bf16.mxu1 %v449_v52 }
 0x14f   :  { %v3880_v53 = vsub.s32 %v298_v51, %v3795_v62 }
 0x151   :  { %487 = vmatpush1.bf16.msra.mxu1 %v448_v54 }
 0x152   :  { %488 = vmatprep.subr.bf16.mxu1 %v453_v55  ;;  %v273_v55 = vld [vmem:[%s5433_s7] sm:$0x3] }
 0x155   :  { %489 = vmatpush1.bf16.msra.mxu1 %v452_v57  ;;  %v274_v57 = vmul.f32 %v273_v55, %v272_v24 }
 0x156   :  { %490 = vmatprep.subr.bf16.mxu1 %v457_v58 }
 0x159   :  { %491 = vmatpush1.bf16.msra.mxu1 %v456_v59 }
 0x15a   :  { %501 = vmatprep.subr.bf16.mxu1 %v399_v61 }
 0x1ef   :  { %v3859_v63 = vpop.f32.mrb[0].mxu1 }
 0x1f0   :  { %v236_v1 = vrot.slane %v3859_v63, 4  ;;  %v250_v2 = vmul.f32 %v3859_v63, %v3859_v63  ;;  %v3864_v3 = vpop.f32.mrb[1].mxu1 }
 0x1f1   :  { %v242_v4 = vrot.slane %v3864_v3, 4  ;;  %v251_v5 = vmul.f32 %v3864_v3, %v3864_v3  ;;  %v233_v6 = vpop.f32.mrb[2].mxu1 }
 0x1f2   :  { %v237_v7 = vadd.f32 %v236_v1, %v3859_v63  ;;  %v252_v8 = vrot.slane %v250_v2, 4  ;;  %v234_v9 = vpop.f32.mrb[3].mxu1 }
 0x1f3   :  { %v243_v10 = vadd.f32 %v242_v4, %v3864_v3  ;;  %v258_v11 = vrot.slane %v251_v5, 4 }
 0x1f4   :  { %v238_v12 = vrot.slane %v237_v7, 2  ;;  %v253_v13 = vadd.f32 %v252_v8, %v250_v2 }
 0x1f5   :  { %v244_v14 = vrot.slane %v243_v10, 2  ;;  %v259_v15 = vadd.f32 %v258_v11, %v251_v5 }
 0x1f6   :  { %v239_v16 = vadd.f32 %v238_v12, %v237_v7  ;;  %v254_v17 = vrot.slane %v253_v13, 2 }
 0x1f7   :  { %v245_v18 = vadd.f32 %v244_v14, %v243_v10  ;;  %v260_v19 = vrot.slane %v259_v15, 2  ;;  %v312_v10 = vld [vmem:[%s5434_s8] sm:$0x3] }
 0x1f8   :  { %v240_v20 = vrot.slane %v239_v16, 1  ;;  %v255_v21 = vadd.f32 %v254_v17, %v253_v13 }
 0x1f9   :  { %v246_v22 = vrot.slane %v245_v18, 1  ;;  %v261_v23 = vadd.f32 %v260_v19, %v259_v15 }
 0x1fa   :  { %v241_v25 = vadd.f32 %v240_v20, %v239_v16  ;;  %v256_v26 = vrot.slane %v255_v21, 1 }
 0x1fb   :  { %v247_v27 = vadd.f32 %v246_v22, %v245_v18  ;;  %v262_v28 = vrot.slane %v261_v23, 1  ;;  %v371_v22 = vld [vmem:[%s5435_s9 + $0x38] sm:$0xff] }
 0x1fc   :  { %v248_v29 = vmul.f32 0.125, %v241_v25  ;;  %v257_v30 = vadd.f32 %v256_v26, %v255_v21  ;;  %v403_v21 = vunpack.c.h.s8.bf16 %v3856_v60  ;;  %v407_v24 = vunpack.c.l.s8.bf16 %v371_v22  ;;  %v370_v25 = vld [vmem:[%s5435_s9 + $0x30] sm:$0xff] }
 0x1fd   :  { %v249_v32 = vmul.f32 0.125, %v247_v27  ;;  %v263_v33 = vadd.f32 %v262_v28, %v261_v23  ;;  %v406_v26 = vunpack.c.l.s8.bf16 %v370_v25  ;;  %v411_v60 = vunpack.c.h.s8.bf16 %v371_v22  ;;  %v375_v27 = vld [vmem:[%s5435_s9 + $0x58] sm:$0xff]  ;;  %v784_v22 = vld [vmem:[%s5439_s13 + $0x50] sm:$0xff] }
 0x1fe   :  { %v264_v35 = vmul.f32 0.125, %v257_v30  ;;  %v266_v36 = vmul.f32 %v248_v29, %v248_v29  ;;  %v410_v28 = vunpack.c.h.s8.bf16 %v370_v25  ;;  %v374_v30 = vld [vmem:[%s5435_s9 + $0x50] sm:$0xff] }
 0x1ff   :  { %v265_v37 = vmul.f32 0.125, %v263_v33  ;;  %v267_v38 = vmul.f32 %v249_v32, %v249_v32  ;;  %v414_v31 = vunpack.c.l.s8.bf16 %v374_v30  ;;  %v379_v33 = vld [vmem:[%s5435_s9 + $0x78] sm:$0xff] }
 0x200   :  { %v268_v39 = vsub.f32 %v264_v35, %v266_v36  ;;  %v418_v35 = vunpack.c.h.s8.bf16 %v374_v30  ;;  %v423_v36 = vunpack.c.l.s8.bf16 %v379_v33 }
 0x201   :  { %v269_v41 = vsub.f32 %v265_v37, %v267_v38  ;;  %v378_v37 = vld [vmem:[%s5435_s9 + $0x70] sm:$0xff] }
 0x202   :  { %v270_v43 = vmax.f32 %v268_v39, 0.0  ;;  %v422_v38 = vunpack.c.l.s8.bf16 %v378_v37  ;;  %v427_v39 = vunpack.c.h.s8.bf16 %v379_v33  ;;  %v792_v33 = vld [vmem:[%s5439_s13 + $0x90] sm:$0xff] }
 0x203   :  { %v271_v44 = vmax.f32 %v269_v41, 0.0  ;;  %v426_v41 = vunpack.c.h.s8.bf16 %v378_v37 }
 0x204   :  { %v287_v45 = vmul.f32 %v280_v40, %v270_v43  ;;  %v383_v40 = vld [vmem:[%s5435_s9 + $0x98] sm:$0xff]  ;;  %v382_v43 = vld [vmem:[%s5435_s9 + $0x90] sm:$0xff] }
 0x205   :  { %v288_v46 = vmul.f32 %v284_v42, %v271_v44  ;;  %v431_v42 = vunpack.c.l.s8.bf16 %v383_v40  ;;  %v430_v44 = vunpack.c.l.s8.bf16 %v382_v43 }
 0x206   :  { %v289_v47 = vadd.f32 1e-05, %v287_v45  ;;  %v435_v45 = vunpack.c.h.s8.bf16 %v383_v40  ;;  %v944_v40 = vunpack.c.h.s8.bf16 %v792_v33 }
 0x207   :  { %v290_v48 = vadd.f32 1e-05, %v288_v46  ;;  %v387_v46 = vld [vmem:[%s5435_s9 + $0xb8] sm:$0xff] }
 0x208   :  { %3566 = vrsqrt.f32 %v289_v47  ;;  %v434_v47 = vunpack.c.h.s8.bf16 %v382_v43  ;;  %v443_v51 = vunpack.c.h.s8.bf16 %v387_v46 }
 0x209   :  { %3568 = vrsqrt.f32 %v290_v48  ;;  %v439_v48 = vunpack.c.l.s8.bf16 %v387_v46  ;;  %v800_v46 = vld [vmem:[%s5439_s13 + $0xd0] sm:$0xff] }
 0x212   :  { %v3567_v52 = vpop.eup %3566 }
 0x213   :  { %v3569_v54 = vpop.eup %3568 }
 0x214   :  { %v295_v56 = vcombine.low %v3567_v52, %v3569_v54  ;;  %v391_v52 = vld [vmem:[%s5435_s9 + $0xd8] sm:$0xff]  ;;  %v442_v54 = vunpack.c.h.s8.bf16 %v386_v49 }
 0x215   :  { %v447_v55 = vunpack.c.l.s8.bf16 %v391_v52 }
 0x216   :  { %v302_v58 = vrot.slane %v295_v56, %v3880_v53  ;;  %v390_v56 = vld [vmem:[%s5435_s9 + $0xd0] sm:$0xff] }
 0x218   :  { %v309_v59 = vrot.slane %v302_v58, %v3880_v53  ;;  %v451_v58 = vunpack.c.h.s8.bf16 %v391_v52  ;;  %v960_v52 = vunpack.c.h.s8.bf16 %v800_v46 }
 0x21a   :  { %v311_v61 = vmul.f32 %v309_v59, %v274_v57  ;;  %v446_v57 = vunpack.c.l.s8.bf16 %v390_v56  ;;  %v395_v59 = vld [vmem:[%s5435_s9 + $0xf8] sm:$0xff] }
 0x21c   :  { %v317_v1 = vrot.slane %v311_v61, %v3798_v0  ;;  %v321_v2 = vrot.slane %v311_v61, %v3875_v34  ;;  %v450_v61 = vunpack.c.h.s8.bf16 %v390_v56 }
 0x21e   :  { %v324_v4 = vmul.f32 %v317_v1, %v248_v29  ;;  %v325_v5 = vmul.f32 %v321_v2, %v249_v32  ;;  %v346_v6 = vmul.f32 %v321_v2, %v3864_v3  ;;  %v345_v7 = vmul.f32 %v317_v1, %v3859_v63  ;;  %v366_v63 = vld [vmem:[%s5435_s9 + $0x10] sm:$0xff] }
 0x21f   :  { %v398_v20 = vunpack.c.l.s8.bf16 %v366_v63  ;;  %v402_v23 = vunpack.c.h.s8.bf16 %v366_v63  ;;  %v415_v29 = vunpack.c.l.s8.bf16 %v375_v27  ;;  %v419_v32 = vunpack.c.h.s8.bf16 %v375_v27  ;;  %v394_v2 = vld [vmem:[%s5435_s9 + $0xf0] sm:$0xff] }
 0x220   :  { %v328_v8 = vcombine.low %v324_v4, %v325_v5  ;;  %v455_v1 = vunpack.c.l.s8.bf16 %v395_v59  ;;  %v454_v4 = vunpack.c.l.s8.bf16 %v394_v2  ;;  %v459_v5 = vunpack.c.h.s8.bf16 %v395_v59  ;;  %v808_v59 = vld [vmem:[%s5439_s13 + $0x110] sm:$0xff] }
 0x221   :  { %v928_v27 = vunpack.c.h.s8.bf16 %v784_v22 }
 0x222   :  { %v335_v9 = vrot.slane %v328_v8, %v3880_v53  ;;  %v777_v8 = vld [vmem:[%s5439_s13 + $0x18] sm:$0xff] }
 0x224   :  { %v342_v11 = vrot.slane %v335_v9, %v3880_v53 }
 0x226   :  { %v344_v12 = vsub.f32 %v312_v10, %v342_v11  ;;  %v905_v10 = vunpack.c.l.s8.bf16 %v777_v8  ;;  %v774_v11 = vld [vmem:[%s5439_s13] sm:$0xff] }
 0x227   :  { %v910_v63 = vunpack.c.h.s8.bf16 %v774_v11 }
 0x228   :  { %v355_v13 = vrot.slane %v344_v12, %v3875_v34  ;;  %v351_v14 = vrot.slane %v344_v12, %v3798_v0  ;;  %v776_v12 = vld [vmem:[%s5439_s13 + $0x10] sm:$0xff] }
 0x22a   :  { %v359_v15 = vadd.f32 %v355_v13, %v346_v6  ;;  %v358_v16 = vadd.f32 %v351_v14, %v345_v7  ;;  %v458_v6 = vunpack.c.h.s8.bf16 %v394_v2  ;;  %v775_v7 = vld [vmem:[%s5439_s13 + $0x8] sm:$0xff]  ;;  %v902_v13 = vunpack.c.l.s8.bf16 %v774_v11  ;;  %v814_v11 = vld [vmem:[%s5439_s13 + $0x140] sm:$0xff] }
 0x22b   :  { %v903_v9 = vunpack.c.l.s8.bf16 %v775_v7  ;;  %v904_v14 = vunpack.c.l.s8.bf16 %v776_v12 }
 0x22c   :  { %v361_v3 = vmax.f32 %v359_v15, 0.0  ;;  %v360_v17 = vmax.f32 %v358_v16, 0.0  ;;  %v911_v15 = vunpack.c.h.s8.bf16 %v775_v7  ;;  %v913_v16 = vunpack.c.h.s8.bf16 %v777_v8  ;;  %v815_v7 = vld [vmem:[%s5439_s13 + $0x148] sm:$0xff]  ;;  %v817_v8 = vld [vmem:[%s5439_s13 + $0x158] sm:$0xff] }
 0x22d   :  { %1158 = vmatprep.subr.bf16.mxu0 %v903_v9  ;;  %v983_v9 = vunpack.c.l.s8.bf16 %v815_v7 }
 0x22e   :  { %v363_v18 = vpack.c.bf16 %v361_v3, %v361_v3  ;;  %v3901_v19 = vpack.c.bf16 %v360_v17, %v360_v17  ;;  %1159 = vmatpush1.bf16.msra.mxu0 %v902_v13  ;;  %v912_v3 = vunpack.c.h.s8.bf16 %v776_v12  ;;  %v783_v17 = vld [vmem:[%s5439_s13 + $0x48] sm:$0xff]  ;;  %v816_v12 = vld [vmem:[%s5439_s13 + $0x150] sm:$0xff]  ;;  %v982_v13 = vunpack.c.l.s8.bf16 %v814_v11 }
 0x22f   :  { %1160 = vmatprep.subr.bf16.mxu0 %v911_v15  ;;  %v927_v25 = vunpack.c.h.s8.bf16 %v783_v17  ;;  %v991_v15 = vunpack.c.h.s8.bf16 %v815_v7 }
 0x230   :  { %492 = vmatprep.mubr.bf16.mxu1 %v363_v18 }
 0x231   :  { %493 = vmatmul.mubr.bf16.vlgmr.msra.gmra.mrb[4].mxu1 %v3901_v19 }
 0x232   :  { %502 = vmatpush1.bf16.msra.mxu1 %v398_v20  ;;  %533 = vmatprep.mubr.bf16.mxu1 %v363_v18  ;;  %v785_v18 = vld [vmem:[%s5439_s13 + $0x58] sm:$0xff] }
 0x233   :  { %503 = vmatprep.subr.bf16.mxu1 %v403_v21  ;;  %1161 = vmatpush1.bf16.msra.mxu0 %v910_v63  ;;  %v921_v20 = vunpack.c.l.s8.bf16 %v785_v18  ;;  %v782_v21 = vld [vmem:[%s5439_s13 + $0x40] sm:$0xff]  ;;  %v990_v63 = vunpack.c.h.s8.bf16 %v814_v11 }
 0x236   :  { %504 = vmatpush1.bf16.msra.mxu1 %v402_v23  ;;  %v918_v23 = vunpack.c.l.s8.bf16 %v782_v21 }
 0x237   :  { %505 = vmatprep.subr.bf16.mxu1 %v407_v24  ;;  %v920_v24 = vunpack.c.l.s8.bf16 %v784_v22  ;;  %v824_v22 = vld [vmem:[%s5439_s13 + $0x190] sm:$0xff] }
 0x23a   :  { %506 = vmatpush1.bf16.msra.mxu1 %v406_v26  ;;  %v929_v26 = vunpack.c.h.s8.bf16 %v785_v18  ;;  %v825_v18 = vld [vmem:[%s5439_s13 + $0x198] sm:$0xff] }
 0x23b   :  { %507 = vmatprep.subr.bf16.mxu1 %v411_v60  ;;  %v926_v60 = vunpack.c.h.s8.bf16 %v782_v21  ;;  %v822_v21 = vld [vmem:[%s5439_s13 + $0x180] sm:$0xff] }
 0x23e   :  { %508 = vmatpush1.bf16.msra.mxu1 %v410_v28  ;;  %v791_v28 = vld [vmem:[%s5439_s13 + $0x88] sm:$0xff] }
 0x23f   :  { %509 = vmatprep.subr.bf16.mxu1 %v415_v29  ;;  %v793_v29 = vld [vmem:[%s5439_s13 + $0x98] sm:$0xff]  ;;  %v935_v30 = vunpack.c.l.s8.bf16 %v791_v28  ;;  %v943_v37 = vunpack.c.h.s8.bf16 %v791_v28  ;;  %v831_v28 = vld [vmem:[%s5439_s13 + $0x1c8] sm:$0xff] }
 0x242   :  { %510 = vmatpush1.bf16.msra.mxu1 %v414_v31  ;;  %v937_v31 = vunpack.c.l.s8.bf16 %v793_v29 }
 0x243   :  { %511 = vmatprep.subr.bf16.mxu1 %v419_v32  ;;  %v790_v32 = vld [vmem:[%s5439_s13 + $0x80] sm:$0xff] }
 0x246   :  { %512 = vmatpush1.bf16.msra.mxu1 %v418_v35  ;;  %v934_v35 = vunpack.c.l.s8.bf16 %v790_v32 }
 0x247   :  { %513 = vmatprep.subr.bf16.mxu1 %v423_v36  ;;  %v936_v36 = vunpack.c.l.s8.bf16 %v792_v33  ;;  %v832_v33 = vld [vmem:[%s5439_s13 + $0x1d0] sm:$0xff] }
 0x24a   :  { %514 = vmatpush1.bf16.msra.mxu1 %v422_v38  ;;  %v945_v38 = vunpack.c.h.s8.bf16 %v793_v29  ;;  %v833_v29 = vld [vmem:[%s5439_s13 + $0x1d8] sm:$0xff] }
 0x24b   :  { %515 = vmatprep.subr.bf16.mxu1 %v427_v39  ;;  %v942_v39 = vunpack.c.h.s8.bf16 %v790_v32  ;;  %v830_v32 = vld [vmem:[%s5439_s13 + $0x1c0] sm:$0xff] }
 0x24e   :  { %516 = vmatpush1.bf16.msra.mxu1 %v426_v41  ;;  %v799_v41 = vld [vmem:[%s5439_s13 + $0xc8] sm:$0xff] }
 0x24f   :  { %517 = vmatprep.subr.bf16.mxu1 %v431_v42  ;;  %v801_v42 = vld [vmem:[%s5439_s13 + $0xd8] sm:$0xff]  ;;  %v951_v43 = vunpack.c.l.s8.bf16 %v799_v41  ;;  %v959_v49 = vunpack.c.h.s8.bf16 %v799_v41 }
 0x252   :  { %518 = vmatpush1.bf16.msra.mxu1 %v430_v44  ;;  %v953_v44 = vunpack.c.l.s8.bf16 %v801_v42 }
 0x253   :  { %519 = vmatprep.subr.bf16.mxu1 %v435_v45  ;;  %v798_v45 = vld [vmem:[%s5439_s13 + $0xc0] sm:$0xff] }
 0x256   :  { %520 = vmatpush1.bf16.msra.mxu1 %v434_v47  ;;  %v950_v47 = vunpack.c.l.s8.bf16 %v798_v45 }
 0x257   :  { %521 = vmatprep.subr.bf16.mxu1 %v439_v48  ;;  %v952_v48 = vunpack.c.l.s8.bf16 %v800_v46 }
 0x25a   :  { %522 = vmatpush1.bf16.msra.mxu1 %v438_v50  ;;  %v961_v50 = vunpack.c.h.s8.bf16 %v801_v42 }
 0x25b   :  { %523 = vmatprep.subr.bf16.mxu1 %v443_v51  ;;  %v958_v51 = vunpack.c.h.s8.bf16 %v798_v45 }
 0x25e   :  { %524 = vmatpush1.bf16.msra.mxu1 %v442_v54  ;;  %v807_v54 = vld [vmem:[%s5439_s13 + $0x108] sm:$0xff] }
 0x25f   :  { %525 = vmatprep.subr.bf16.mxu1 %v447_v55  ;;  %v809_v55 = vld [vmem:[%s5439_s13 + $0x118] sm:$0xff]  ;;  %v967_v56 = vunpack.c.l.s8.bf16 %v807_v54  ;;  %v975_v2 = vunpack.c.h.s8.bf16 %v807_v54 }
 0x262   :  { %526 = vmatpush1.bf16.msra.mxu1 %v446_v57  ;;  %v969_v57 = vunpack.c.l.s8.bf16 %v809_v55 }
 0x263   :  { %527 = vmatprep.subr.bf16.mxu1 %v451_v58  ;;  %v806_v58 = vld [vmem:[%s5439_s13 + $0x100] sm:$0xff] }
 0x266   :  { %528 = vmatpush1.bf16.msra.mxu1 %v450_v61  ;;  %v966_v61 = vunpack.c.l.s8.bf16 %v806_v58 }
 0x267   :  { %529 = vmatprep.subr.bf16.mxu1 %v455_v1  ;;  %v968_v1 = vunpack.c.l.s8.bf16 %v808_v59 }
 0x26a   :  { %530 = vmatpush1.bf16.msra.mxu1 %v454_v4  ;;  %v977_v4 = vunpack.c.h.s8.bf16 %v809_v55 }
 0x26b   :  { %531 = vmatprep.subr.bf16.mxu1 %v459_v5  ;;  %v974_v5 = vunpack.c.h.s8.bf16 %v806_v58 }
 0x26e   :  { %532 = vmatpush1.bf16.msra.mxu1 %v458_v6  ;;  %v976_v6 = vunpack.c.h.s8.bf16 %v808_v59 }
 0x26f   :  { %1240 = vmatprep.subr.bf16.mxu1 %v905_v10  ;;  %v985_v10 = vunpack.c.l.s8.bf16 %v817_v8 }
 0x271   :  { %534 = vmatmul.mubr.bf16.vlgmr.msra.gmra.mrb[8].mxu1 %v3901_v19  ;;  %v919_v19 = vunpack.c.l.s8.bf16 %v783_v17  ;;  %v823_v17 = vld [vmem:[%s5439_s13 + $0x188] sm:$0xff] }
 0x272   :  { %1241 = vmatpush1.bf16.msra.mxu1 %v904_v14  ;;  %v984_v14 = vunpack.c.l.s8.bf16 %v816_v12 }
 0x273   :  { %1242 = vmatprep.subr.bf16.mxu1 %v913_v16  ;;  %1162 = vmatprep.subr.bf16.mxu0 %v919_v19  ;;  %v993_v16 = vunpack.c.h.s8.bf16 %v817_v8  ;;  %v999_v19 = vunpack.c.l.s8.bf16 %v823_v17 }
 0x274   :  { %1163 = vmatpush1.bf16.msra.mxu0 %v918_v23  ;;  %v998_v23 = vunpack.c.l.s8.bf16 %v822_v21 }
 0x275   :  { %1164 = vmatprep.subr.bf16.mxu0 %v927_v25  ;;  %v1007_v25 = vunpack.c.h.s8.bf16 %v823_v17 }
 0x276   :  { %1243 = vmatpush1.bf16.msra.mxu1 %v912_v3  ;;  %v992_v3 = vunpack.c.h.s8.bf16 %v816_v12 }
 0x277   :  { %1244 = vmatprep.subr.bf16.mxu1 %v921_v20  ;;  %v1001_v20 = vunpack.c.l.s8.bf16 %v825_v18 }
 0x278   :  { %1165 = vmatpush1.bf16.msra.mxu0 %v926_v60  ;;  %v1006_v60 = vunpack.c.h.s8.bf16 %v822_v21 }
 0x279   :  { %1166 = vmatprep.subr.bf16.mxu0 %v935_v30  ;;  %v1015_v30 = vunpack.c.l.s8.bf16 %v831_v28 }
 0x27a   :  { %1245 = vmatpush1.bf16.msra.mxu1 %v920_v24  ;;  %v1000_v24 = vunpack.c.l.s8.bf16 %v824_v22 }
 0x27b   :  { %1246 = vmatprep.subr.bf16.mxu1 %v929_v26  ;;  %v1009_v26 = vunpack.c.h.s8.bf16 %v825_v18 }
 0x27c   :  { %1167 = vmatpush1.bf16.msra.mxu0 %v934_v35  ;;  %v1014_v35 = vunpack.c.l.s8.bf16 %v830_v32 }
 0x27d   :  { %1168 = vmatprep.subr.bf16.mxu0 %v943_v37  ;;  %v1023_v37 = vunpack.c.h.s8.bf16 %v831_v28 }
 0x27e   :  { %1247 = vmatpush1.bf16.msra.mxu1 %v928_v27  ;;  %v1008_v27 = vunpack.c.h.s8.bf16 %v824_v22 }
 0x27f   :  { %1248 = vmatprep.subr.bf16.mxu1 %v937_v31  ;;  %v1017_v31 = vunpack.c.l.s8.bf16 %v833_v29 }
 0x280   :  { %1169 = vmatpush1.bf16.msra.mxu0 %v942_v39  ;;  %v1022_v39 = vunpack.c.h.s8.bf16 %v830_v32 }
 0x281   :  { %1170 = vmatprep.subr.bf16.mxu0 %v951_v43 }
 0x282   :  { %1249 = vmatpush1.bf16.msra.mxu1 %v936_v36  ;;  %v1016_v36 = vunpack.c.l.s8.bf16 %v832_v33 }
 0x283   :  { %1250 = vmatprep.subr.bf16.mxu1 %v945_v38  ;;  %v1025_v38 = vunpack.c.h.s8.bf16 %v833_v29 }
 0x284   :  { %1171 = vmatpush1.bf16.msra.mxu0 %v950_v47 }
 0x285   :  { %1172 = vmatprep.subr.bf16.mxu0 %v959_v49 }
 0x286   :  { %1251 = vmatpush1.bf16.msra.mxu1 %v944_v40  ;;  %v1024_v40 = vunpack.c.h.s8.bf16 %v832_v33 }
 0x287   :  { %1252 = vmatprep.subr.bf16.mxu1 %v953_v44 }
 0x288   :  { %1173 = vmatpush1.bf16.msra.mxu0 %v958_v51  ;;  %v4058_v51 = vld [vmem:[%s5439_s13 + $0x208] sm:$0xff] }
 0x289   :  { %1174 = vmatprep.subr.bf16.mxu0 %v967_v56  ;;  %v1031_v56 = vunpack.c.l.s8.bf16 %v4058_v51 }
 0x28a   :  { %1253 = vmatpush1.bf16.msra.mxu1 %v952_v48 }
 0x28b   :  { %1254 = vmatprep.subr.bf16.mxu1 %v961_v50 }
 0x28c   :  { %1175 = vmatpush1.bf16.msra.mxu0 %v966_v61 }
 0x28d   :  { %1176 = vmatprep.subr.bf16.mxu0 %v975_v2 }
 0x28e   :  { %1255 = vmatpush1.bf16.msra.mxu1 %v960_v52  ;;  %v4063_v52 = vld [vmem:[%s5439_s13 + $0x218] sm:$0xff] }
 0x28f   :  { %1256 = vmatprep.subr.bf16.mxu1 %v969_v57  ;;  %v1033_v57 = vunpack.c.l.s8.bf16 %v4063_v52 }
 0x290   :  { %1177 = vmatpush1.bf16.msra.mxu0 %v974_v5 }
 0x291   :  { %1178 = vmatprep.subr.bf16.mxu0 %v983_v9  ;;  %v4071_v9 = vld [vmem:[%s5436_s10] sm:$0xf] }
 0x292   :  { %1257 = vmatpush1.bf16.msra.mxu1 %v968_v1 }
 0x293   :  { %1258 = vmatprep.subr.bf16.mxu1 %v977_v4 }
 0x294   :  { %1179 = vmatpush1.bf16.msra.mxu0 %v982_v13 }
 0x295   :  { %1180 = vmatprep.subr.bf16.mxu0 %v991_v15 }
 0x296   :  { %1259 = vmatpush1.bf16.msra.mxu1 %v976_v6 }
 0x297   :  { %1260 = vmatprep.subr.bf16.mxu1 %v985_v10 }
 0x298   :  { %1181 = vmatpush1.bf16.msra.mxu0 %v990_v63 }
 0x299   :  { %1182 = vmatprep.subr.bf16.mxu0 %v999_v19 }
 0x29a   :  { %1261 = vmatpush1.bf16.msra.mxu1 %v984_v14 }
 0x29b   :  { %1262 = vmatprep.subr.bf16.mxu1 %v993_v16 }
 0x29c   :  { %1183 = vmatpush1.bf16.msra.mxu0 %v998_v23 }
 0x29d   :  { %1184 = vmatprep.subr.bf16.mxu0 %v1007_v25 }
 0x29e   :  { %1263 = vmatpush1.bf16.msra.mxu1 %v992_v3  ;;  %v4077_v3 = vmul.f32 %v4071_v9, %v4071_v9 }
 0x29f   :  { %1264 = vmatprep.subr.bf16.mxu1 %v1001_v20 }
 0x2a0   :  { %1185 = vmatpush1.bf16.msra.mxu0 %v1006_v60 }
 0x2a1   :  { %1186 = vmatprep.subr.bf16.mxu0 %v1015_v30 }
 0x2a2   :  { %1265 = vmatpush1.bf16.msra.mxu1 %v1000_v24  ;;  %v622_v24 = vrot.slane %v4077_v3, %v3798_v0 }
 0x2a3   :  { %1266 = vmatprep.subr.bf16.mxu1 %v1009_v26  ;;  %v626_v26 = vrot.slane %v4077_v3, %v3875_v34 }
 0x2a4   :  { %1187 = vmatpush1.bf16.msra.mxu0 %v1014_v35 }
 0x2a5   :  { %1188 = vmatprep.subr.bf16.mxu0 %v1023_v37 }
 0x2a6   :  { %1267 = vmatpush1.bf16.msra.mxu1 %v1008_v27 }
 0x2a7   :  { %1268 = vmatprep.subr.bf16.mxu1 %v1017_v31 }
 0x2a8   :  { %1189 = vmatpush1.bf16.msra.mxu0 %v1022_v39 }
 0x2a9   :  { %1199 = vmatprep.subr.bf16.mxu0 %v1031_v56 }
 0x2aa   :  { %1269 = vmatpush1.bf16.msra.mxu1 %v1016_v36 }
 0x2ab   :  { %1270 = vmatprep.subr.bf16.mxu1 %v1025_v38 }
 0x2ae   :  { %1271 = vmatpush1.bf16.msra.mxu1 %v1024_v40 }
 0x2af   :  { %1281 = vmatprep.subr.bf16.mxu1 %v1033_v57 }
 0x304   :  { %v4044_v41 = vpop.f32.mrb[4].mxu1 }
 0x305   :  { %v542_v42 = vrot.slane %v4044_v41, 4  ;;  %v570_v43 = vmul.f32 %v4044_v41, %v4044_v41  ;;  %v4049_v44 = vpop.f32.mrb[5].mxu1 }
 0x306   :  { %v548_v45 = vrot.slane %v4049_v44, 4  ;;  %v571_v46 = vmul.f32 %v4049_v44, %v4049_v44  ;;  %v498_v47 = vpop.f32.mrb[6].mxu1 }
 0x307   :  { %v543_v48 = vadd.f32 %v542_v42, %v4044_v41  ;;  %v574_v49 = vrot.slane %v570_v43, 4  ;;  %v499_v50 = vpop.f32.mrb[7].mxu1 }
 0x308   :  { %v549_v54 = vadd.f32 %v548_v45, %v4049_v44  ;;  %v580_v55 = vrot.slane %v571_v46, 4 }
 0x309   :  { %v544_v58 = vrot.slane %v543_v48, 2  ;;  %v575_v59 = vadd.f32 %v574_v49, %v570_v43 }
 0x30a   :  { %v550_v61 = vrot.slane %v549_v54, 2  ;;  %v581_v1 = vadd.f32 %v580_v55, %v571_v46 }
 0x30b   :  { %v545_v2 = vadd.f32 %v544_v58, %v543_v48  ;;  %v576_v4 = vrot.slane %v575_v59, 2 }
 0x30c   :  { %v551_v5 = vadd.f32 %v550_v61, %v549_v54  ;;  %v582_v6 = vrot.slane %v581_v1, 2 }
 0x30d   :  { %v546_v7 = vrot.slane %v545_v2, 1  ;;  %v577_v8 = vadd.f32 %v576_v4, %v575_v59 }
 0x30e   :  { %v552_v10 = vrot.slane %v551_v5, 1  ;;  %v583_v11 = vadd.f32 %v582_v6, %v581_v1 }
 0x30f   :  { %v547_v12 = vadd.f32 %v546_v7, %v545_v2  ;;  %v578_v13 = vrot.slane %v577_v8, 1 }
 0x310   :  { %v553_v14 = vadd.f32 %v552_v10, %v551_v5  ;;  %v584_v15 = vrot.slane %v583_v11, 1 }
 0x311   :  { %v4073_v16 = vmul.f32 0.125, %v547_v12  ;;  %v579_v63 = vadd.f32 %v578_v13, %v577_v8  ;;  %v4102_v13 = vsub.s32 2, %v3795_v62 }
 0x312   :  { %v4079_v17 = vmul.f32 0.125, %v553_v14  ;;  %v585_v18 = vadd.f32 %v584_v15, %v583_v11 }
 0x313   :  { %v598_v19 = vmul.f32 0.125, %v579_v63  ;;  %v602_v20 = vmul.f32 %v4073_v16, %v4073_v16  ;;  %v4105_v63 = vsub.s32 3, %v3795_v62 }
 0x314   :  { %v599_v21 = vmul.f32 0.125, %v585_v18  ;;  %v603_v22 = vmul.f32 %v4079_v17, %v4079_v17 }
 0x315   :  { %v606_v23 = vsub.f32 %v598_v19, %v602_v20 }
 0x316   :  { %v607_v25 = vsub.f32 %v599_v21, %v603_v22 }
 0x317   :  { %v610_v60 = vmax.f32 %v606_v23, 0.0  ;;  %v630_v23 = vrot.slane %v4077_v3, %v4102_v13 }
 0x318   :  { %v611_v27 = vmax.f32 %v607_v25, 0.0  ;;  %v634_v25 = vrot.slane %v4077_v3, %v4105_v63 }
 0x319   :  { %v639_v28 = vmul.f32 %v622_v24, %v610_v60 }
 0x31a   :  { %v640_v29 = vmul.f32 %v626_v26, %v611_v27 }
 0x31b   :  { %v643_v30 = vadd.f32 1e-05, %v639_v28 }
 0x31c   :  { %v644_v31 = vadd.f32 1e-05, %v640_v29 }
 0x31d   :  { %3570 = vrsqrt.f32 %v643_v30 }
 0x31e   :  { %3572 = vrsqrt.f32 %v644_v31 }
 0x327   :  { %v3571_v32 = vpop.eup %3570 }
 0x328   :  { %v3573_v33 = vpop.eup %3572 }
 0x329   :  { %v655_v35 = vcombine.low %v3571_v32, %v3573_v33 }
 0x344   :  { %v4089_v36 = vpop.f32.mrb[8].mxu1 }
 0x345   :  { %v554_v37 = vrot.slane %v4089_v36, 4  ;;  %v572_v38 = vmul.f32 %v4089_v36, %v4089_v36  ;;  %v4094_v39 = vpop.f32.mrb[9].mxu1 }
 0x346   :  { %v560_v40 = vrot.slane %v4094_v39, 4  ;;  %v573_v42 = vmul.f32 %v4094_v39, %v4094_v39  ;;  %v539_v43 = vpop.f32.mrb[10].mxu1 }
 0x347   :  { %v555_v45 = vadd.f32 %v554_v37, %v4089_v36  ;;  %v586_v46 = vrot.slane %v572_v38, 4  ;;  %v540_v47 = vpop.f32.mrb[11].mxu1  ;;  %v615_v37 = vld [vmem:[%s5437_s11] sm:$0xf] }
 0x348   :  { %v561_v48 = vadd.f32 %v560_v40, %v4094_v39  ;;  %v592_v49 = vrot.slane %v573_v42, 4  ;;  %v616_v3 = vmul.f32 %v615_v37, %v4071_v9 }
 0x349   :  { %v556_v50 = vrot.slane %v555_v45, 2  ;;  %v587_v54 = vadd.f32 %v586_v46, %v572_v38  ;;  %v663_v38 = vrot.slane %v655_v35, %v3880_v53 }
 0x34a   :  { %v562_v55 = vrot.slane %v561_v48, 2  ;;  %v593_v56 = vadd.f32 %v592_v49, %v573_v42 }
 0x34b   :  { %v557_v57 = vadd.f32 %v556_v50, %v555_v45  ;;  %v588_v58 = vrot.slane %v587_v54, 2 }
 0x34c   :  { %v563_v59 = vadd.f32 %v562_v55, %v561_v48  ;;  %v594_v61 = vrot.slane %v593_v56, 2 }
 0x34d   :  { %v558_v1 = vrot.slane %v557_v57, 1  ;;  %v589_v2 = vadd.f32 %v588_v58, %v587_v54 }
 0x34e   :  { %v564_v4 = vrot.slane %v563_v59, 1  ;;  %v595_v5 = vadd.f32 %v594_v61, %v593_v56 }
 0x34f   :  { %v559_v6 = vadd.f32 %v558_v1, %v557_v57  ;;  %v590_v7 = vrot.slane %v589_v2, 1 }
 0x350   :  { %v565_v8 = vadd.f32 %v564_v4, %v563_v59  ;;  %v596_v10 = vrot.slane %v595_v5, 1 }
 0x351   :  { %v568_v11 = vmul.f32 0.125, %v559_v6  ;;  %v591_v12 = vadd.f32 %v590_v7, %v589_v2 }
 0x352   :  { %v569_v14 = vmul.f32 0.125, %v565_v8  ;;  %v597_v15 = vadd.f32 %v596_v10, %v595_v5 }
 0x353   :  { %v600_v18 = vmul.f32 0.125, %v591_v12  ;;  %v604_v19 = vmul.f32 %v568_v11, %v568_v11  ;;  %v840_v12 = vld [vmem:[%s5439_s13 + $0x210] sm:$0xff] }
 0x354   :  { %v601_v20 = vmul.f32 0.125, %v597_v15  ;;  %v605_v21 = vmul.f32 %v569_v14, %v569_v14 }
 0x355   :  { %v608_v22 = vsub.f32 %v600_v18, %v604_v19 }
 0x356   :  { %v609_v24 = vsub.f32 %v601_v20, %v605_v21 }
 0x357   :  { %v612_v26 = vmax.f32 %v608_v22, 0.0  ;;  %v1032_v22 = vunpack.c.l.s8.bf16 %v840_v12 }
 0x358   :  { %v613_v60 = vmax.f32 %v609_v24, 0.0  ;;  %v1041_v24 = vunpack.c.h.s8.bf16 %v4063_v52 }
 0x359   :  { %v641_v27 = vmul.f32 %v630_v23, %v612_v26  ;;  %v1039_v23 = vunpack.c.h.s8.bf16 %v4058_v51  ;;  %v849_v26 = vld [vmem:[%s5439_s13 + $0x258] sm:$0xff]  ;;  %v1040_v51 = vunpack.c.h.s8.bf16 %v840_v12 }
 0x35a   :  { %v642_v28 = vmul.f32 %v634_v25, %v613_v60  ;;  %v847_v25 = vld [vmem:[%s5439_s13 + $0x248] sm:$0xff]  ;;  %v1057_v37 = vunpack.c.h.s8.bf16 %v849_v26 }
 0x35b   :  { %v645_v29 = vadd.f32 1e-05, %v641_v27  ;;  %v1047_v52 = vunpack.c.l.s8.bf16 %v847_v25 }
 0x35c   :  { %v646_v30 = vadd.f32 1e-05, %v642_v28  ;;  %v1049_v28 = vunpack.c.l.s8.bf16 %v849_v26  ;;  %v880_v26 = vld [vmem:[%s5439_s13 + $0x350] sm:$0xff] }
 0x35d   :  { %3574 = vrsqrt.f32 %v645_v29  ;;  %v846_v29 = vld [vmem:[%s5439_s13 + $0x240] sm:$0xff] }
 0x35e   :  { %3576 = vrsqrt.f32 %v646_v30  ;;  %v848_v30 = vld [vmem:[%s5439_s13 + $0x250] sm:$0xff] }
 0x367   :  { %v3575_v31 = vpop.eup %3574 }
 0x368   :  { %v3577_v32 = vpop.eup %3576 }
 0x369   :  { %v656_v33 = vcombine.low %v3575_v31, %v3577_v32  ;;  %v1046_v31 = vunpack.c.l.s8.bf16 %v846_v29  ;;  %v1048_v32 = vunpack.c.l.s8.bf16 %v848_v30 }
 0x36b   :  { %v670_v40 = vrot.slane %v656_v33, %v3880_v53  ;;  %v1055_v33 = vunpack.c.h.s8.bf16 %v847_v25  ;;  %v878_v25 = vld [vmem:[%s5439_s13 + $0x340] sm:$0xff] }
 0x36d   :  { %v671_v42 = vcombine.low %v663_v38, %v670_v40  ;;  %v855_v38 = vld [vmem:[%s5439_s13 + $0x288] sm:$0xff]  ;;  %v857_v40 = vld [vmem:[%s5439_s13 + $0x298] sm:$0xff] }
 0x36f   :  { %v678_v43 = vrot.slane %v671_v42, %v3880_v53  ;;  %v1056_v42 = vunpack.c.h.s8.bf16 %v848_v30  ;;  %v889_v30 = vld [vmem:[%s5439_s13 + $0x398] sm:$0xff] }
 0x371   :  { %v680_v45 = vmul.f32 %v678_v43, %v616_v3  ;;  %v1054_v3 = vunpack.c.h.s8.bf16 %v846_v29  ;;  %v1063_v43 = vunpack.c.l.s8.bf16 %v855_v38  ;;  %v887_v29 = vld [vmem:[%s5439_s13 + $0x388] sm:$0xff] }
 0x373   :  { %v686_v46 = vrot.slane %v680_v45, %v3798_v0  ;;  %v690_v47 = vrot.slane %v680_v45, %v3875_v34  ;;  %v694_v48 = vrot.slane %v680_v45, %v4102_v13  ;;  %v698_v49 = vrot.slane %v680_v45, %v4105_v63 }
 0x374   :  { %v1065_v45 = vunpack.c.l.s8.bf16 %v857_v40 }
 0x375   :  { %v703_v50 = vmul.f32 %v686_v46, %v4073_v16  ;;  %v704_v35 = vmul.f32 %v690_v47, %v4079_v17  ;;  %v705_v54 = vmul.f32 %v694_v48, %v568_v11  ;;  %v706_v55 = vmul.f32 %v698_v49, %v569_v14  ;;  %v681_v16 = vld [vmem:[%s5438_s12] sm:$0xf] }
 0x376   :  { %v740_v9 = vmul.f32 %v698_v49, %v4094_v39  ;;  %v738_v56 = vmul.f32 %v690_v47, %v4049_v44  ;;  %v737_v57 = vmul.f32 %v686_v46, %v4044_v41  ;;  %v739_v58 = vmul.f32 %v694_v48, %v4089_v36  ;;  %v838_v11 = vld [vmem:[%s5439_s13 + $0x200] sm:$0xff]  ;;  %v856_v47 = vld [vmem:[%s5439_s13 + $0x290] sm:$0xff] }
 0x377   :  { %v711_v59 = vcombine.low %v703_v50, %v704_v35  ;;  %v712_v61 = vcombine.low %v705_v54, %v706_v55  ;;  %v1030_v21 = vunpack.c.l.s8.bf16 %v838_v11  ;;  %v1038_v27 = vunpack.c.h.s8.bf16 %v838_v11  ;;  %v854_v46 = vld [vmem:[%s5439_s13 + $0x280] sm:$0xff]  ;;  %v863_v54 = vld [vmem:[%s5439_s13 + $0x2c8] sm:$0xff]  ;;  %v865_v55 = vld [vmem:[%s5439_s13 + $0x2d8] sm:$0xff] }
 0x378   :  { %v1062_v48 = vunpack.c.l.s8.bf16 %v854_v46  ;;  %v1064_v49 = vunpack.c.l.s8.bf16 %v856_v47  ;;  %v1071_v50 = vunpack.c.h.s8.bf16 %v855_v38  ;;  %v1073_v35 = vunpack.c.h.s8.bf16 %v857_v40  ;;  %v886_v38 = vld [vmem:[%s5439_s13 + $0x380] sm:$0xff]  ;;  %v888_v40 = vld [vmem:[%s5439_s13 + $0x390] sm:$0xff] }
 0x379   :  { %v719_v1 = vrot.slane %v711_v59, %v3880_v53  ;;  %v726_v2 = vrot.slane %v712_v61, %v3880_v53  ;;  %v862_v59 = vld [vmem:[%s5439_s13 + $0x2c0] sm:$0xff]  ;;  %v864_v61 = vld [vmem:[%s5439_s13 + $0x2d0] sm:$0xff] }
 0x37b   :  { %v727_v4 = vcombine.low %v719_v1, %v726_v2  ;;  %v1078_v1 = vunpack.c.l.s8.bf16 %v862_v59  ;;  %v1080_v2 = vunpack.c.l.s8.bf16 %v864_v61 }
 0x37d   :  { %v734_v17 = vrot.slane %v727_v4, %v3880_v53  ;;  %v1087_v4 = vunpack.c.h.s8.bf16 %v863_v54 }
 0x37f   :  { %v736_v39 = vsub.f32 %v681_v16, %v734_v17  ;;  %v1089_v16 = vunpack.c.h.s8.bf16 %v865_v55  ;;  %v871_v17 = vld [vmem:[%s5439_s13 + $0x308] sm:$0xff] }
 0x380   :  { %v1103_v12 = vunpack.c.h.s8.bf16 %v871_v17 }
 0x381   :  { %v757_v44 = vrot.slane %v736_v39, %v4105_v63  ;;  %v749_v41 = vrot.slane %v736_v39, %v3875_v34  ;;  %v745_v36 = vrot.slane %v736_v39, %v3798_v0  ;;  %v753_v5 = vrot.slane %v736_v39, %v4102_v13  ;;  %v873_v39 = vld [vmem:[%s5439_s13 + $0x318] sm:$0xff] }
 0x383   :  { %v765_v6 = vadd.f32 %v757_v44, %v740_v9  ;;  %v763_v7 = vadd.f32 %v749_v41, %v738_v56  ;;  %v762_v8 = vadd.f32 %v745_v36, %v737_v57  ;;  %v4138_v10 = vadd.f32 %v753_v5, %v739_v58 }
 0x384   :  { %v1070_v9 = vunpack.c.h.s8.bf16 %v854_v46  ;;  %v1072_v56 = vunpack.c.h.s8.bf16 %v856_v47  ;;  %v1079_v57 = vunpack.c.l.s8.bf16 %v863_v54  ;;  %v1081_v58 = vunpack.c.l.s8.bf16 %v865_v55  ;;  %v895_v46 = vld [vmem:[%s5439_s13 + $0x3c8] sm:$0xff]  ;;  %v897_v47 = vld [vmem:[%s5439_s13 + $0x3d8] sm:$0xff]  ;;  %v894_v54 = vld [vmem:[%s5439_s13 + $0x3c0] sm:$0xff] }
 0x385   :  { %v767_v14 = vmax.f32 %v763_v7, 0.0  ;;  %v766_v15 = vmax.f32 %v762_v8, 0.0  ;;  %v769_v18 = vmax.f32 %v765_v6, 0.0  ;;  %v1086_v44 = vunpack.c.h.s8.bf16 %v862_v59  ;;  %v870_v6 = vld [vmem:[%s5439_s13 + $0x300] sm:$0xff]  ;;  %v872_v7 = vld [vmem:[%s5439_s13 + $0x310] sm:$0xff]  ;;  %v779_v59 = vld [vmem:[%s5439_s13 + $0x28] sm:$0xff] }
 0x386   :  { %v1088_v41 = vunpack.c.h.s8.bf16 %v864_v61  ;;  %v1095_v36 = vunpack.c.l.s8.bf16 %v871_v17  ;;  %v1097_v5 = vunpack.c.l.s8.bf16 %v873_v39  ;;  %v1094_v8 = vunpack.c.l.s8.bf16 %v870_v6  ;;  %v896_v55 = vld [vmem:[%s5439_s13 + $0x3d0] sm:$0xff]  ;;  %v781_v61 = vld [vmem:[%s5439_s13 + $0x38] sm:$0xff] }
 0x387   :  { %v4146_v19 = vpack.c.bf16 %v767_v14, %v767_v14  ;;  %v4148_v20 = vpack.c.bf16 %v766_v15, %v766_v15  ;;  %v4162_v60 = vpack.c.bf16 %v769_v18, %v769_v18  ;;  %v1096_v11 = vunpack.c.l.s8.bf16 %v872_v7  ;;  %v879_v15 = vld [vmem:[%s5439_s13 + $0x348] sm:$0xff]  ;;  %v881_v18 = vld [vmem:[%s5439_s13 + $0x358] sm:$0xff] }
 0x388   :  { %v1105_v14 = vunpack.c.h.s8.bf16 %v873_v39  ;;  %v909_v17 = vunpack.c.l.s8.bf16 %v781_v61  ;;  %v778_v39 = vld [vmem:[%s5439_s13 + $0x20] sm:$0xff] }
 0x389   :  { %1190 = vmatprep.mubr.bf16.mxu0 %v4146_v19  ;;  %1272 = vmatprep.mubr.bf16.mxu1 %v4146_v19 }
 0x38a   :  { %1191 = vmatmul.mubr.bf16.vlgmr.msra.gmra.mrb[4].mxu0 %v4148_v20  ;;  %1273 = vmatmul.mubr.bf16.vlgmr.msra.gmra.mrb[12].mxu1 %v4148_v20 }
 0x38b   :  { %1200 = vmatpush1.bf16.msra.mxu0 %v1030_v21  ;;  %1282 = vmatpush1.bf16.msra.mxu1 %v1032_v22  ;;  %v1102_v21 = vunpack.c.h.s8.bf16 %v870_v6  ;;  %v1104_v22 = vunpack.c.h.s8.bf16 %v872_v7  ;;  %v915_v6 = vunpack.c.h.s8.bf16 %v779_v59  ;;  %v787_v7 = vld [vmem:[%s5439_s13 + $0x68] sm:$0xff] }
 0x38c   :  { %1231 = vmatprep.mubr.bf16.mxu0 %v4162_v60  ;;  %1313 = vmatprep.mubr.bf16.mxu1 %v4162_v60 }
 0x38d   :  { %1201 = vmatprep.subr.bf16.mxu0 %v1039_v23  ;;  %1283 = vmatprep.subr.bf16.mxu1 %v1041_v24  ;;  %v1111_v23 = vunpack.c.l.s8.bf16 %v879_v15  ;;  %v1113_v24 = vunpack.c.l.s8.bf16 %v881_v18 }
 0x38f   :  { %1202 = vmatpush1.bf16.msra.mxu0 %v1038_v27  ;;  %1284 = vmatpush1.bf16.msra.mxu1 %v1040_v51  ;;  %v1110_v27 = vunpack.c.l.s8.bf16 %v878_v25  ;;  %v1112_v51 = vunpack.c.l.s8.bf16 %v880_v26 }
 0x390   :  { %1203 = vmatprep.subr.bf16.mxu0 %v1047_v52  ;;  %1285 = vmatprep.subr.bf16.mxu1 %v1049_v28  ;;  %v1119_v52 = vunpack.c.h.s8.bf16 %v879_v15  ;;  %v1121_v28 = vunpack.c.h.s8.bf16 %v881_v18  ;;  %v786_v15 = vld [vmem:[%s5439_s13 + $0x60] sm:$0xff] }
 0x393   :  { %1204 = vmatpush1.bf16.msra.mxu0 %v1046_v31  ;;  %1286 = vmatpush1.bf16.msra.mxu1 %v1048_v32  ;;  %v1118_v31 = vunpack.c.h.s8.bf16 %v878_v25  ;;  %v1120_v32 = vunpack.c.h.s8.bf16 %v880_v26  ;;  %v795_v25 = vld [vmem:[%s5439_s13 + $0xa8] sm:$0xff]  ;;  %v797_v26 = vld [vmem:[%s5439_s13 + $0xb8] sm:$0xff] }
 0x394   :  { %1205 = vmatprep.subr.bf16.mxu0 %v1055_v33  ;;  %1287 = vmatprep.subr.bf16.mxu1 %v1057_v37  ;;  %v1127_v33 = vunpack.c.l.s8.bf16 %v887_v29  ;;  %v1129_v37 = vunpack.c.l.s8.bf16 %v889_v30 }
 0x397   :  { %1206 = vmatpush1.bf16.msra.mxu0 %v1054_v3  ;;  %1288 = vmatpush1.bf16.msra.mxu1 %v1056_v42  ;;  %v1126_v3 = vunpack.c.l.s8.bf16 %v886_v38  ;;  %v1128_v42 = vunpack.c.l.s8.bf16 %v888_v40 }
 0x398   :  { %1207 = vmatprep.subr.bf16.mxu0 %v1063_v43  ;;  %1289 = vmatprep.subr.bf16.mxu1 %v1065_v45  ;;  %v1135_v43 = vunpack.c.h.s8.bf16 %v887_v29  ;;  %v1137_v45 = vunpack.c.h.s8.bf16 %v889_v30  ;;  %v941_v29 = vunpack.c.l.s8.bf16 %v797_v26  ;;  %v796_v30 = vld [vmem:[%s5439_s13 + $0xb0] sm:$0xff] }
 0x39b   :  { %1208 = vmatpush1.bf16.msra.mxu0 %v1062_v48  ;;  %1290 = vmatpush1.bf16.msra.mxu1 %v1064_v49  ;;  %v1134_v48 = vunpack.c.h.s8.bf16 %v886_v38  ;;  %v1136_v49 = vunpack.c.h.s8.bf16 %v888_v40  ;;  %v803_v38 = vld [vmem:[%s5439_s13 + $0xe8] sm:$0xff]  ;;  %v805_v40 = vld [vmem:[%s5439_s13 + $0xf8] sm:$0xff] }
 0x39c   :  { %1209 = vmatprep.subr.bf16.mxu0 %v1071_v50  ;;  %1291 = vmatprep.subr.bf16.mxu1 %v1073_v35  ;;  %v1143_v50 = vunpack.c.l.s8.bf16 %v895_v46  ;;  %v1145_v35 = vunpack.c.l.s8.bf16 %v897_v47 }
 0x39f   :  { %1210 = vmatpush1.bf16.msra.mxu0 %v1070_v9  ;;  %1292 = vmatpush1.bf16.msra.mxu1 %v1072_v56  ;;  %v1142_v9 = vunpack.c.l.s8.bf16 %v894_v54  ;;  %v1144_v56 = vunpack.c.l.s8.bf16 %v896_v55 }
 0x3a0   :  { %1211 = vmatprep.subr.bf16.mxu0 %v1079_v57  ;;  %1293 = vmatprep.subr.bf16.mxu1 %v1081_v58  ;;  %v1151_v57 = vunpack.c.h.s8.bf16 %v895_v46  ;;  %v1153_v58 = vunpack.c.h.s8.bf16 %v897_v47  ;;  %v957_v46 = vunpack.c.l.s8.bf16 %v805_v40  ;;  %v804_v47 = vld [vmem:[%s5439_s13 + $0xf0] sm:$0xff] }
 0x3a3   :  { %1212 = vmatpush1.bf16.msra.mxu0 %v1078_v1  ;;  %1294 = vmatpush1.bf16.msra.mxu1 %v1080_v2  ;;  %v1150_v1 = vunpack.c.h.s8.bf16 %v894_v54  ;;  %v1152_v2 = vunpack.c.h.s8.bf16 %v896_v55  ;;  %v811_v54 = vld [vmem:[%s5439_s13 + $0x128] sm:$0xff]  ;;  %v813_v55 = vld [vmem:[%s5439_s13 + $0x138] sm:$0xff] }
 0x3a4   :  { %1213 = vmatprep.subr.bf16.mxu0 %v1087_v4  ;;  %1295 = vmatprep.subr.bf16.mxu1 %v1089_v16  ;;  %v768_v4 = vmax.f32 %v4138_v10, 0.0  ;;  %v907_v16 = vunpack.c.l.s8.bf16 %v779_v59  ;;  %v917_v10 = vunpack.c.h.s8.bf16 %v781_v61  ;;  %v973_v59 = vunpack.c.l.s8.bf16 %v813_v55  ;;  %v812_v61 = vld [vmem:[%s5439_s13 + $0x130] sm:$0xff] }
 0x3a7   :  { %1214 = vmatpush1.bf16.msra.mxu0 %v1086_v44  ;;  %1296 = vmatpush1.bf16.msra.mxu1 %v1088_v41  ;;  %v780_v44 = vld [vmem:[%s5439_s13 + $0x30] sm:$0xff]  ;;  %v906_v41 = vunpack.c.l.s8.bf16 %v778_v39 }
 0x3a8   :  { %1215 = vmatprep.subr.bf16.mxu0 %v1095_v36  ;;  %1297 = vmatprep.subr.bf16.mxu1 %v1097_v5  ;;  %v4257_v36 = vpack.c.bf16 %v768_v4, %v768_v4  ;;  %v908_v5 = vunpack.c.l.s8.bf16 %v780_v44  ;;  %v979_v4 = vunpack.c.h.s8.bf16 %v811_v54 }
 0x3ab   :  { %1216 = vmatpush1.bf16.msra.mxu0 %v1094_v8  ;;  %1298 = vmatpush1.bf16.msra.mxu1 %v1096_v11  ;;  %v789_v8 = vld [vmem:[%s5439_s13 + $0x78] sm:$0xff]  ;;  %v914_v11 = vunpack.c.h.s8.bf16 %v778_v39 }
 0x3ac   :  { %1217 = vmatprep.subr.bf16.mxu0 %v1103_v12  ;;  %1299 = vmatprep.subr.bf16.mxu1 %v1105_v14  ;;  %v916_v12 = vunpack.c.h.s8.bf16 %v780_v44  ;;  %v923_v14 = vunpack.c.l.s8.bf16 %v787_v7  ;;  %v925_v18 = vunpack.c.l.s8.bf16 %v789_v8  ;;  %v821_v39 = vld [vmem:[%s5439_s13 + $0x178] sm:$0xff] }
 0x3af   :  { %1218 = vmatpush1.bf16.msra.mxu0 %v1102_v21  ;;  %1300 = vmatpush1.bf16.msra.mxu1 %v1104_v22  ;;  %v788_v21 = vld [vmem:[%s5439_s13 + $0x70] sm:$0xff]  ;;  %v922_v22 = vunpack.c.l.s8.bf16 %v786_v15 }
 0x3b0   :  { %1219 = vmatprep.subr.bf16.mxu0 %v1111_v23  ;;  %1301 = vmatprep.subr.bf16.mxu1 %v1113_v24  ;;  %v924_v23 = vunpack.c.l.s8.bf16 %v788_v21  ;;  %v931_v24 = vunpack.c.h.s8.bf16 %v787_v7  ;;  %v820_v7 = vld [vmem:[%s5439_s13 + $0x170] sm:$0xff] }
 0x3b3   :  { %1220 = vmatpush1.bf16.msra.mxu0 %v1110_v27  ;;  %1302 = vmatpush1.bf16.msra.mxu1 %v1112_v51  ;;  %v930_v27 = vunpack.c.h.s8.bf16 %v786_v15  ;;  %v932_v51 = vunpack.c.h.s8.bf16 %v788_v21  ;;  %v827_v15 = vld [vmem:[%s5439_s13 + $0x1a8] sm:$0xff] }
 0x3b4   :  { %1221 = vmatprep.subr.bf16.mxu0 %v1119_v52  ;;  %1303 = vmatprep.subr.bf16.mxu1 %v1121_v28  ;;  %v939_v52 = vunpack.c.l.s8.bf16 %v795_v25  ;;  %v794_v28 = vld [vmem:[%s5439_s13 + $0xa0] sm:$0xff] }
 0x3b7   :  { %1222 = vmatpush1.bf16.msra.mxu0 %v1118_v31  ;;  %1304 = vmatpush1.bf16.msra.mxu1 %v1120_v32  ;;  %v938_v31 = vunpack.c.l.s8.bf16 %v794_v28  ;;  %v940_v32 = vunpack.c.l.s8.bf16 %v796_v30 }
 0x3b8   :  { %1223 = vmatprep.subr.bf16.mxu0 %v1127_v33  ;;  %1305 = vmatprep.subr.bf16.mxu1 %v1129_v37  ;;  %v947_v33 = vunpack.c.h.s8.bf16 %v795_v25  ;;  %v949_v37 = vunpack.c.h.s8.bf16 %v797_v26  ;;  %v828_v25 = vld [vmem:[%s5439_s13 + $0x1b0] sm:$0xff] }
 0x3bb   :  { %1224 = vmatpush1.bf16.msra.mxu0 %v1126_v3  ;;  %1306 = vmatpush1.bf16.msra.mxu1 %v1128_v42  ;;  %v946_v3 = vunpack.c.h.s8.bf16 %v794_v28  ;;  %v948_v42 = vunpack.c.h.s8.bf16 %v796_v30  ;;  %v835_v28 = vld [vmem:[%s5439_s13 + $0x1e8] sm:$0xff] }
 0x3bc   :  { %1225 = vmatprep.subr.bf16.mxu0 %v1135_v43  ;;  %1307 = vmatprep.subr.bf16.mxu1 %v1137_v45  ;;  %v955_v43 = vunpack.c.l.s8.bf16 %v803_v38  ;;  %v802_v45 = vld [vmem:[%s5439_s13 + $0xe0] sm:$0xff] }
 0x3bf   :  { %1226 = vmatpush1.bf16.msra.mxu0 %v1134_v48  ;;  %1308 = vmatpush1.bf16.msra.mxu1 %v1136_v49  ;;  %v954_v48 = vunpack.c.l.s8.bf16 %v802_v45  ;;  %v956_v49 = vunpack.c.l.s8.bf16 %v804_v47 }
 0x3c0   :  { %1227 = vmatprep.subr.bf16.mxu0 %v1143_v50  ;;  %1309 = vmatprep.subr.bf16.mxu1 %v1145_v35  ;;  %v963_v50 = vunpack.c.h.s8.bf16 %v803_v38  ;;  %v965_v35 = vunpack.c.h.s8.bf16 %v805_v40  ;;  %v836_v38 = vld [vmem:[%s5439_s13 + $0x1f0] sm:$0xff] }
 0x3c3   :  { %1228 = vmatpush1.bf16.msra.mxu0 %v1142_v9  ;;  %1310 = vmatpush1.bf16.msra.mxu1 %v1144_v56  ;;  %v962_v9 = vunpack.c.h.s8.bf16 %v802_v45  ;;  %v964_v56 = vunpack.c.h.s8.bf16 %v804_v47  ;;  %v843_v45 = vld [vmem:[%s5439_s13 + $0x228] sm:$0xff] }
 0x3c4   :  { %1229 = vmatprep.subr.bf16.mxu0 %v1151_v57  ;;  %1311 = vmatprep.subr.bf16.mxu1 %v1153_v58  ;;  %v971_v57 = vunpack.c.l.s8.bf16 %v811_v54  ;;  %v810_v58 = vld [vmem:[%s5439_s13 + $0x120] sm:$0xff]  ;;  %v844_v54 = vld [vmem:[%s5439_s13 + $0x230] sm:$0xff] }
 0x3c5   :  { %v978_v44 = vunpack.c.h.s8.bf16 %v810_v58 }
 0x3c7   :  { %1230 = vmatpush1.bf16.msra.mxu0 %v1150_v1  ;;  %1312 = vmatpush1.bf16.msra.mxu1 %v1152_v2  ;;  %v970_v1 = vunpack.c.l.s8.bf16 %v810_v58  ;;  %v972_v2 = vunpack.c.l.s8.bf16 %v812_v61 }
 0x3c8   :  { %1322 = vmatprep.subr.bf16.mxu0 %v907_v16  ;;  %1404 = vmatprep.subr.bf16.mxu1 %v909_v17  ;;  %v981_v16 = vunpack.c.h.s8.bf16 %v813_v55  ;;  %v819_v17 = vld [vmem:[%s5439_s13 + $0x168] sm:$0xff] }
 0x3ca   :  { %1232 = vmatmul.mubr.bf16.vlgmr.msra.gmra.mrb[4].mxu0 %v4257_v36  ;;  %1314 = vmatmul.mubr.bf16.vlgmr.msra.gmra.mrb[12].mxu1 %v4257_v36 }
 0x3cb   :  { %1323 = vmatpush1.bf16.msra.mxu0 %v906_v41  ;;  %1354 = vmatprep.mubr.bf16.mxu0 %v4146_v19  ;;  %v980_v41 = vunpack.c.h.s8.bf16 %v812_v61 }
 0x3cc   :  { %1405 = vmatpush1.bf16.msra.mxu1 %v908_v5  ;;  %1436 = vmatprep.mubr.bf16.mxu1 %v4146_v19  ;;  %v933_v19 = vunpack.c.h.s8.bf16 %v789_v8  ;;  %v987_v5 = vunpack.c.l.s8.bf16 %v819_v17 }
 0x3cd   :  { %1324 = vmatprep.subr.bf16.mxu0 %v915_v6  ;;  %1406 = vmatprep.subr.bf16.mxu1 %v917_v10  ;;  %v818_v6 = vld [vmem:[%s5439_s13 + $0x160] sm:$0xff]  ;;  %v989_v10 = vunpack.c.l.s8.bf16 %v821_v39 }
 0x3ce   :  { %v986_v8 = vunpack.c.l.s8.bf16 %v818_v6  ;;  %v994_v21 = vunpack.c.h.s8.bf16 %v818_v6 }
 0x3cf   :  { %1325 = vmatpush1.bf16.msra.mxu0 %v914_v11  ;;  %v988_v11 = vunpack.c.l.s8.bf16 %v820_v7 }
 0x3d0   :  { %1407 = vmatpush1.bf16.msra.mxu1 %v916_v12  ;;  %1326 = vmatprep.subr.bf16.mxu0 %v923_v14  ;;  %v995_v12 = vunpack.c.h.s8.bf16 %v819_v17  ;;  %v997_v14 = vunpack.c.h.s8.bf16 %v821_v39  ;;  %v852_v17 = vld [vmem:[%s5439_s13 + $0x270] sm:$0xff] }
 0x3d1   :  { %1408 = vmatprep.subr.bf16.mxu1 %v925_v18  ;;  %v829_v18 = vld [vmem:[%s5439_s13 + $0x1b8] sm:$0xff]  ;;  %v1052_v39 = vunpack.c.l.s8.bf16 %v852_v17 }
 0x3d3   :  { %1327 = vmatpush1.bf16.msra.mxu0 %v922_v22  ;;  %v996_v22 = vunpack.c.h.s8.bf16 %v820_v7 }
 0x3d4   :  { %1409 = vmatpush1.bf16.msra.mxu1 %v924_v23  ;;  %1328 = vmatprep.subr.bf16.mxu0 %v931_v24  ;;  %v1003_v23 = vunpack.c.l.s8.bf16 %v827_v15  ;;  %v826_v24 = vld [vmem:[%s5439_s13 + $0x1a0] sm:$0xff] }
 0x3d5   :  { %1410 = vmatprep.subr.bf16.mxu1 %v933_v19  ;;  %v1005_v19 = vunpack.c.l.s8.bf16 %v829_v18  ;;  %v1002_v26 = vunpack.c.l.s8.bf16 %v826_v24  ;;  %v1010_v30 = vunpack.c.h.s8.bf16 %v826_v24 }
 0x3d7   :  { %1329 = vmatpush1.bf16.msra.mxu0 %v930_v27  ;;  %v1004_v27 = vunpack.c.l.s8.bf16 %v828_v25 }
 0x3d8   :  { %1411 = vmatpush1.bf16.msra.mxu1 %v932_v51  ;;  %1330 = vmatprep.subr.bf16.mxu0 %v939_v52  ;;  %v1011_v51 = vunpack.c.h.s8.bf16 %v827_v15  ;;  %v1013_v52 = vunpack.c.h.s8.bf16 %v829_v18 }
 0x3d9   :  { %1412 = vmatprep.subr.bf16.mxu1 %v941_v29  ;;  %v837_v29 = vld [vmem:[%s5439_s13 + $0x1f8] sm:$0xff] }
 0x3db   :  { %1331 = vmatpush1.bf16.msra.mxu0 %v938_v31  ;;  %v1012_v31 = vunpack.c.h.s8.bf16 %v828_v25 }
 0x3dc   :  { %1413 = vmatpush1.bf16.msra.mxu1 %v940_v32  ;;  %1332 = vmatprep.subr.bf16.mxu0 %v947_v33  ;;  %v1019_v32 = vunpack.c.l.s8.bf16 %v835_v28  ;;  %v834_v33 = vld [vmem:[%s5439_s13 + $0x1e0] sm:$0xff] }
 0x3dd   :  { %1414 = vmatprep.subr.bf16.mxu1 %v949_v37  ;;  %v1021_v37 = vunpack.c.l.s8.bf16 %v837_v29  ;;  %v1018_v40 = vunpack.c.l.s8.bf16 %v834_v33  ;;  %v1026_v47 = vunpack.c.h.s8.bf16 %v834_v33 }
 0x3df   :  { %1333 = vmatpush1.bf16.msra.mxu0 %v946_v3  ;;  %v1020_v3 = vunpack.c.l.s8.bf16 %v836_v38 }
 0x3e0   :  { %1415 = vmatpush1.bf16.msra.mxu1 %v948_v42  ;;  %1334 = vmatprep.subr.bf16.mxu0 %v955_v43  ;;  %v1027_v42 = vunpack.c.h.s8.bf16 %v835_v28  ;;  %v1029_v43 = vunpack.c.h.s8.bf16 %v837_v29 }
 0x3e1   :  { %1416 = vmatprep.subr.bf16.mxu1 %v957_v46  ;;  %v845_v46 = vld [vmem:[%s5439_s13 + $0x238] sm:$0xff] }
 0x3e2   :  { %v1045_v58 = vunpack.c.h.s8.bf16 %v845_v46 }
 0x3e3   :  { %1335 = vmatpush1.bf16.msra.mxu0 %v954_v48  ;;  %v1028_v48 = vunpack.c.h.s8.bf16 %v836_v38 }
 0x3e4   :  { %1417 = vmatpush1.bf16.msra.mxu1 %v956_v49  ;;  %1336 = vmatprep.subr.bf16.mxu0 %v963_v50  ;;  %v1035_v49 = vunpack.c.l.s8.bf16 %v843_v45  ;;  %v842_v50 = vld [vmem:[%s5439_s13 + $0x220] sm:$0xff] }
 0x3e5   :  { %1418 = vmatprep.subr.bf16.mxu1 %v965_v35  ;;  %v1037_v35 = vunpack.c.l.s8.bf16 %v845_v46  ;;  %v1034_v55 = vunpack.c.l.s8.bf16 %v842_v50  ;;  %v1042_v61 = vunpack.c.h.s8.bf16 %v842_v50 }
 0x3e7   :  { %1337 = vmatpush1.bf16.msra.mxu0 %v962_v9  ;;  %v1036_v9 = vunpack.c.l.s8.bf16 %v844_v54 }
 0x3e8   :  { %1419 = vmatpush1.bf16.msra.mxu1 %v964_v56  ;;  %1338 = vmatprep.subr.bf16.mxu0 %v971_v57  ;;  %v1043_v56 = vunpack.c.h.s8.bf16 %v843_v45  ;;  %v851_v57 = vld [vmem:[%s5439_s13 + $0x268] sm:$0xff] }
 0x3e9   :  { %1420 = vmatprep.subr.bf16.mxu1 %v973_v59  ;;  %v853_v59 = vld [vmem:[%s5439_s13 + $0x278] sm:$0xff] }
 0x3eb   :  { %1339 = vmatpush1.bf16.msra.mxu0 %v970_v1  ;;  %v1044_v1 = vunpack.c.h.s8.bf16 %v844_v54 }
 0x3ec   :  { %1421 = vmatpush1.bf16.msra.mxu1 %v972_v2  ;;  %1340 = vmatprep.subr.bf16.mxu0 %v979_v4  ;;  %v1051_v2 = vunpack.c.l.s8.bf16 %v851_v57  ;;  %v850_v4 = vld [vmem:[%s5439_s13 + $0x260] sm:$0xff] }
 0x3ed   :  { %1422 = vmatprep.subr.bf16.mxu1 %v981_v16  ;;  %v1053_v16 = vunpack.c.l.s8.bf16 %v853_v59  ;;  %v1058_v6 = vunpack.c.h.s8.bf16 %v850_v4 }
 0x3ef   :  { %1341 = vmatpush1.bf16.msra.mxu0 %v978_v44  ;;  %v1059_v44 = vunpack.c.h.s8.bf16 %v851_v57 }
 0x3f0   :  { %1423 = vmatpush1.bf16.msra.mxu1 %v980_v41  ;;  %1342 = vmatprep.subr.bf16.mxu0 %v987_v5  ;;  %v1061_v41 = vunpack.c.h.s8.bf16 %v853_v59  ;;  %v859_v5 = vld [vmem:[%s5439_s13 + $0x2a8] sm:$0xff] }
 0x3f1   :  { %1424 = vmatprep.subr.bf16.mxu1 %v989_v10  ;;  %v1060_v10 = vunpack.c.h.s8.bf16 %v852_v17  ;;  %v1067_v7 = vunpack.c.l.s8.bf16 %v859_v5  ;;  %v1075_v18 = vunpack.c.h.s8.bf16 %v859_v5 }
 0x3f3   :  { %1343 = vmatpush1.bf16.msra.mxu0 %v986_v8  ;;  %v858_v8 = vld [vmem:[%s5439_s13 + $0x2a0] sm:$0xff] }
 0x3f4   :  { %1425 = vmatpush1.bf16.msra.mxu1 %v988_v11  ;;  %1344 = vmatprep.subr.bf16.mxu0 %v995_v12  ;;  %v860_v12 = vld [vmem:[%s5439_s13 + $0x2b0] sm:$0xff]  ;;  %v1074_v24 = vunpack.c.h.s8.bf16 %v858_v8 }
 0x3f5   :  { %1426 = vmatprep.subr.bf16.mxu1 %v997_v14  ;;  %v1066_v14 = vunpack.c.l.s8.bf16 %v858_v8  ;;  %v1068_v15 = vunpack.c.l.s8.bf16 %v860_v12 }
 0x3f7   :  { %1345 = vmatpush1.bf16.msra.mxu0 %v994_v21 }
 0x3f8   :  { %1427 = vmatpush1.bf16.msra.mxu1 %v996_v22  ;;  %1346 = vmatprep.subr.bf16.mxu0 %v1003_v23  ;;  %v867_v22 = vld [vmem:[%s5439_s13 + $0x2e8] sm:$0xff]  ;;  %v869_v23 = vld [vmem:[%s5439_s13 + $0x2f8] sm:$0xff] }
 0x3f9   :  { %1428 = vmatprep.subr.bf16.mxu1 %v1005_v19  ;;  %v1076_v19 = vunpack.c.h.s8.bf16 %v860_v12  ;;  %v1083_v25 = vunpack.c.l.s8.bf16 %v867_v22  ;;  %v1091_v29 = vunpack.c.h.s8.bf16 %v867_v22 }
 0x3fb   :  { %1347 = vmatpush1.bf16.msra.mxu0 %v1002_v26  ;;  %v866_v26 = vld [vmem:[%s5439_s13 + $0x2e0] sm:$0xff] }
 0x3fc   :  { %1429 = vmatpush1.bf16.msra.mxu1 %v1004_v27  ;;  %1348 = vmatprep.subr.bf16.mxu0 %v1011_v51  ;;  %v1085_v27 = vunpack.c.l.s8.bf16 %v869_v23  ;;  %v868_v51 = vld [vmem:[%s5439_s13 + $0x2f0] sm:$0xff]  ;;  %v1090_v33 = vunpack.c.h.s8.bf16 %v866_v26 }
 0x3fd   :  { %1430 = vmatprep.subr.bf16.mxu1 %v1013_v52  ;;  %v1082_v52 = vunpack.c.l.s8.bf16 %v866_v26  ;;  %v1084_v28 = vunpack.c.l.s8.bf16 %v868_v51  ;;  %v4452_v26 = vld [vmem:[%s5440_s14] sm:$0xff] }
 0x3ff   :  { %1349 = vmatpush1.bf16.msra.mxu0 %v1010_v30  ;;  %v1093_v30 = vunpack.c.h.s8.bf16 %v869_v23 }
 0x400   :  { %1431 = vmatpush1.bf16.msra.mxu1 %v1012_v31  ;;  %1350 = vmatprep.subr.bf16.mxu0 %v1019_v32  ;;  %v875_v31 = vld [vmem:[%s5439_s13 + $0x328] sm:$0xff]  ;;  %v877_v32 = vld [vmem:[%s5439_s13 + $0x338] sm:$0xff] }
 0x401   :  { %1432 = vmatprep.subr.bf16.mxu1 %v1021_v37  ;;  %v1092_v37 = vunpack.c.h.s8.bf16 %v868_v51  ;;  %v1099_v38 = vunpack.c.l.s8.bf16 %v875_v31  ;;  %v1107_v46 = vunpack.c.h.s8.bf16 %v875_v31 }
 0x403   :  { %1351 = vmatpush1.bf16.msra.mxu0 %v1018_v40  ;;  %v874_v40 = vld [vmem:[%s5439_s13 + $0x320] sm:$0xff] }
 0x404   :  { %1433 = vmatpush1.bf16.msra.mxu1 %v1020_v3  ;;  %1352 = vmatprep.subr.bf16.mxu0 %v1027_v42  ;;  %v1101_v3 = vunpack.c.l.s8.bf16 %v877_v32  ;;  %v876_v42 = vld [vmem:[%s5439_s13 + $0x330] sm:$0xff]  ;;  %v1106_v50 = vunpack.c.h.s8.bf16 %v874_v40 }
 0x405   :  { %1434 = vmatprep.subr.bf16.mxu1 %v1029_v43  ;;  %v1098_v43 = vunpack.c.l.s8.bf16 %v874_v40  ;;  %v1100_v45 = vunpack.c.l.s8.bf16 %v876_v42 }
 0x407   :  { %1353 = vmatpush1.bf16.msra.mxu0 %v1026_v47  ;;  %v1109_v47 = vunpack.c.h.s8.bf16 %v877_v32 }
 0x408   :  { %1435 = vmatpush1.bf16.msra.mxu1 %v1028_v48  ;;  %1363 = vmatprep.subr.bf16.mxu0 %v1035_v49  ;;  %v883_v48 = vld [vmem:[%s5439_s13 + $0x368] sm:$0xff]  ;;  %v885_v49 = vld [vmem:[%s5439_s13 + $0x378] sm:$0xff] }
 0x409   :  { %1445 = vmatprep.subr.bf16.mxu1 %v1037_v35  ;;  %v1108_v35 = vunpack.c.h.s8.bf16 %v876_v42  ;;  %v1115_v54 = vunpack.c.l.s8.bf16 %v883_v48  ;;  %v1123_v59 = vunpack.c.h.s8.bf16 %v883_v48 }
 0x40a   :  { %1355 = vmatmul.mubr.bf16.vlgmr.msra.gmra.mrb[8].mxu0 %v4148_v20 }
 0x40b   :  { %1437 = vmatmul.mubr.bf16.vlgmr.msra.gmra.mrb[16].mxu1 %v4148_v20  ;;  %1364 = vmatpush1.bf16.msra.mxu0 %v1034_v55  ;;  %v1050_v20 = vunpack.c.l.s8.bf16 %v850_v4  ;;  %v882_v55 = vld [vmem:[%s5439_s13 + $0x360] sm:$0xff] }
 0x40c   :  { %1395 = vmatprep.mubr.bf16.mxu0 %v4162_v60  ;;  %1446 = vmatpush1.bf16.msra.mxu1 %v1036_v9  ;;  %v1117_v9 = vunpack.c.l.s8.bf16 %v885_v49  ;;  %v1114_v57 = vunpack.c.l.s8.bf16 %v882_v55  ;;  %v1122_v4 = vunpack.c.h.s8.bf16 %v882_v55 }
 0x40d   :  { %1477 = vmatprep.mubr.bf16.mxu1 %v4162_v60  ;;  %1365 = vmatprep.subr.bf16.mxu0 %v1043_v56  ;;  %v861_v60 = vld [vmem:[%s5439_s13 + $0x2b8] sm:$0xff]  ;;  %v884_v56 = vld [vmem:[%s5439_s13 + $0x370] sm:$0xff] }
 0x40e   :  { %1447 = vmatprep.subr.bf16.mxu1 %v1045_v58  ;;  %v1069_v11 = vunpack.c.l.s8.bf16 %v861_v60  ;;  %v1077_v21 = vunpack.c.h.s8.bf16 %v861_v60  ;;  %v1116_v58 = vunpack.c.l.s8.bf16 %v884_v56 }
 0x40f   :  { %1366 = vmatpush1.bf16.msra.mxu0 %v1042_v61  ;;  %v1125_v61 = vunpack.c.h.s8.bf16 %v885_v49 }
 0x410   :  { %1448 = vmatpush1.bf16.msra.mxu1 %v1044_v1  ;;  %1367 = vmatprep.subr.bf16.mxu0 %v1051_v2  ;;  %v891_v1 = vld [vmem:[%s5439_s13 + $0x3a8] sm:$0xff]  ;;  %v893_v2 = vld [vmem:[%s5439_s13 + $0x3b8] sm:$0xff] }
 0x411   :  { %1449 = vmatprep.subr.bf16.mxu1 %v1053_v16  ;;  %v1124_v16 = vunpack.c.h.s8.bf16 %v884_v56  ;;  %v1131_v17 = vunpack.c.l.s8.bf16 %v891_v1  ;;  %v1139_v60 = vunpack.c.h.s8.bf16 %v891_v1 }
 0x413   :  { %1368 = vmatpush1.bf16.msra.mxu0 %v1050_v20  ;;  %v890_v20 = vld [vmem:[%s5439_s13 + $0x3a0] sm:$0xff] }
 0x414   :  { %1450 = vmatpush1.bf16.msra.mxu1 %v1052_v39  ;;  %1369 = vmatprep.subr.bf16.mxu0 %v1059_v44  ;;  %v1133_v39 = vunpack.c.l.s8.bf16 %v893_v2  ;;  %v892_v44 = vld [vmem:[%s5439_s13 + $0x3b0] sm:$0xff]  ;;  %v1138_v8 = vunpack.c.h.s8.bf16 %v890_v20 }
 0x415   :  { %1451 = vmatprep.subr.bf16.mxu1 %v1061_v41  ;;  %v1130_v41 = vunpack.c.l.s8.bf16 %v890_v20  ;;  %v1132_v5 = vunpack.c.l.s8.bf16 %v892_v44 }
 0x417   :  { %1370 = vmatpush1.bf16.msra.mxu0 %v1058_v6  ;;  %v1141_v6 = vunpack.c.h.s8.bf16 %v893_v2 }
 0x418   :  { %1452 = vmatpush1.bf16.msra.mxu1 %v1060_v10  ;;  %1371 = vmatprep.subr.bf16.mxu0 %v1067_v7  ;;  %v899_v10 = vld [vmem:[%s5439_s13 + $0x3e8] sm:$0xff]  ;;  %v901_v7 = vld [vmem:[%s5439_s13 + $0x3f8] sm:$0xff] }
 0x419   :  { %1453 = vmatprep.subr.bf16.mxu1 %v1069_v11  ;;  %v1140_v11 = vunpack.c.h.s8.bf16 %v892_v44  ;;  %v1147_v12 = vunpack.c.l.s8.bf16 %v899_v10  ;;  %v1155_v23 = vunpack.c.h.s8.bf16 %v899_v10 }
 0x41b   :  { %1372 = vmatpush1.bf16.msra.mxu0 %v1066_v14  ;;  %v898_v14 = vld [vmem:[%s5439_s13 + $0x3e0] sm:$0xff] }
 0x41c   :  { %1454 = vmatpush1.bf16.msra.mxu1 %v1068_v15  ;;  %1373 = vmatprep.subr.bf16.mxu0 %v1075_v18  ;;  %v1149_v15 = vunpack.c.l.s8.bf16 %v901_v7  ;;  %v900_v18 = vld [vmem:[%s5439_s13 + $0x3f0] sm:$0xff] }
 0x41d   :  { %1455 = vmatprep.subr.bf16.mxu1 %v1077_v21  ;;  %v1146_v21 = vunpack.c.l.s8.bf16 %v898_v14  ;;  %v1148_v22 = vunpack.c.l.s8.bf16 %v900_v18 }
 0x41f   :  { %1374 = vmatpush1.bf16.msra.mxu0 %v1074_v24  ;;  %v1157_v24 = vunpack.c.h.s8.bf16 %v901_v7 }
 0x420   :  { %1456 = vmatpush1.bf16.msra.mxu1 %v1076_v19  ;;  %1375 = vmatprep.subr.bf16.mxu0 %v1083_v25  ;;  %v1154_v19 = vunpack.c.h.s8.bf16 %v898_v14  ;;  %v1156_v25 = vunpack.c.h.s8.bf16 %v900_v18 }
 0x421   :  { %1457 = vmatprep.subr.bf16.mxu1 %v1085_v27  ;;  %v4456_v27 = vmul.f32 %v4452_v26, %v4452_v26 }
 0x423   :  { %1376 = vmatpush1.bf16.msra.mxu0 %v1082_v52  ;;  %v1638_v52 = vrot.slane %v4456_v27, %v3798_v0 }
 0x424   :  { %1458 = vmatpush1.bf16.msra.mxu1 %v1084_v28  ;;  %1377 = vmatprep.subr.bf16.mxu0 %v1091_v29  ;;  %v1646_v29 = vrot.slane %v4456_v27, %v4102_v13 }
 0x425   :  { %1459 = vmatprep.subr.bf16.mxu1 %v1093_v30  ;;  %v1650_v30 = vrot.slane %v4456_v27, %v4105_v63 }
 0x427   :  { %1378 = vmatpush1.bf16.msra.mxu0 %v1090_v33 }
 0x428   :  { %1460 = vmatpush1.bf16.msra.mxu1 %v1092_v37  ;;  %1379 = vmatprep.subr.bf16.mxu0 %v1099_v38 }
 0x429   :  { %1461 = vmatprep.subr.bf16.mxu1 %v1101_v3 }
 0x42b   :  { %1380 = vmatpush1.bf16.msra.mxu0 %v1098_v43 }
 0x42c   :  { %1462 = vmatpush1.bf16.msra.mxu1 %v1100_v45  ;;  %1381 = vmatprep.subr.bf16.mxu0 %v1107_v46 }
 0x42d   :  { %1463 = vmatprep.subr.bf16.mxu1 %v1109_v47 }
 0x42f   :  { %1382 = vmatpush1.bf16.msra.mxu0 %v1106_v50 }
 0x430   :  { %1464 = vmatpush1.bf16.msra.mxu1 %v1108_v35  ;;  %1383 = vmatprep.subr.bf16.mxu0 %v1115_v54 }
 0x431   :  { %1465 = vmatprep.subr.bf16.mxu1 %v1117_v9 }
 0x433   :  { %1384 = vmatpush1.bf16.msra.mxu0 %v1114_v57 }
 0x434   :  { %1466 = vmatpush1.bf16.msra.mxu1 %v1116_v58  ;;  %1385 = vmatprep.subr.bf16.mxu0 %v1123_v59 }
 0x435   :  { %1467 = vmatprep.subr.bf16.mxu1 %v1125_v61 }
 0x437   :  { %1386 = vmatpush1.bf16.msra.mxu0 %v1122_v4 }
 0x438   :  { %1468 = vmatpush1.bf16.msra.mxu1 %v1124_v16  ;;  %1387 = vmatprep.subr.bf16.mxu0 %v1131_v17 }
 0x439   :  { %1469 = vmatprep.subr.bf16.mxu1 %v1133_v39 }
 0x43b   :  { %1388 = vmatpush1.bf16.msra.mxu0 %v1130_v41 }
 0x43c   :  { %1470 = vmatpush1.bf16.msra.mxu1 %v1132_v5  ;;  %1389 = vmatprep.subr.bf16.mxu0 %v1139_v60 }
 0x43d   :  { %1471 = vmatprep.subr.bf16.mxu1 %v1141_v6 }
 0x43f   :  { %1390 = vmatpush1.bf16.msra.mxu0 %v1138_v8 }
 0x440   :  { %1472 = vmatpush1.bf16.msra.mxu1 %v1140_v11  ;;  %1391 = vmatprep.subr.bf16.mxu0 %v1147_v12 }
 0x441   :  { %1473 = vmatprep.subr.bf16.mxu1 %v1149_v15 }
 0x443   :  { %1392 = vmatpush1.bf16.msra.mxu0 %v1146_v21 }
 0x444   :  { %1474 = vmatpush1.bf16.msra.mxu1 %v1148_v22  ;;  %1393 = vmatprep.subr.bf16.mxu0 %v1155_v23 }
 0x445   :  { %1475 = vmatprep.subr.bf16.mxu1 %v1157_v24 }
 0x447   :  { %1394 = vmatpush1.bf16.msra.mxu0 %v1154_v19 }
 0x448   :  { %1476 = vmatpush1.bf16.msra.mxu1 %v1156_v25 }
 0x44a   :  { %1396 = vmatmul.mubr.bf16.vlgmr.msra.gmra.mrb[8].mxu0 %v4257_v36 }
 0x44b   :  { %1478 = vmatmul.mubr.bf16.vlgmr.msra.gmra.mrb[16].mxu1 %v4257_v36  ;;  %v1642_v36 = vrot.slane %v4456_v27, %v3875_v34 }
 0x49d   :  { %v4458_v51 = vpop.f32.mrb[4].mxu0  ;;  %v4462_v28 = vpop.f32.mrb[12].mxu1 }
 0x49e   :  { %v1486_v31 = vrot.slane %v4458_v51, 4  ;;  %v1542_v32 = vmul.f32 %v4458_v51, %v4458_v51  ;;  %v1498_v33 = vrot.slane %v4462_v28, 4  ;;  %v1544_v37 = vmul.f32 %v4462_v28, %v4462_v28  ;;  %v4476_v38 = vpop.f32.mrb[5].mxu0  ;;  %v4478_v40 = vpop.f32.mrb[13].mxu1 }
 0x49f   :  { %v1492_v3 = vrot.slane %v4476_v38, 4  ;;  %v1543_v42 = vmul.f32 %v4476_v38, %v4476_v38  ;;  %v1504_v43 = vrot.slane %v4478_v40, 4  ;;  %v1545_v45 = vmul.f32 %v4478_v40, %v4478_v40  ;;  %v1237_v46 = vpop.f32.mrb[6].mxu0  ;;  %v1319_v47 = vpop.f32.mrb[14].mxu1 }
 0x4a0   :  { %v1487_v48 = vadd.f32 %v1486_v31, %v4458_v51  ;;  %v1550_v49 = vrot.slane %v1542_v32, 4  ;;  %v1499_v50 = vadd.f32 %v1498_v33, %v4462_v28  ;;  %v1562_v35 = vrot.slane %v1544_v37, 4  ;;  %v1238_v54 = vpop.f32.mrb[7].mxu0  ;;  %v1320_v55 = vpop.f32.mrb[15].mxu1 }
 0x4a1   :  { %v1493_v9 = vadd.f32 %v1492_v3, %v4476_v38  ;;  %v1556_v56 = vrot.slane %v1543_v42, 4  ;;  %v1505_v57 = vadd.f32 %v1504_v43, %v4478_v40  ;;  %v1568_v58 = vrot.slane %v1545_v45, 4 }
 0x4a2   :  { %v1488_v59 = vrot.slane %v1487_v48, 2  ;;  %v1551_v61 = vadd.f32 %v1550_v49, %v1542_v32  ;;  %v1500_v1 = vrot.slane %v1499_v50, 2  ;;  %v1563_v2 = vadd.f32 %v1562_v35, %v1544_v37  ;;  %v1943_v35 = vld [vmem:[%s5443_s17 + $0x18] sm:$0xff] }
 0x4a3   :  { %v1494_v4 = vrot.slane %v1493_v9, 2  ;;  %v1557_v16 = vadd.f32 %v1556_v56, %v1543_v42  ;;  %v1506_v17 = vrot.slane %v1505_v57, 2  ;;  %v1569_v20 = vadd.f32 %v1568_v58, %v1545_v45  ;;  %v1942_v58 = vld [vmem:[%s5443_s17 + $0x10] sm:$0xff] }
 0x4a4   :  { %v1489_v39 = vadd.f32 %v1488_v59, %v1487_v48  ;;  %v1552_v44 = vrot.slane %v1551_v61, 2  ;;  %v1501_v41 = vadd.f32 %v1500_v1, %v1499_v50  ;;  %v1564_v5 = vrot.slane %v1563_v2, 2  ;;  %v1941_v50 = vld [vmem:[%s5443_s17 + $0x8] sm:$0xff] }
 0x4a5   :  { %v1495_v60 = vadd.f32 %v1494_v4, %v1493_v9  ;;  %v1558_v6 = vrot.slane %v1557_v16, 2  ;;  %v1507_v10 = vadd.f32 %v1506_v17, %v1505_v57  ;;  %v1570_v7 = vrot.slane %v1569_v20, 2  ;;  %v1940_v57 = vld [vmem:[%s5443_s17] sm:$0xff] }
 0x4a6   :  { %v1490_v8 = vrot.slane %v1489_v39, 1  ;;  %v1553_v11 = vadd.f32 %v1552_v44, %v1551_v61  ;;  %v1502_v12 = vrot.slane %v1501_v41, 1  ;;  %v1565_v14 = vadd.f32 %v1564_v5, %v1563_v2 }
 0x4a7   :  { %v1496_v15 = vrot.slane %v1495_v60, 1  ;;  %v1559_v18 = vadd.f32 %v1558_v6, %v1557_v16  ;;  %v1508_v21 = vrot.slane %v1507_v10, 1  ;;  %v1571_v22 = vadd.f32 %v1570_v7, %v1569_v20 }
 0x4a8   :  { %v1491_v23 = vadd.f32 %v1490_v8, %v1489_v39  ;;  %v1554_v24 = vrot.slane %v1553_v11, 1  ;;  %v1503_v19 = vadd.f32 %v1502_v12, %v1501_v41  ;;  %v1566_v25 = vrot.slane %v1565_v14, 1 }
 0x4a9   :  { %v1497_v31 = vadd.f32 %v1496_v15, %v1495_v60  ;;  %v1560_v32 = vrot.slane %v1559_v18, 1  ;;  %v1509_v33 = vadd.f32 %v1508_v21, %v1507_v10  ;;  %v1572_v37 = vrot.slane %v1571_v22, 1  ;;  %v1948_v15 = vld [vmem:[%s5443_s17 + $0x40] sm:$0xff] }
 0x4aa   :  { %v4490_v3 = vmul.f32 0.125, %v1491_v23  ;;  %v1555_v42 = vadd.f32 %v1554_v24, %v1553_v11  ;;  %v4492_v43 = vmul.f32 0.125, %v1503_v19  ;;  %v1567_v45 = vadd.f32 %v1566_v25, %v1565_v14 }
 0x4ab   :  { %v4494_v46 = vmul.f32 0.125, %v1497_v31  ;;  %v1561_v47 = vadd.f32 %v1560_v32, %v1559_v18  ;;  %v4496_v48 = vmul.f32 0.125, %v1509_v33  ;;  %v1573_v49 = vadd.f32 %v1572_v37, %v1571_v22 }
 0x4ac   :  { %v1598_v54 = vmul.f32 0.125, %v1555_v42  ;;  %v1606_v55 = vmul.f32 %v4490_v3, %v4490_v3  ;;  %v1600_v9 = vmul.f32 0.125, %v1567_v45  ;;  %v1608_v56 = vmul.f32 %v4492_v43, %v4492_v43 }
 0x4ad   :  { %v1599_v59 = vmul.f32 0.125, %v1561_v47  ;;  %v1607_v61 = vmul.f32 %v4494_v46, %v4494_v46  ;;  %v1601_v1 = vmul.f32 0.125, %v1573_v49  ;;  %v1609_v2 = vmul.f32 %v4496_v48, %v4496_v48  ;;  %v1955_v47 = vld [vmem:[%s5443_s17 + $0x78] sm:$0xff]  ;;  %v1957_v49 = vld [vmem:[%s5443_s17 + $0x88] sm:$0xff] }
 0x4ae   :  { %v1614_v4 = vsub.f32 %v1598_v54, %v1606_v55  ;;  %v1616_v16 = vsub.f32 %v1600_v9, %v1608_v56  ;;  %v2165_v17 = vunpack.c.l.s8.bf16 %v1941_v50  ;;  %v2167_v20 = vunpack.c.l.s8.bf16 %v1943_v35  ;;  %v1954_v9 = vld [vmem:[%s5443_s17 + $0x70] sm:$0xff]  ;;  %v1956_v56 = vld [vmem:[%s5443_s17 + $0x80] sm:$0xff] }
 0x4af   :  { %v1615_v39 = vsub.f32 %v1599_v59, %v1607_v61  ;;  %v1617_v44 = vsub.f32 %v1601_v1, %v1609_v2  ;;  %v2164_v41 = vunpack.c.l.s8.bf16 %v1940_v57  ;;  %v2166_v5 = vunpack.c.l.s8.bf16 %v1942_v58 }
 0x4b0   :  { %v1622_v60 = vmax.f32 %v1614_v4, 0.0  ;;  %v1624_v6 = vmax.f32 %v1616_v16, 0.0  ;;  %2612 = vmatprep.subr.bf16.mxu0 %v2165_v17  ;;  %2776 = vmatprep.subr.bf16.mxu1 %v2167_v20  ;;  %v2172_v22 = vunpack.c.h.s8.bf16 %v1941_v50  ;;  %v2171_v19 = vunpack.c.h.s8.bf16 %v1940_v57  ;;  %v1962_v4 = vld [vmem:[%s5443_s17 + $0xb0] sm:$0xff]  ;;  %v1964_v16 = vld [vmem:[%s5443_s17 + $0xc0] sm:$0xff] }
 0x4b1   :  { %v1623_v10 = vmax.f32 %v1615_v39, 0.0  ;;  %v1625_v7 = vmax.f32 %v1617_v44, 0.0  ;;  %2613 = vmatpush1.bf16.msra.mxu0 %v2164_v41  ;;  %2777 = vmatpush1.bf16.msra.mxu1 %v2166_v5  ;;  %v2173_v25 = vunpack.c.h.s8.bf16 %v1942_v58  ;;  %v2179_v31 = vunpack.c.l.s8.bf16 %v1948_v15 }
 0x4b2   :  { %v1675_v8 = vmul.f32 %v1638_v52, %v1622_v60  ;;  %v1677_v11 = vmul.f32 %v1646_v29, %v1624_v6  ;;  %v1950_v52 = vld [vmem:[%s5443_s17 + $0x50] sm:$0xff]  ;;  %v2174_v29 = vunpack.c.h.s8.bf16 %v1943_v35  ;;  %2614 = vmatprep.subr.bf16.mxu0 %v2172_v22  ;;  %v2186_v42 = vunpack.c.h.s8.bf16 %v1948_v15  ;;  %v1971_v22 = vld [vmem:[%s5443_s17 + $0xf8] sm:$0xff] }
 0x4b3   :  { %v1676_v12 = vmul.f32 %v1642_v36, %v1623_v10  ;;  %v1678_v14 = vmul.f32 %v1650_v30, %v1625_v7  ;;  %v1947_v36 = vld [vmem:[%s5443_s17 + $0x38] sm:$0xff]  ;;  %v1949_v30 = vld [vmem:[%s5443_s17 + $0x48] sm:$0xff]  ;;  %v2181_v32 = vunpack.c.l.s8.bf16 %v1950_v52  ;;  %v2188_v45 = vunpack.c.h.s8.bf16 %v1950_v52 }
 0x4b4   :  { %v1683_v18 = vadd.f32 1e-05, %v1675_v8  ;;  %v1685_v21 = vadd.f32 1e-05, %v1677_v11  ;;  %2778 = vmatprep.subr.bf16.mxu1 %v2174_v29  ;;  %v2178_v33 = vunpack.c.l.s8.bf16 %v1947_v36  ;;  %v2180_v37 = vunpack.c.l.s8.bf16 %v1949_v30  ;;  %v1961_v10 = vld [vmem:[%s5443_s17 + $0xa8] sm:$0xff]  ;;  %v1963_v7 = vld [vmem:[%s5443_s17 + $0xb8] sm:$0xff] }
 0x4b5   :  { %v1684_v23 = vadd.f32 1e-05, %v1676_v12  ;;  %v1686_v24 = vadd.f32 1e-05, %v1678_v14  ;;  %2615 = vmatpush1.bf16.msra.mxu0 %v2171_v19  ;;  %2779 = vmatpush1.bf16.msra.mxu1 %v2173_v25  ;;  %v2185_v50 = vunpack.c.h.s8.bf16 %v1947_v36  ;;  %v2187_v35 = vunpack.c.h.s8.bf16 %v1949_v30  ;;  %v1970_v19 = vld [vmem:[%s5443_s17 + $0xf0] sm:$0xff] }
 0x4b6   :  { %3578 = vrsqrt.f32 %v1683_v18  ;;  %2616 = vmatprep.subr.bf16.mxu0 %v2179_v31  ;;  %2780 = vmatprep.subr.bf16.mxu1 %v2181_v32  ;;  %v2193_v54 = vunpack.c.l.s8.bf16 %v1955_v47  ;;  %v2195_v55 = vunpack.c.l.s8.bf16 %v1957_v49  ;;  %v2192_v57 = vunpack.c.l.s8.bf16 %v1954_v9 }
 0x4b7   :  { %3580 = vrsqrt.f32 %v1685_v21  ;;  %v2194_v58 = vunpack.c.l.s8.bf16 %v1956_v56  ;;  %v2200_v61 = vunpack.c.h.s8.bf16 %v1955_v47  ;;  %v2202_v1 = vunpack.c.h.s8.bf16 %v1957_v49  ;;  %v1969_v21 = vld [vmem:[%s5443_s17 + $0xe8] sm:$0xff] }
 0x4b8   :  { %3582 = vrsqrt.f32 %v1684_v23  ;;  %v2199_v44 = vunpack.c.h.s8.bf16 %v1954_v9  ;;  %v2201_v41 = vunpack.c.h.s8.bf16 %v1956_v56  ;;  %v2207_v60 = vunpack.c.l.s8.bf16 %v1962_v4 }
 0x4b9   :  { %3584 = vrsqrt.f32 %v1686_v24  ;;  %2617 = vmatpush1.bf16.msra.mxu0 %v2178_v33  ;;  %2781 = vmatpush1.bf16.msra.mxu1 %v2180_v37  ;;  %v2209_v6 = vunpack.c.l.s8.bf16 %v1964_v16  ;;  %v2206_v12 = vunpack.c.l.s8.bf16 %v1961_v10  ;;  %v2208_v14 = vunpack.c.l.s8.bf16 %v1963_v7  ;;  %v1968_v24 = vld [vmem:[%s5443_s17 + $0xe0] sm:$0xff] }
 0x4ba   :  { %2618 = vmatprep.subr.bf16.mxu0 %v2186_v42  ;;  %2782 = vmatprep.subr.bf16.mxu1 %v2188_v45  ;;  %v2214_v52 = vunpack.c.h.s8.bf16 %v1962_v4  ;;  %v2216_v18 = vunpack.c.h.s8.bf16 %v1964_v16  ;;  %v2213_v29 = vunpack.c.h.s8.bf16 %v1961_v10  ;;  %v2215_v36 = vunpack.c.h.s8.bf16 %v1963_v7  ;;  %v1976_v37 = vld [vmem:[%s5443_s17 + $0x120] sm:$0xff]  ;;  %v1978_v42 = vld [vmem:[%s5443_s17 + $0x130] sm:$0xff] }
 0x4bb   :  { %v2221_v30 = vunpack.c.l.s8.bf16 %v1969_v21  ;;  %v2223_v23 = vunpack.c.l.s8.bf16 %v1971_v22  ;;  %v2220_v25 = vunpack.c.l.s8.bf16 %v1968_v24  ;;  %v2222_v31 = vunpack.c.l.s8.bf16 %v1970_v19  ;;  %v1982_v16 = vld [vmem:[%s5443_s17 + $0x150] sm:$0xff] }
 0x4bc   :  { %v2228_v32 = vunpack.c.h.s8.bf16 %v1969_v21  ;;  %v2230_v33 = vunpack.c.h.s8.bf16 %v1971_v22  ;;  %v2227_v45 = vunpack.c.h.s8.bf16 %v1968_v24  ;;  %v2229_v47 = vunpack.c.h.s8.bf16 %v1970_v19 }
 0x4bd   :  { %2619 = vmatpush1.bf16.msra.mxu0 %v2185_v50  ;;  %2783 = vmatpush1.bf16.msra.mxu1 %v2187_v35  ;;  %v2235_v49 = vunpack.c.l.s8.bf16 %v1976_v37  ;;  %v2237_v50 = vunpack.c.l.s8.bf16 %v1978_v42  ;;  %v1975_v35 = vld [vmem:[%s5443_s17 + $0x118] sm:$0xff]  ;;  %v2242_v56 = vunpack.c.h.s8.bf16 %v1976_v37 }
 0x4be   :  { %2620 = vmatprep.subr.bf16.mxu0 %v2193_v54  ;;  %2784 = vmatprep.subr.bf16.mxu1 %v2195_v55  ;;  %v1977_v54 = vld [vmem:[%s5443_s17 + $0x128] sm:$0xff]  ;;  %v2234_v55 = vunpack.c.l.s8.bf16 %v1975_v35 }
 0x4bf   :  { %v2236_v9 = vunpack.c.l.s8.bf16 %v1977_v54 }
 0x4c0   :  { %v3579_v59 = vpop.eup %3578 }
 0x4c1   :  { %v3581_v2 = vpop.eup %3580  ;;  %2621 = vmatpush1.bf16.msra.mxu0 %v2192_v57  ;;  %2785 = vmatpush1.bf16.msra.mxu1 %v2194_v58  ;;  %v2244_v57 = vunpack.c.h.s8.bf16 %v1978_v42  ;;  %v1983_v58 = vld [vmem:[%s5443_s17 + $0x158] sm:$0xff] }
 0x4c2   :  { %v3583_v17 = vpop.eup %3582  ;;  %2622 = vmatprep.subr.bf16.mxu0 %v2200_v61  ;;  %2786 = vmatprep.subr.bf16.mxu1 %v2202_v1  ;;  %v2241_v61 = vunpack.c.h.s8.bf16 %v1975_v35  ;;  %v2243_v1 = vunpack.c.h.s8.bf16 %v1977_v54 }
 0x4c3   :  { %v3585_v20 = vpop.eup %3584  ;;  %v1707_v39 = vcombine.low %v3579_v59, %v3583_v17  ;;  %v1985_v59 = vld [vmem:[%s5443_s17 + $0x168] sm:$0xff]  ;;  %v1984_v17 = vld [vmem:[%s5443_s17 + $0x160] sm:$0xff] }
 0x4c4   :  { %v1708_v5 = vcombine.low %v3581_v2, %v3585_v20  ;;  %v2249_v2 = vunpack.c.l.s8.bf16 %v1983_v58  ;;  %v2251_v4 = vunpack.c.l.s8.bf16 %v1985_v59  ;;  %v2248_v20 = vunpack.c.l.s8.bf16 %v1982_v16 }
 0x4c5   :  { %v4567_v8 = vrot.slane %v1707_v39, %v3880_v53  ;;  %2623 = vmatpush1.bf16.msra.mxu0 %v2199_v44  ;;  %2787 = vmatpush1.bf16.msra.mxu1 %v2201_v41  ;;  %v2250_v39 = vunpack.c.l.s8.bf16 %v1984_v17  ;;  %v2256_v44 = vunpack.c.h.s8.bf16 %v1983_v58  ;;  %v2258_v41 = vunpack.c.h.s8.bf16 %v1985_v59 }
 0x4c6   :  { %v4570_v11 = vrot.slane %v1708_v5, %v3880_v53  ;;  %2624 = vmatprep.subr.bf16.mxu0 %v2207_v60  ;;  %2788 = vmatprep.subr.bf16.mxu1 %v2209_v6  ;;  %v1990_v5 = vld [vmem:[%s5443_s17 + $0x190] sm:$0xff]  ;;  %v1992_v60 = vld [vmem:[%s5443_s17 + $0x1a0] sm:$0xff]  ;;  %v2255_v6 = vunpack.c.h.s8.bf16 %v1982_v16  ;;  %v2257_v10 = vunpack.c.h.s8.bf16 %v1984_v17 }
 0x4c7   :  { %v2263_v7 = vunpack.c.l.s8.bf16 %v1990_v5  ;;  %v2270_v22 = vunpack.c.h.s8.bf16 %v1990_v5 }
 0x4c8   :  { %v1739_v15 = vcombine.low %v4567_v8, %v4570_v11 }
 0x4c9   :  { %2625 = vmatpush1.bf16.msra.mxu0 %v2206_v12  ;;  %2789 = vmatpush1.bf16.msra.mxu1 %v2208_v14  ;;  %v2265_v12 = vunpack.c.l.s8.bf16 %v1992_v60  ;;  %v1989_v14 = vld [vmem:[%s5443_s17 + $0x188] sm:$0xff] }
 0x4ca   :  { %2626 = vmatprep.subr.bf16.mxu0 %v2214_v52  ;;  %2790 = vmatprep.subr.bf16.mxu1 %v2216_v18  ;;  %v1991_v52 = vld [vmem:[%s5443_s17 + $0x198] sm:$0xff]  ;;  %v2262_v18 = vunpack.c.l.s8.bf16 %v1989_v14 }
 0x4cb   :  { %v2264_v21 = vunpack.c.l.s8.bf16 %v1991_v52  ;;  %v2271_v24 = vunpack.c.h.s8.bf16 %v1991_v52 }
 0x4cd   :  { %2627 = vmatpush1.bf16.msra.mxu0 %v2213_v29  ;;  %2791 = vmatpush1.bf16.msra.mxu1 %v2215_v36  ;;  %v2272_v29 = vunpack.c.h.s8.bf16 %v1992_v60  ;;  %v4625_v36 = vld [vmem:[%s5443_s17 + $0x1c8] sm:$0xff] }
 0x4ce   :  { %2628 = vmatprep.subr.bf16.mxu0 %v2221_v30  ;;  %2792 = vmatprep.subr.bf16.mxu1 %v2223_v23  ;;  %v4630_v30 = vld [vmem:[%s5443_s17 + $0x1d8] sm:$0xff]  ;;  %v2269_v23 = vunpack.c.h.s8.bf16 %v1989_v14  ;;  %v2277_v19 = vunpack.c.l.s8.bf16 %v4625_v36 }
 0x4d1   :  { %2629 = vmatpush1.bf16.msra.mxu0 %v2220_v25  ;;  %2793 = vmatpush1.bf16.msra.mxu1 %v2222_v31  ;;  %v2279_v25 = vunpack.c.l.s8.bf16 %v4630_v30 }
 0x4d2   :  { %2630 = vmatprep.subr.bf16.mxu0 %v2228_v32  ;;  %2794 = vmatprep.subr.bf16.mxu1 %v2230_v33  ;;  %v4637_v32 = vsub.s32 4, %v3795_v62  ;;  %v4640_v33 = vsub.s32 6, %v3795_v62 }
 0x4d5   :  { %2631 = vmatpush1.bf16.msra.mxu0 %v2227_v45  ;;  %2795 = vmatpush1.bf16.msra.mxu1 %v2229_v47 }
 0x4d6   :  { %2632 = vmatprep.subr.bf16.mxu0 %v2235_v49  ;;  %2796 = vmatprep.subr.bf16.mxu1 %v2237_v50  ;;  %v4650_v49 = vsub.s32 5, %v3795_v62  ;;  %v4653_v50 = vsub.s32 7, %v3795_v62 }
 0x4d9   :  { %2633 = vmatpush1.bf16.msra.mxu0 %v2234_v55  ;;  %2797 = vmatpush1.bf16.msra.mxu1 %v2236_v9 }
 0x4da   :  { %2634 = vmatprep.subr.bf16.mxu0 %v2242_v56  ;;  %2798 = vmatprep.subr.bf16.mxu1 %v2244_v57 }
 0x4dd   :  { %2635 = vmatpush1.bf16.msra.mxu0 %v2241_v61  ;;  %2799 = vmatpush1.bf16.msra.mxu1 %v2243_v1 }
 0x4de   :  { %2636 = vmatprep.subr.bf16.mxu0 %v2249_v2  ;;  %2800 = vmatprep.subr.bf16.mxu1 %v2251_v4 }
 0x4e1   :  { %2637 = vmatpush1.bf16.msra.mxu0 %v2248_v20  ;;  %2801 = vmatpush1.bf16.msra.mxu1 %v2250_v39 }
 0x4e2   :  { %2638 = vmatprep.subr.bf16.mxu0 %v2256_v44  ;;  %2802 = vmatprep.subr.bf16.mxu1 %v2258_v41 }
 0x4e5   :  { %2639 = vmatpush1.bf16.msra.mxu0 %v2255_v6  ;;  %2803 = vmatpush1.bf16.msra.mxu1 %v2257_v10 }
 0x4e6   :  { %2640 = vmatprep.subr.bf16.mxu0 %v2263_v7  ;;  %2804 = vmatprep.subr.bf16.mxu1 %v2265_v12 }
 0x4e9   :  { %2641 = vmatpush1.bf16.msra.mxu0 %v2262_v18  ;;  %2805 = vmatpush1.bf16.msra.mxu1 %v2264_v21 }
 0x4ea   :  { %2642 = vmatprep.subr.bf16.mxu0 %v2270_v22  ;;  %2806 = vmatprep.subr.bf16.mxu1 %v2272_v29 }
 0x4ed   :  { %2643 = vmatpush1.bf16.msra.mxu0 %v2269_v23  ;;  %2807 = vmatpush1.bf16.msra.mxu1 %v2271_v24 }
 0x4ee   :  { %2653 = vmatprep.subr.bf16.mxu0 %v2277_v19  ;;  %2817 = vmatprep.subr.bf16.mxu1 %v2279_v25 }
 0x51d   :  { %v4634_v31 = vpop.f32.mrb[8].mxu0 }
 0x51e   :  { %v1510_v37 = vrot.slane %v4634_v31, 4  ;;  %v1546_v42 = vmul.f32 %v4634_v31, %v4634_v31  ;;  %v4645_v45 = vpop.f32.mrb[16].mxu1  ;;  %v4647_v47 = vpop.f32.mrb[9].mxu0 }
 0x51f   :  { %v1522_v35 = vrot.slane %v4645_v45, 4  ;;  %v1548_v54 = vmul.f32 %v4645_v45, %v4645_v45  ;;  %v1516_v55 = vrot.slane %v4647_v47, 4  ;;  %v1547_v9 = vmul.f32 %v4647_v47, %v4647_v47  ;;  %v4661_v56 = vpop.f32.mrb[17].mxu1  ;;  %v1401_v57 = vpop.f32.mrb[10].mxu0 }
 0x520   :  { %v1511_v58 = vadd.f32 %v1510_v37, %v4634_v31  ;;  %v1574_v59 = vrot.slane %v1546_v42, 4  ;;  %v1528_v61 = vrot.slane %v4661_v56, 4  ;;  %v1549_v62 = vmul.f32 %v4661_v56, %v4661_v56  ;;  %v1483_v1 = vpop.f32.mrb[18].mxu1  ;;  %v1402_v2 = vpop.f32.mrb[11].mxu0 }
 0x521   :  { %v1523_v4 = vadd.f32 %v1522_v35, %v4645_v45  ;;  %v1586_v16 = vrot.slane %v1548_v54, 4  ;;  %v1517_v17 = vadd.f32 %v1516_v55, %v4647_v47  ;;  %v1580_v20 = vrot.slane %v1547_v9, 4  ;;  %v1484_v39 = vpop.f32.mrb[19].mxu1 }
 0x522   :  { %v1512_v44 = vrot.slane %v1511_v58, 2  ;;  %v1575_v41 = vadd.f32 %v1574_v59, %v1546_v42  ;;  %v1529_v5 = vadd.f32 %v1528_v61, %v4661_v56  ;;  %v1592_v60 = vrot.slane %v1549_v62, 4 }
 0x523   :  { %v1524_v6 = vrot.slane %v1523_v4, 2  ;;  %v1587_v10 = vadd.f32 %v1586_v16, %v1548_v54  ;;  %v1518_v7 = vrot.slane %v1517_v17, 2  ;;  %v1581_v12 = vadd.f32 %v1580_v20, %v1547_v9 }
 0x524   :  { %v1513_v14 = vadd.f32 %v1512_v44, %v1511_v58  ;;  %v1576_v52 = vrot.slane %v1575_v41, 2  ;;  %v1530_v18 = vrot.slane %v1529_v5, 2  ;;  %v1593_v21 = vadd.f32 %v1592_v60, %v1549_v62 }
 0x525   :  { %v1525_v22 = vadd.f32 %v1524_v6, %v1523_v4  ;;  %v1588_v29 = vrot.slane %v1587_v10, 2  ;;  %v1519_v23 = vadd.f32 %v1518_v7, %v1517_v17  ;;  %v1582_v24 = vrot.slane %v1581_v12, 2 }
 0x526   :  { %v1514_v19 = vrot.slane %v1513_v14, 1  ;;  %v1577_v25 = vadd.f32 %v1576_v52, %v1575_v41  ;;  %v1531_v37 = vadd.f32 %v1530_v18, %v1529_v5  ;;  %v1594_v35 = vrot.slane %v1593_v21, 2 }
 0x527   :  { %v1526_v42 = vrot.slane %v1525_v22, 1  ;;  %v1589_v55 = vadd.f32 %v1588_v29, %v1587_v10  ;;  %v1520_v57 = vrot.slane %v1519_v23, 1  ;;  %v1583_v59 = vadd.f32 %v1582_v24, %v1581_v12 }
 0x528   :  { %v1515_v61 = vadd.f32 %v1514_v19, %v1513_v14  ;;  %v1578_v54 = vrot.slane %v1577_v25, 1  ;;  %v1532_v1 = vrot.slane %v1531_v37, 1  ;;  %v1595_v9 = vadd.f32 %v1594_v35, %v1593_v21 }
 0x529   :  { %v1527_v58 = vadd.f32 %v1526_v42, %v1525_v22  ;;  %v1590_v2 = vrot.slane %v1589_v55, 1  ;;  %v1521_v16 = vadd.f32 %v1520_v57, %v1519_v23  ;;  %v1584_v62 = vrot.slane %v1583_v59, 1 }
 0x52a   :  { %v4670_v4 = vmul.f32 0.125, %v1515_v61  ;;  %v1579_v17 = vadd.f32 %v1578_v54, %v1577_v25  ;;  %v1533_v20 = vadd.f32 %v1532_v1, %v1531_v37  ;;  %v1596_v39 = vrot.slane %v1595_v9, 1 }
 0x52b   :  { %v4672_v44 = vmul.f32 0.125, %v1527_v58  ;;  %v1591_v41 = vadd.f32 %v1590_v2, %v1589_v55  ;;  %v4674_v5 = vmul.f32 0.125, %v1521_v16  ;;  %v1585_v60 = vadd.f32 %v1584_v62, %v1583_v59 }
 0x52c   :  { %v1602_v6 = vmul.f32 0.125, %v1579_v17  ;;  %v1610_v10 = vmul.f32 %v4670_v4, %v4670_v4  ;;  %v1541_v7 = vmul.f32 0.125, %v1533_v20  ;;  %v1597_v12 = vadd.f32 %v1596_v39, %v1595_v9 }
 0x52d   :  { %v1604_v14 = vmul.f32 0.125, %v1591_v41  ;;  %v1612_v52 = vmul.f32 %v4672_v44, %v4672_v44  ;;  %v1603_v18 = vmul.f32 0.125, %v1585_v60  ;;  %v1611_v21 = vmul.f32 %v4674_v5, %v4674_v5 }
 0x52e   :  { %v1618_v22 = vsub.f32 %v1602_v6, %v1610_v10  ;;  %v1654_v29 = vrot.slane %v4456_v27, %v4637_v32  ;;  %v1605_v23 = vmul.f32 0.125, %v1597_v12  ;;  %v1613_v24 = vmul.f32 %v1541_v7, %v1541_v7 }
 0x52f   :  { %v1620_v19 = vsub.f32 %v1604_v14, %v1612_v52  ;;  %v1662_v25 = vrot.slane %v4456_v27, %v4640_v33  ;;  %v1619_v37 = vsub.f32 %v1603_v18, %v1611_v21  ;;  %v1658_v35 = vrot.slane %v4456_v27, %v4650_v49  ;;  %v1631_v52 = vld [vmem:[%s5441_s15] sm:$0xff] }
 0x530   :  { %v1626_v42 = vmax.f32 %v1618_v22, 0.0  ;;  %v1621_v55 = vsub.f32 %v1605_v23, %v1613_v24  ;;  %v1666_v57 = vrot.slane %v4456_v27, %v4653_v50  ;;  %v1747_v21 = vrot.slane %v1739_v15, %v3880_v53 }
 0x531   :  { %v1628_v59 = vmax.f32 %v1620_v19, 0.0  ;;  %v1627_v61 = vmax.f32 %v1619_v37, 0.0  ;;  %v1632_v22 = vmul.f32 %v1631_v52, %v4452_v26 }
 0x532   :  { %v1679_v54 = vmul.f32 %v1654_v29, %v1626_v42  ;;  %v1629_v1 = vmax.f32 %v1621_v55, 0.0 }
 0x533   :  { %v1681_v9 = vmul.f32 %v1662_v25, %v1628_v59  ;;  %v1680_v58 = vmul.f32 %v1658_v35, %v1627_v61 }
 0x534   :  { %v1687_v2 = vadd.f32 1e-05, %v1679_v54  ;;  %v1682_v16 = vmul.f32 %v1666_v57, %v1629_v1 }
 0x535   :  { %v1689_v62 = vadd.f32 1e-05, %v1681_v9  ;;  %v1688_v17 = vadd.f32 1e-05, %v1680_v58 }
 0x536   :  { %3586 = vrsqrt.f32 %v1687_v2  ;;  %v1690_v20 = vadd.f32 1e-05, %v1682_v16 }
 0x537   :  { %3588 = vrsqrt.f32 %v1689_v62 }
 0x538   :  { %3590 = vrsqrt.f32 %v1688_v17 }
 0x539   :  { %3592 = vrsqrt.f32 %v1690_v20 }
 0x540   :  { %v3587_v39 = vpop.eup %3586 }
 0x541   :  { %v3589_v41 = vpop.eup %3588 }
 0x542   :  { %v3591_v60 = vpop.eup %3590 }
 0x543   :  { %v3593_v6 = vpop.eup %3592  ;;  %v1709_v27 = vcombine.low %v3587_v39, %v3591_v60 }
 0x544   :  { %v1710_v10 = vcombine.low %v3589_v41, %v3593_v6 }
 0x545   :  { %v1731_v12 = vrot.slane %v1709_v27, %v3880_v53 }
 0x546   :  { %v1738_v14 = vrot.slane %v1710_v10, %v3880_v53 }
 0x548   :  { %v1740_v18 = vcombine.low %v1731_v12, %v1738_v14 }
 0x54a   :  { %v1754_v29 = vrot.slane %v1740_v18, %v3880_v53 }
 0x54c   :  { %v1755_v23 = vcombine.low %v1747_v21, %v1754_v29  ;;  %v1996_v21 = vld [vmem:[%s5443_s17 + $0x1c0] sm:$0xff] }
 0x54e   :  { %v1757_v24 = vmul.f32 %v1755_v23, %v1632_v22 }
 0x550   :  { %v1763_v19 = vrot.slane %v1757_v24, %v3798_v0  ;;  %v1767_v25 = vrot.slane %v1757_v24, %v3875_v34  ;;  %v1771_v37 = vrot.slane %v1757_v24, %v4102_v13  ;;  %v1775_v35 = vrot.slane %v1757_v24, %v4105_v63 }
 0x551   :  { %v1779_v42 = vrot.slane %v1757_v24, %v4637_v32  ;;  %v1783_v55 = vrot.slane %v1757_v24, %v4650_v49  ;;  %v1787_v8 = vrot.slane %v1757_v24, %v4640_v33  ;;  %v1791_v26 = vrot.slane %v1757_v24, %v4653_v50 }
 0x552   :  { %v1800_v11 = vmul.f32 %v1763_v19, %v4490_v3  ;;  %v1801_v15 = vmul.f32 %v1767_v25, %v4494_v46  ;;  %v1802_v57 = vmul.f32 %v1771_v37, %v4492_v43  ;;  %v1803_v59 = vmul.f32 %v1775_v35, %v4496_v48 }
 0x553   :  { %v1804_v61 = vmul.f32 %v1779_v42, %v4670_v4  ;;  %v1805_v54 = vmul.f32 %v1783_v55, %v4674_v5  ;;  %v1806_v1 = vmul.f32 %v1787_v8, %v4672_v44  ;;  %v1807_v9 = vmul.f32 %v1791_v26, %v1541_v7 }
 0x554   :  { %v1816_v58 = vcombine.low %v1800_v11, %v1801_v15  ;;  %v1817_v2 = vcombine.low %v1802_v57, %v1803_v59  ;;  %v1874_v16 = vmul.f32 %v1791_v26, %v4661_v56  ;;  %v1868_v62 = vmul.f32 %v1767_v25, %v4476_v38  ;;  %v2004_v11 = vld [vmem:[%s5443_s17 + $0x200] sm:$0xff]  ;;  %v2006_v15 = vld [vmem:[%s5443_s17 + $0x210] sm:$0xff] }
 0x555   :  { %v1818_v3 = vcombine.low %v1804_v61, %v1805_v54  ;;  %v1819_v17 = vcombine.low %v1806_v1, %v1807_v9  ;;  %v1867_v46 = vmul.f32 %v1763_v19, %v4458_v51  ;;  %v1870_v43 = vmul.f32 %v1775_v35, %v4478_v40 }
 0x556   :  { %v1826_v48 = vrot.slane %v1816_v58, %v3880_v53  ;;  %v1833_v4 = vrot.slane %v1817_v2, %v3880_v53  ;;  %v1869_v5 = vmul.f32 %v1771_v37, %v4462_v28  ;;  %v1872_v44 = vmul.f32 %v1783_v55, %v4647_v47  ;;  %v1758_v28 = vld [vmem:[%s5442_s16] sm:$0xff]  ;;  %v2003_v58 = vld [vmem:[%s5443_s17 + $0x1f8] sm:$0xff]  ;;  %v2005_v2 = vld [vmem:[%s5443_s17 + $0x208] sm:$0xff] }
 0x557   :  { %v1840_v7 = vrot.slane %v1818_v3, %v3880_v53  ;;  %v1847_v56 = vrot.slane %v1819_v17, %v3880_v53  ;;  %v1871_v40 = vmul.f32 %v1779_v42, %v4634_v31  ;;  %v1873_v41 = vmul.f32 %v1787_v8, %v4645_v45 }
 0x558   :  { %v1848_v20 = vcombine.low %v1826_v48, %v1833_v4  ;;  %v2276_v35 = vunpack.c.l.s8.bf16 %v1996_v21  ;;  %v2284_v8 = vunpack.c.h.s8.bf16 %v4625_v36  ;;  %v2286_v26 = vunpack.c.h.s8.bf16 %v4630_v30 }
 0x559   :  { %v1849_v38 = vcombine.low %v1840_v7, %v1847_v56  ;;  %v2283_v36 = vunpack.c.h.s8.bf16 %v1996_v21  ;;  %v2291_v1 = vunpack.c.l.s8.bf16 %v2004_v11  ;;  %v2293_v9 = vunpack.c.l.s8.bf16 %v2006_v15  ;;  %v2010_v7 = vld [vmem:[%s5443_s17 + $0x230] sm:$0xff]  ;;  %v2012_v56 = vld [vmem:[%s5443_s17 + $0x240] sm:$0xff] }
 0x55a   :  { %v1856_v39 = vrot.slane %v1848_v20, %v3880_v53  ;;  %v2298_v3 = vunpack.c.h.s8.bf16 %v2004_v11  ;;  %v2300_v17 = vunpack.c.h.s8.bf16 %v2006_v15  ;;  %v2297_v48 = vunpack.c.h.s8.bf16 %v2003_v58  ;;  %v2032_v11 = vld [vmem:[%s5443_s17 + $0x2e0] sm:$0xff]  ;;  %v2034_v15 = vld [vmem:[%s5443_s17 + $0x2f0] sm:$0xff] }
 0x55b   :  { %v1863_v51 = vrot.slane %v1849_v38, %v3880_v53  ;;  %v2299_v4 = vunpack.c.h.s8.bf16 %v2005_v2  ;;  %v2304_v20 = vunpack.c.l.s8.bf16 %v2010_v7  ;;  %v2306_v38 = vunpack.c.l.s8.bf16 %v2012_v56 }
 0x55d   :  { %v1864_v60 = vcombine.low %v1856_v39, %v1863_v51 }
 0x55f   :  { %v1866_v47 = vsub.f32 %v1758_v28, %v1864_v60  ;;  %v2311_v28 = vunpack.c.h.s8.bf16 %v2010_v7  ;;  %v2313_v60 = vunpack.c.h.s8.bf16 %v2012_v56  ;;  %v2040_v7 = vld [vmem:[%s5443_s17 + $0x320] sm:$0xff] }
 0x561   :  { %v1907_v6 = vrot.slane %v1866_v47, %v4653_v50  ;;  %v1883_v27 = vrot.slane %v1866_v47, %v3875_v34  ;;  %v1879_v10 = vrot.slane %v1866_v47, %v3798_v0  ;;  %v1891_v12 = vrot.slane %v1866_v47, %v4105_v63  ;;  %v1998_v50 = vld [vmem:[%s5443_s17 + $0x1d0] sm:$0xff] }
 0x562   :  { %v1887_v53 = vrot.slane %v1866_v47, %v4102_v13  ;;  %v1899_v31 = vrot.slane %v1866_v47, %v4650_v49  ;;  %v2278_v42 = vunpack.c.l.s8.bf16 %v1998_v50  ;;  %v1895_v55 = vrot.slane %v1866_v47, %v4637_v32 }
 0x563   :  { %v4739_v14 = vadd.f32 %v1907_v6, %v1874_v16  ;;  %v1917_v45 = vadd.f32 %v1883_v27, %v1868_v62  ;;  %v1916_v52 = vadd.f32 %v1879_v10, %v1867_v46  ;;  %v1919_v18 = vadd.f32 %v1891_v12, %v1870_v43  ;;  %v2011_v46 = vld [vmem:[%s5443_s17 + $0x238] sm:$0xff]  ;;  %v2013_v43 = vld [vmem:[%s5443_s17 + $0x248] sm:$0xff] }
 0x564   :  { %v4747_v22 = vadd.f32 %v1887_v53, %v1869_v5  ;;  %v4749_v29 = vadd.f32 %v1899_v31, %v1872_v44  ;;  %v1903_v57 = vrot.slane %v1866_v47, %v4640_v33  ;;  %v4771_v61 = vadd.f32 %v1895_v55, %v1871_v40  ;;  %v2018_v40 = vld [vmem:[%s5443_s17 + $0x270] sm:$0xff]  ;;  %v2017_v27 = vld [vmem:[%s5443_s17 + $0x268] sm:$0xff]  ;;  %v2019_v10 = vld [vmem:[%s5443_s17 + $0x278] sm:$0xff] }
 0x565   :  { %v1925_v23 = vmax.f32 %v1917_v45, 0.0  ;;  %v1924_v24 = vmax.f32 %v1916_v52, 0.0  ;;  %v1927_v19 = vmax.f32 %v1919_v18, 0.0  ;;  %v2285_v30 = vunpack.c.h.s8.bf16 %v1998_v50  ;;  %v2025_v52 = vld [vmem:[%s5443_s17 + $0x2a8] sm:$0xff]  ;;  %v2027_v18 = vld [vmem:[%s5443_s17 + $0x2b8] sm:$0xff] }
 0x566   :  { %v4773_v54 = vadd.f32 %v1903_v57, %v1873_v41  ;;  %v2290_v16 = vunpack.c.l.s8.bf16 %v2003_v58  ;;  %v2292_v62 = vunpack.c.l.s8.bf16 %v2005_v2  ;;  %v2305_v5 = vunpack.c.l.s8.bf16 %v2011_v46  ;;  %v2020_v41 = vld [vmem:[%s5443_s17 + $0x280] sm:$0xff]  ;;  %v2033_v58 = vld [vmem:[%s5443_s17 + $0x2e8] sm:$0xff] }
 0x567   :  { %v4751_v25 = vpack.c.bf16 %v1925_v23, %v1925_v23  ;;  %v4753_v37 = vpack.c.bf16 %v1924_v24, %v1924_v24  ;;  %v4769_v59 = vpack.c.bf16 %v1927_v19, %v1927_v19  ;;  %v2307_v44 = vunpack.c.l.s8.bf16 %v2013_v43  ;;  %v2024_v19 = vld [vmem:[%s5443_s17 + $0x2a0] sm:$0xff] }
 0x568   :  { %v2312_v39 = vunpack.c.h.s8.bf16 %v2011_v46  ;;  %v2314_v51 = vunpack.c.h.s8.bf16 %v2013_v43  ;;  %v2319_v47 = vunpack.c.l.s8.bf16 %v2018_v40  ;;  %v2321_v6 = vunpack.c.l.s8.bf16 %v2020_v41  ;;  %v2041_v46 = vld [vmem:[%s5443_s17 + $0x328] sm:$0xff] }
 0x569   :  { %2644 = vmatprep.mubr.bf16.mxu0 %v4751_v25  ;;  %2808 = vmatprep.mubr.bf16.mxu1 %v4751_v25  ;;  %v2318_v12 = vunpack.c.l.s8.bf16 %v2017_v27  ;;  %v2320_v53 = vunpack.c.l.s8.bf16 %v2019_v10  ;;  %v2326_v31 = vunpack.c.h.s8.bf16 %v2018_v40  ;;  %v2328_v45 = vunpack.c.h.s8.bf16 %v2020_v41  ;;  %v2048_v40 = vld [vmem:[%s5443_s17 + $0x360] sm:$0xff] }
 0x56a   :  { %2645 = vmatmul.mubr.bf16.vlgmr.msra.gmra.mrb[12].mxu0 %v4753_v37  ;;  %2809 = vmatmul.mubr.bf16.vlgmr.msra.gmra.mrb[20].mxu1 %v4753_v37  ;;  %v2325_v21 = vunpack.c.h.s8.bf16 %v2017_v27  ;;  %v2327_v50 = vunpack.c.h.s8.bf16 %v2019_v10  ;;  %v2333_v23 = vunpack.c.l.s8.bf16 %v2025_v52  ;;  %v2335_v24 = vunpack.c.l.s8.bf16 %v2027_v18  ;;  %v2047_v27 = vld [vmem:[%s5443_s17 + $0x358] sm:$0xff] }
 0x56b   :  { %2654 = vmatpush1.bf16.msra.mxu0 %v2276_v35  ;;  %2818 = vmatpush1.bf16.msra.mxu1 %v2278_v42  ;;  %v2026_v35 = vld [vmem:[%s5443_s17 + $0x2b0] sm:$0xff]  ;;  %v2332_v42 = vunpack.c.l.s8.bf16 %v2024_v19  ;;  %v2339_v57 = vunpack.c.h.s8.bf16 %v2024_v19  ;;  %v2052_v19 = vld [vmem:[%s5443_s17 + $0x380] sm:$0xff] }
 0x56c   :  { %2685 = vmatprep.mubr.bf16.mxu0 %v4769_v59  ;;  %2849 = vmatprep.mubr.bf16.mxu1 %v4769_v59  ;;  %v2334_v55 = vunpack.c.l.s8.bf16 %v2026_v35 }
 0x56d   :  { %2655 = vmatprep.subr.bf16.mxu0 %v2284_v8  ;;  %2819 = vmatprep.subr.bf16.mxu1 %v2286_v26  ;;  %v2340_v8 = vunpack.c.h.s8.bf16 %v2025_v52  ;;  %v2342_v26 = vunpack.c.h.s8.bf16 %v2027_v18  ;;  %v2055_v52 = vld [vmem:[%s5443_s17 + $0x398] sm:$0xff] }
 0x56f   :  { %2656 = vmatpush1.bf16.msra.mxu0 %v2283_v36  ;;  %2820 = vmatpush1.bf16.msra.mxu1 %v2285_v30  ;;  %v2341_v36 = vunpack.c.h.s8.bf16 %v2026_v35  ;;  %v2347_v30 = vunpack.c.l.s8.bf16 %v2032_v11  ;;  %v1929_v35 = vmax.f32 %v4749_v29, 0.0  ;;  %v2060_v29 = vld [vmem:[%s5443_s17 + $0x3c0] sm:$0xff] }
 0x570   :  { %2657 = vmatprep.subr.bf16.mxu0 %v2291_v1  ;;  %2821 = vmatprep.subr.bf16.mxu1 %v2293_v9  ;;  %v2349_v1 = vunpack.c.l.s8.bf16 %v2034_v15  ;;  %v2031_v9 = vld [vmem:[%s5443_s17 + $0x2d8] sm:$0xff] }
 0x571   :  { %v2346_v2 = vunpack.c.l.s8.bf16 %v2031_v9  ;;  %v2353_v43 = vunpack.c.h.s8.bf16 %v2031_v9  ;;  %v2059_v9 = vld [vmem:[%s5443_s17 + $0x3b8] sm:$0xff] }
 0x573   :  { %2658 = vmatpush1.bf16.msra.mxu0 %v2290_v16  ;;  %2822 = vmatpush1.bf16.msra.mxu1 %v2292_v62  ;;  %v2348_v16 = vunpack.c.l.s8.bf16 %v2033_v58  ;;  %v2354_v62 = vunpack.c.h.s8.bf16 %v2032_v11 }
 0x574   :  { %2659 = vmatprep.subr.bf16.mxu0 %v2298_v3  ;;  %2823 = vmatprep.subr.bf16.mxu1 %v2300_v17  ;;  %v2356_v3 = vunpack.c.h.s8.bf16 %v2034_v15  ;;  %v2039_v17 = vld [vmem:[%s5443_s17 + $0x318] sm:$0xff]  ;;  %v2398_v15 = vunpack.c.h.s8.bf16 %v2055_v52 }
 0x577   :  { %2660 = vmatpush1.bf16.msra.mxu0 %v2297_v48  ;;  %2824 = vmatpush1.bf16.msra.mxu1 %v2299_v4  ;;  %v2355_v48 = vunpack.c.h.s8.bf16 %v2033_v58  ;;  %v2361_v4 = vunpack.c.l.s8.bf16 %v2039_v17 }
 0x578   :  { %2661 = vmatprep.subr.bf16.mxu0 %v2305_v5  ;;  %2825 = vmatprep.subr.bf16.mxu1 %v2307_v44  ;;  %v2363_v5 = vunpack.c.l.s8.bf16 %v2041_v46  ;;  %v2038_v44 = vld [vmem:[%s5443_s17 + $0x310] sm:$0xff] }
 0x579   :  { %v2360_v56 = vunpack.c.l.s8.bf16 %v2038_v44  ;;  %v2367_v41 = vunpack.c.h.s8.bf16 %v2038_v44  ;;  %v2066_v44 = vld [vmem:[%s5443_s17 + $0x3f0] sm:$0xff] }
 0x57b   :  { %2662 = vmatpush1.bf16.msra.mxu0 %v2304_v20  ;;  %2826 = vmatpush1.bf16.msra.mxu1 %v2306_v38  ;;  %v2362_v20 = vunpack.c.l.s8.bf16 %v2040_v7  ;;  %v2368_v38 = vunpack.c.h.s8.bf16 %v2039_v17 }
 0x57c   :  { %2663 = vmatprep.subr.bf16.mxu0 %v2312_v39  ;;  %2827 = vmatprep.subr.bf16.mxu1 %v2314_v51  ;;  %v2370_v39 = vunpack.c.h.s8.bf16 %v2041_v46  ;;  %v2046_v51 = vld [vmem:[%s5443_s17 + $0x350] sm:$0xff]  ;;  %v2067_v46 = vld [vmem:[%s5443_s17 + $0x3f8] sm:$0xff] }
 0x57f   :  { %2664 = vmatpush1.bf16.msra.mxu0 %v2311_v28  ;;  %2828 = vmatpush1.bf16.msra.mxu1 %v2313_v60  ;;  %v2369_v28 = vunpack.c.h.s8.bf16 %v2040_v7  ;;  %v2375_v60 = vunpack.c.l.s8.bf16 %v2046_v51 }
 0x580   :  { %2665 = vmatprep.subr.bf16.mxu0 %v2319_v47  ;;  %2829 = vmatprep.subr.bf16.mxu1 %v2321_v6  ;;  %v2377_v47 = vunpack.c.l.s8.bf16 %v2048_v40  ;;  %v2045_v6 = vld [vmem:[%s5443_s17 + $0x348] sm:$0xff] }
 0x581   :  { %v2374_v10 = vunpack.c.l.s8.bf16 %v2045_v6  ;;  %v2381_v18 = vunpack.c.h.s8.bf16 %v2045_v6  ;;  %v2073_v6 = vld [vmem:[%s5443_s17 + $0x428] sm:$0xff] }
 0x583   :  { %2666 = vmatpush1.bf16.msra.mxu0 %v2318_v12  ;;  %2830 = vmatpush1.bf16.msra.mxu1 %v2320_v53  ;;  %v2376_v12 = vunpack.c.l.s8.bf16 %v2047_v27  ;;  %v2382_v53 = vunpack.c.h.s8.bf16 %v2046_v51 }
 0x584   :  { %2667 = vmatprep.subr.bf16.mxu0 %v2326_v31  ;;  %2831 = vmatprep.subr.bf16.mxu1 %v2328_v45  ;;  %v2384_v31 = vunpack.c.h.s8.bf16 %v2048_v40  ;;  %v2053_v45 = vld [vmem:[%s5443_s17 + $0x388] sm:$0xff]  ;;  %v2074_v40 = vld [vmem:[%s5443_s17 + $0x430] sm:$0xff] }
 0x585   :  { %v2396_v11 = vunpack.c.h.s8.bf16 %v2053_v45 }
 0x587   :  { %2668 = vmatpush1.bf16.msra.mxu0 %v2325_v21  ;;  %2832 = vmatpush1.bf16.msra.mxu1 %v2327_v50  ;;  %v2383_v21 = vunpack.c.h.s8.bf16 %v2047_v27  ;;  %v1926_v50 = vmax.f32 %v4747_v22, 0.0 }
 0x588   :  { %2669 = vmatprep.subr.bf16.mxu0 %v2333_v23  ;;  %2833 = vmatprep.subr.bf16.mxu1 %v2335_v24  ;;  %v2389_v23 = vunpack.c.l.s8.bf16 %v2053_v45  ;;  %v2391_v24 = vunpack.c.l.s8.bf16 %v2055_v52  ;;  %v2081_v52 = vld [vmem:[%s5443_s17 + $0x468] sm:$0xff] }
 0x58b   :  { %2670 = vmatpush1.bf16.msra.mxu0 %v2332_v42  ;;  %2834 = vmatpush1.bf16.msra.mxu1 %v2334_v55  ;;  %v2054_v42 = vld [vmem:[%s5443_s17 + $0x390] sm:$0xff]  ;;  %v2388_v55 = vunpack.c.l.s8.bf16 %v2052_v19 }
 0x58c   :  { %2671 = vmatprep.subr.bf16.mxu0 %v2340_v8  ;;  %2835 = vmatprep.subr.bf16.mxu1 %v2342_v26  ;;  %v4869_v8 = vpack.c.bf16 %v1926_v50, %v1926_v50  ;;  %v2390_v22 = vunpack.c.l.s8.bf16 %v2054_v42  ;;  %v4871_v26 = vpack.c.bf16 %v1929_v35, %v1929_v35  ;;  %v2082_v35 = vld [vmem:[%s5443_s17 + $0x470] sm:$0xff] }
 0x58f   :  { %2672 = vmatpush1.bf16.msra.mxu0 %v2339_v57  ;;  %2836 = vmatpush1.bf16.msra.mxu1 %v2341_v36  ;;  %v2062_v57 = vld [vmem:[%s5443_s17 + $0x3d0] sm:$0xff]  ;;  %v2395_v36 = vunpack.c.h.s8.bf16 %v2052_v19 }
 0x590   :  { %2673 = vmatprep.subr.bf16.mxu0 %v2347_v30  ;;  %2837 = vmatprep.subr.bf16.mxu1 %v2349_v1  ;;  %v2397_v30 = vunpack.c.h.s8.bf16 %v2054_v42  ;;  %v2403_v1 = vunpack.c.l.s8.bf16 %v2060_v29  ;;  %v2405_v58 = vunpack.c.l.s8.bf16 %v2062_v57  ;;  %v2412_v17 = vunpack.c.h.s8.bf16 %v2062_v57 }
 0x593   :  { %2674 = vmatpush1.bf16.msra.mxu0 %v2346_v2  ;;  %2838 = vmatpush1.bf16.msra.mxu1 %v2348_v16  ;;  %v2061_v2 = vld [vmem:[%s5443_s17 + $0x3c8] sm:$0xff]  ;;  %v2402_v16 = vunpack.c.l.s8.bf16 %v2059_v9 }
 0x594   :  { %2675 = vmatprep.subr.bf16.mxu0 %v2354_v62  ;;  %2839 = vmatprep.subr.bf16.mxu1 %v2356_v3  ;;  %v2404_v62 = vunpack.c.l.s8.bf16 %v2061_v2  ;;  %v2410_v3 = vunpack.c.h.s8.bf16 %v2060_v29  ;;  %v2090_v29 = vld [vmem:[%s5443_s17 + $0x4b0] sm:$0xff] }
 0x597   :  { %2676 = vmatpush1.bf16.msra.mxu0 %v2353_v43  ;;  %2840 = vmatpush1.bf16.msra.mxu1 %v2355_v48  ;;  %v2069_v43 = vld [vmem:[%s5443_s17 + $0x408] sm:$0xff]  ;;  %v2409_v48 = vunpack.c.h.s8.bf16 %v2059_v9  ;;  %v2461_v9 = vunpack.c.l.s8.bf16 %v2090_v29 }
 0x598   :  { %2677 = vmatprep.subr.bf16.mxu0 %v2361_v4  ;;  %2841 = vmatprep.subr.bf16.mxu1 %v2363_v5  ;;  %v2411_v4 = vunpack.c.h.s8.bf16 %v2061_v2  ;;  %v2417_v5 = vunpack.c.l.s8.bf16 %v2067_v46  ;;  %v2419_v7 = vunpack.c.l.s8.bf16 %v2069_v43  ;;  %v2426_v51 = vunpack.c.h.s8.bf16 %v2069_v43 }
 0x59b   :  { %2678 = vmatpush1.bf16.msra.mxu0 %v2360_v56  ;;  %2842 = vmatpush1.bf16.msra.mxu1 %v2362_v20  ;;  %v2068_v56 = vld [vmem:[%s5443_s17 + $0x400] sm:$0xff]  ;;  %v2416_v20 = vunpack.c.l.s8.bf16 %v2066_v44 }
 0x59c   :  { %2679 = vmatprep.subr.bf16.mxu0 %v2368_v38  ;;  %2843 = vmatprep.subr.bf16.mxu1 %v2370_v39  ;;  %v2418_v38 = vunpack.c.l.s8.bf16 %v2068_v56  ;;  %v2424_v39 = vunpack.c.h.s8.bf16 %v2067_v46  ;;  %v2097_v46 = vld [vmem:[%s5443_s17 + $0x4e8] sm:$0xff] }
 0x59f   :  { %2680 = vmatpush1.bf16.msra.mxu0 %v2367_v41  ;;  %2844 = vmatpush1.bf16.msra.mxu1 %v2369_v28  ;;  %v2076_v41 = vld [vmem:[%s5443_s17 + $0x440] sm:$0xff]  ;;  %v2423_v28 = vunpack.c.h.s8.bf16 %v2066_v44  ;;  %v2475_v44 = vunpack.c.l.s8.bf16 %v2097_v46 }
 0x5a0   :  { %2681 = vmatprep.subr.bf16.mxu0 %v2375_v60  ;;  %2845 = vmatprep.subr.bf16.mxu1 %v2377_v47  ;;  %v2425_v60 = vunpack.c.h.s8.bf16 %v2068_v56  ;;  %v2431_v47 = vunpack.c.l.s8.bf16 %v2074_v40  ;;  %v2433_v27 = vunpack.c.l.s8.bf16 %v2076_v41  ;;  %v2440_v45 = vunpack.c.h.s8.bf16 %v2076_v41 }
 0x5a3   :  { %2682 = vmatpush1.bf16.msra.mxu0 %v2374_v10  ;;  %2846 = vmatpush1.bf16.msra.mxu1 %v2376_v12  ;;  %v2075_v10 = vld [vmem:[%s5443_s17 + $0x438] sm:$0xff]  ;;  %v2430_v12 = vunpack.c.l.s8.bf16 %v2073_v6 }
 0x5a4   :  { %2683 = vmatprep.subr.bf16.mxu0 %v2382_v53  ;;  %2847 = vmatprep.subr.bf16.mxu1 %v2384_v31  ;;  %v2432_v53 = vunpack.c.l.s8.bf16 %v2075_v10  ;;  %v2438_v31 = vunpack.c.h.s8.bf16 %v2074_v40  ;;  %v2439_v50 = vunpack.c.h.s8.bf16 %v2075_v10  ;;  %v2104_v40 = vld [vmem:[%s5443_s17 + $0x520] sm:$0xff] }
 0x5a7   :  { %2684 = vmatpush1.bf16.msra.mxu0 %v2381_v18  ;;  %2848 = vmatpush1.bf16.msra.mxu1 %v2383_v21  ;;  %v2083_v18 = vld [vmem:[%s5443_s17 + $0x478] sm:$0xff]  ;;  %v2437_v21 = vunpack.c.h.s8.bf16 %v2073_v6  ;;  %v2489_v6 = vunpack.c.l.s8.bf16 %v2104_v40 }
 0x5a8   :  { %2694 = vmatprep.subr.bf16.mxu0 %v2389_v23  ;;  %2858 = vmatprep.subr.bf16.mxu1 %v2391_v24  ;;  %v2445_v23 = vunpack.c.l.s8.bf16 %v2081_v52  ;;  %v2080_v24 = vld [vmem:[%s5443_s17 + $0x460] sm:$0xff]  ;;  %v2447_v19 = vunpack.c.l.s8.bf16 %v2083_v18 }
 0x5a9   :  { %v2444_v42 = vunpack.c.l.s8.bf16 %v2080_v24  ;;  %v2451_v57 = vunpack.c.h.s8.bf16 %v2080_v24  ;;  %v2108_v24 = vld [vmem:[%s5443_s17 + $0x540] sm:$0xff] }
 0x5aa   :  { %2686 = vmatmul.mubr.bf16.vlgmr.msra.gmra.mrb[12].mxu0 %v4869_v8  ;;  %2850 = vmatmul.mubr.bf16.vlgmr.msra.gmra.mrb[20].mxu1 %v4869_v8 }
 0x5ab   :  { %2695 = vmatpush1.bf16.msra.mxu0 %v2388_v55  ;;  %2726 = vmatprep.mubr.bf16.mxu0 %v4871_v26  ;;  %v2446_v55 = vunpack.c.l.s8.bf16 %v2082_v35 }
 0x5ac   :  { %2859 = vmatpush1.bf16.msra.mxu1 %v2390_v22  ;;  %2890 = vmatprep.mubr.bf16.mxu1 %v4871_v26  ;;  %v2452_v22 = vunpack.c.h.s8.bf16 %v2081_v52  ;;  %v2111_v52 = vld [vmem:[%s5443_s17 + $0x558] sm:$0xff] }
 0x5ad   :  { %2696 = vmatprep.subr.bf16.mxu0 %v2396_v11  ;;  %2860 = vmatprep.subr.bf16.mxu1 %v2398_v15  ;;  %v2454_v11 = vunpack.c.h.s8.bf16 %v2083_v18  ;;  %v2088_v15 = vld [vmem:[%s5443_s17 + $0x4a0] sm:$0xff] }
 0x5af   :  { %2697 = vmatpush1.bf16.msra.mxu0 %v2395_v36  ;;  %v2453_v36 = vunpack.c.h.s8.bf16 %v2082_v35  ;;  %v2110_v35 = vld [vmem:[%s5443_s17 + $0x550] sm:$0xff] }
 0x5b0   :  { %2861 = vmatpush1.bf16.msra.mxu1 %v2397_v30  ;;  %2698 = vmatprep.subr.bf16.mxu0 %v2403_v1  ;;  %v2459_v30 = vunpack.c.l.s8.bf16 %v2088_v15  ;;  %v2087_v1 = vld [vmem:[%s5443_s17 + $0x498] sm:$0xff] }
 0x5b1   :  { %2862 = vmatprep.subr.bf16.mxu1 %v2405_v58  ;;  %v2089_v58 = vld [vmem:[%s5443_s17 + $0x4a8] sm:$0xff]  ;;  %v2458_v2 = vunpack.c.l.s8.bf16 %v2087_v1  ;;  %v2465_v43 = vunpack.c.h.s8.bf16 %v2087_v1 }
 0x5b3   :  { %2699 = vmatpush1.bf16.msra.mxu0 %v2402_v16  ;;  %v2460_v16 = vunpack.c.l.s8.bf16 %v2089_v58 }
 0x5b4   :  { %2863 = vmatpush1.bf16.msra.mxu1 %v2404_v62  ;;  %2700 = vmatprep.subr.bf16.mxu0 %v2410_v3  ;;  %v2466_v62 = vunpack.c.h.s8.bf16 %v2088_v15  ;;  %v2468_v3 = vunpack.c.h.s8.bf16 %v2090_v29  ;;  %v2116_v15 = vld [vmem:[%s5443_s17 + $0x580] sm:$0xff] }
 0x5b5   :  { %2864 = vmatprep.subr.bf16.mxu1 %v2412_v17  ;;  %v2095_v17 = vld [vmem:[%s5443_s17 + $0x4d8] sm:$0xff]  ;;  %v2515_v1 = vunpack.c.l.s8.bf16 %v2116_v15 }
 0x5b7   :  { %2701 = vmatpush1.bf16.msra.mxu0 %v2409_v48  ;;  %v2467_v48 = vunpack.c.h.s8.bf16 %v2089_v58 }
 0x5b8   :  { %2865 = vmatpush1.bf16.msra.mxu1 %v2411_v4  ;;  %2702 = vmatprep.subr.bf16.mxu0 %v2417_v5  ;;  %v2473_v4 = vunpack.c.l.s8.bf16 %v2095_v17  ;;  %v2094_v5 = vld [vmem:[%s5443_s17 + $0x4d0] sm:$0xff] }
 0x5b9   :  { %2866 = vmatprep.subr.bf16.mxu1 %v2419_v7  ;;  %v2096_v7 = vld [vmem:[%s5443_s17 + $0x4e0] sm:$0xff]  ;;  %v2472_v56 = vunpack.c.l.s8.bf16 %v2094_v5  ;;  %v2479_v41 = vunpack.c.h.s8.bf16 %v2094_v5 }
 0x5bb   :  { %2703 = vmatpush1.bf16.msra.mxu0 %v2416_v20  ;;  %v2474_v20 = vunpack.c.l.s8.bf16 %v2096_v7 }
 0x5bc   :  { %2867 = vmatpush1.bf16.msra.mxu1 %v2418_v38  ;;  %2704 = vmatprep.subr.bf16.mxu0 %v2424_v39  ;;  %v2480_v38 = vunpack.c.h.s8.bf16 %v2095_v17  ;;  %v2482_v39 = vunpack.c.h.s8.bf16 %v2097_v46  ;;  %v2123_v46 = vld [vmem:[%s5443_s17 + $0x5b8] sm:$0xff] }
 0x5bd   :  { %2868 = vmatprep.subr.bf16.mxu1 %v2426_v51  ;;  %v2102_v51 = vld [vmem:[%s5443_s17 + $0x510] sm:$0xff]  ;;  %v2529_v5 = vunpack.c.l.s8.bf16 %v2123_v46 }
 0x5bf   :  { %2705 = vmatpush1.bf16.msra.mxu0 %v2423_v28  ;;  %v2481_v28 = vunpack.c.h.s8.bf16 %v2096_v7 }
 0x5c0   :  { %2869 = vmatpush1.bf16.msra.mxu1 %v2425_v60  ;;  %2706 = vmatprep.subr.bf16.mxu0 %v2431_v47  ;;  %v2487_v60 = vunpack.c.l.s8.bf16 %v2102_v51  ;;  %v2101_v47 = vld [vmem:[%s5443_s17 + $0x508] sm:$0xff] }
 0x5c1   :  { %2870 = vmatprep.subr.bf16.mxu1 %v2433_v27  ;;  %v2103_v27 = vld [vmem:[%s5443_s17 + $0x518] sm:$0xff]  ;;  %v2486_v10 = vunpack.c.l.s8.bf16 %v2101_v47  ;;  %v2493_v18 = vunpack.c.h.s8.bf16 %v2101_v47 }
 0x5c3   :  { %2707 = vmatpush1.bf16.msra.mxu0 %v2430_v12  ;;  %v2488_v12 = vunpack.c.l.s8.bf16 %v2103_v27 }
 0x5c4   :  { %2871 = vmatpush1.bf16.msra.mxu1 %v2432_v53  ;;  %2708 = vmatprep.subr.bf16.mxu0 %v2438_v31  ;;  %v2494_v53 = vunpack.c.h.s8.bf16 %v2102_v51  ;;  %v2496_v31 = vunpack.c.h.s8.bf16 %v2104_v40  ;;  %v2130_v40 = vld [vmem:[%s5443_s17 + $0x5f0] sm:$0xff] }
 0x5c5   :  { %2872 = vmatprep.subr.bf16.mxu1 %v2440_v45  ;;  %v2109_v45 = vld [vmem:[%s5443_s17 + $0x548] sm:$0xff]  ;;  %v2543_v47 = vunpack.c.l.s8.bf16 %v2130_v40 }
 0x5c7   :  { %2709 = vmatpush1.bf16.msra.mxu0 %v2437_v21  ;;  %v2495_v21 = vunpack.c.h.s8.bf16 %v2103_v27 }
 0x5c8   :  { %2873 = vmatpush1.bf16.msra.mxu1 %v2439_v50  ;;  %2710 = vmatprep.subr.bf16.mxu0 %v2445_v23  ;;  %v1928_v50 = vmax.f32 %v4771_v61, 0.0  ;;  %v2501_v23 = vunpack.c.l.s8.bf16 %v2109_v45  ;;  %v2502_v61 = vunpack.c.l.s8.bf16 %v2110_v35 }
 0x5c9   :  { %2874 = vmatprep.subr.bf16.mxu1 %v2447_v19  ;;  %v2503_v19 = vunpack.c.l.s8.bf16 %v2111_v52 }
 0x5cb   :  { %2711 = vmatpush1.bf16.msra.mxu0 %v2444_v42  ;;  %v1931_v42 = vmax.f32 %v4739_v14, 0.0  ;;  %v2118_v14 = vld [vmem:[%s5443_s17 + $0x590] sm:$0xff] }
 0x5cc   :  { %2875 = vmatpush1.bf16.msra.mxu1 %v2446_v55  ;;  %2712 = vmatprep.subr.bf16.mxu0 %v2452_v22  ;;  %v2500_v55 = vunpack.c.l.s8.bf16 %v2108_v24  ;;  %v4975_v22 = vpack.c.bf16 %v1928_v50, %v1928_v50  ;;  %v2517_v58 = vunpack.c.l.s8.bf16 %v2118_v14  ;;  %v2524_v17 = vunpack.c.h.s8.bf16 %v2118_v14 }
 0x5cd   :  { %2876 = vmatprep.subr.bf16.mxu1 %v2454_v11  ;;  %v2508_v11 = vunpack.c.h.s8.bf16 %v2109_v45  ;;  %v4981_v29 = vpack.c.bf16 %v1931_v42, %v1931_v42 }
 0x5cf   :  { %2713 = vmatpush1.bf16.msra.mxu0 %v2451_v57  ;;  %v2510_v57 = vunpack.c.h.s8.bf16 %v2111_v52  ;;  %v2137_v52 = vld [vmem:[%s5443_s17 + $0x628] sm:$0xff] }
 0x5d0   :  { %2877 = vmatpush1.bf16.msra.mxu1 %v2453_v36  ;;  %2714 = vmatprep.subr.bf16.mxu0 %v2459_v30  ;;  %v2507_v36 = vunpack.c.h.s8.bf16 %v2108_v24  ;;  %v2509_v30 = vunpack.c.h.s8.bf16 %v2110_v35  ;;  %v2136_v24 = vld [vmem:[%s5443_s17 + $0x620] sm:$0xff]  ;;  %v2138_v35 = vld [vmem:[%s5443_s17 + $0x630] sm:$0xff] }
 0x5d1   :  { %2878 = vmatprep.subr.bf16.mxu1 %v2461_v9  ;;  %v2115_v9 = vld [vmem:[%s5443_s17 + $0x578] sm:$0xff]  ;;  %v2556_v42 = vunpack.c.l.s8.bf16 %v2136_v24  ;;  %v2563_v14 = vunpack.c.h.s8.bf16 %v2136_v24  ;;  %v1944_v24 = vld [vmem:[%s5443_s17 + $0x20] sm:$0xff] }
 0x5d3   :  { %2715 = vmatpush1.bf16.msra.mxu0 %v2458_v2  ;;  %v2117_v2 = vld [vmem:[%s5443_s17 + $0x588] sm:$0xff] }
 0x5d4   :  { %2879 = vmatpush1.bf16.msra.mxu1 %v2460_v16  ;;  %2716 = vmatprep.subr.bf16.mxu0 %v2466_v62  ;;  %v2514_v16 = vunpack.c.l.s8.bf16 %v2115_v9  ;;  %v2516_v62 = vunpack.c.l.s8.bf16 %v2117_v2 }
 0x5d5   :  { %2880 = vmatprep.subr.bf16.mxu1 %v2468_v3  ;;  %v2522_v3 = vunpack.c.h.s8.bf16 %v2116_v15  ;;  %v2144_v15 = vld [vmem:[%s5443_s17 + $0x660] sm:$0xff] }
 0x5d7   :  { %2717 = vmatpush1.bf16.msra.mxu0 %v2465_v43  ;;  %v2125_v43 = vld [vmem:[%s5443_s17 + $0x5c8] sm:$0xff] }
 0x5d8   :  { %2881 = vmatpush1.bf16.msra.mxu1 %v2467_v48  ;;  %2718 = vmatprep.subr.bf16.mxu0 %v2473_v4  ;;  %v2521_v48 = vunpack.c.h.s8.bf16 %v2115_v9  ;;  %v2523_v4 = vunpack.c.h.s8.bf16 %v2117_v2  ;;  %v2531_v7 = vunpack.c.l.s8.bf16 %v2125_v43  ;;  %v2538_v51 = vunpack.c.h.s8.bf16 %v2125_v43 }
 0x5d9   :  { %2882 = vmatprep.subr.bf16.mxu1 %v2475_v44  ;;  %v2122_v44 = vld [vmem:[%s5443_s17 + $0x5b0] sm:$0xff] }
 0x5db   :  { %2719 = vmatpush1.bf16.msra.mxu0 %v2472_v56  ;;  %v2124_v56 = vld [vmem:[%s5443_s17 + $0x5c0] sm:$0xff] }
 0x5dc   :  { %2883 = vmatpush1.bf16.msra.mxu1 %v2474_v20  ;;  %2720 = vmatprep.subr.bf16.mxu0 %v2480_v38  ;;  %v2528_v20 = vunpack.c.l.s8.bf16 %v2122_v44  ;;  %v2530_v38 = vunpack.c.l.s8.bf16 %v2124_v56 }
 0x5dd   :  { %2884 = vmatprep.subr.bf16.mxu1 %v2482_v39  ;;  %v2536_v39 = vunpack.c.h.s8.bf16 %v2123_v46  ;;  %v2153_v46 = vld [vmem:[%s5443_s17 + $0x6a8] sm:$0xff] }
 0x5df   :  { %2721 = vmatpush1.bf16.msra.mxu0 %v2479_v41  ;;  %v2132_v41 = vld [vmem:[%s5443_s17 + $0x600] sm:$0xff] }
 0x5e0   :  { %2885 = vmatpush1.bf16.msra.mxu1 %v2481_v28  ;;  %2722 = vmatprep.subr.bf16.mxu0 %v2487_v60  ;;  %v2535_v28 = vunpack.c.h.s8.bf16 %v2122_v44  ;;  %v2537_v60 = vunpack.c.h.s8.bf16 %v2124_v56  ;;  %v2545_v27 = vunpack.c.l.s8.bf16 %v2132_v41  ;;  %v2552_v45 = vunpack.c.h.s8.bf16 %v2132_v41 }
 0x5e1   :  { %2886 = vmatprep.subr.bf16.mxu1 %v2489_v6  ;;  %v2129_v6 = vld [vmem:[%s5443_s17 + $0x5e8] sm:$0xff]  ;;  %v2587_v44 = vunpack.c.l.s8.bf16 %v2153_v46 }
 0x5e3   :  { %2723 = vmatpush1.bf16.msra.mxu0 %v2486_v10  ;;  %v2131_v10 = vld [vmem:[%s5443_s17 + $0x5f8] sm:$0xff] }
 0x5e4   :  { %2887 = vmatpush1.bf16.msra.mxu1 %v2488_v12  ;;  %2724 = vmatprep.subr.bf16.mxu0 %v2494_v53  ;;  %v2542_v12 = vunpack.c.l.s8.bf16 %v2129_v6  ;;  %v2544_v53 = vunpack.c.l.s8.bf16 %v2131_v10  ;;  %v2551_v50 = vunpack.c.h.s8.bf16 %v2131_v10 }
 0x5e5   :  { %2888 = vmatprep.subr.bf16.mxu1 %v2496_v31  ;;  %v2550_v31 = vunpack.c.h.s8.bf16 %v2130_v40  ;;  %v2160_v40 = vld [vmem:[%s5443_s17 + $0x6e0] sm:$0xff] }
 0x5e7   :  { %2725 = vmatpush1.bf16.msra.mxu0 %v2493_v18  ;;  %v2139_v18 = vld [vmem:[%s5443_s17 + $0x638] sm:$0xff] }
 0x5e8   :  { %2889 = vmatpush1.bf16.msra.mxu1 %v2495_v21  ;;  %2735 = vmatprep.subr.bf16.mxu0 %v2501_v23  ;;  %v2549_v21 = vunpack.c.h.s8.bf16 %v2129_v6  ;;  %v2557_v23 = vunpack.c.l.s8.bf16 %v2137_v52  ;;  %v2601_v6 = vunpack.c.l.s8.bf16 %v2160_v40 }
 0x5e9   :  { %2899 = vmatprep.subr.bf16.mxu1 %v2503_v19  ;;  %v2559_v19 = vunpack.c.l.s8.bf16 %v2139_v18 }
 0x5ea   :  { %2727 = vmatmul.mubr.bf16.vlgmr.msra.gmra.mrb[12].mxu0 %v4975_v22 }
 0x5eb   :  { %2891 = vmatmul.mubr.bf16.vlgmr.msra.gmra.mrb[20].mxu1 %v4975_v22  ;;  %2736 = vmatpush1.bf16.msra.mxu0 %v2500_v55  ;;  %v2558_v55 = vunpack.c.l.s8.bf16 %v2138_v35 }
 0x5ec   :  { %2767 = vmatprep.mubr.bf16.mxu0 %v4981_v29  ;;  %2900 = vmatpush1.bf16.msra.mxu1 %v2502_v61  ;;  %v2564_v61 = vunpack.c.h.s8.bf16 %v2137_v52  ;;  %v1974_v52 = vld [vmem:[%s5443_s17 + $0x110] sm:$0xff] }
 0x5ed   :  { %2931 = vmatprep.mubr.bf16.mxu1 %v4981_v29  ;;  %2737 = vmatprep.subr.bf16.mxu0 %v2508_v11  ;;  %v2566_v11 = vunpack.c.h.s8.bf16 %v2139_v18 }
 0x5ee   :  { %2901 = vmatprep.subr.bf16.mxu1 %v2510_v57  ;;  %v2146_v57 = vld [vmem:[%s5443_s17 + $0x670] sm:$0xff] }
 0x5ef   :  { %2738 = vmatpush1.bf16.msra.mxu0 %v2507_v36  ;;  %v2565_v36 = vunpack.c.h.s8.bf16 %v2138_v35  ;;  %v2573_v9 = vunpack.c.l.s8.bf16 %v2146_v57  ;;  %v1946_v35 = vld [vmem:[%s5443_s17 + $0x30] sm:$0xff] }
 0x5f0   :  { %2902 = vmatpush1.bf16.msra.mxu1 %v2509_v30  ;;  %2739 = vmatprep.subr.bf16.mxu0 %v2515_v1  ;;  %v2571_v30 = vunpack.c.l.s8.bf16 %v2144_v15  ;;  %v2143_v1 = vld [vmem:[%s5443_s17 + $0x658] sm:$0xff] }
 0x5f1   :  { %2903 = vmatprep.subr.bf16.mxu1 %v2517_v58  ;;  %v2145_v58 = vld [vmem:[%s5443_s17 + $0x668] sm:$0xff]  ;;  %v2570_v2 = vunpack.c.l.s8.bf16 %v2143_v1  ;;  %v2577_v43 = vunpack.c.h.s8.bf16 %v2143_v1  ;;  %v1951_v1 = vld [vmem:[%s5443_s17 + $0x58] sm:$0xff] }
 0x5f3   :  { %2740 = vmatpush1.bf16.msra.mxu0 %v2514_v16  ;;  %v2572_v16 = vunpack.c.l.s8.bf16 %v2145_v58 }
 0x5f4   :  { %2904 = vmatpush1.bf16.msra.mxu1 %v2516_v62  ;;  %2741 = vmatprep.subr.bf16.mxu0 %v2522_v3  ;;  %v2578_v62 = vunpack.c.h.s8.bf16 %v2144_v15  ;;  %v2580_v3 = vunpack.c.h.s8.bf16 %v2146_v57  ;;  %v2233_v15 = vunpack.c.h.s8.bf16 %v1974_v52  ;;  %v1981_v57 = vld [vmem:[%s5443_s17 + $0x148] sm:$0xff] }
 0x5f5   :  { %2905 = vmatprep.subr.bf16.mxu1 %v2524_v17  ;;  %v2151_v17 = vld [vmem:[%s5443_s17 + $0x698] sm:$0xff] }
 0x5f7   :  { %2742 = vmatpush1.bf16.msra.mxu0 %v2521_v48  ;;  %v2579_v48 = vunpack.c.h.s8.bf16 %v2145_v58  ;;  %v1953_v58 = vld [vmem:[%s5443_s17 + $0x68] sm:$0xff] }
 0x5f8   :  { %2906 = vmatpush1.bf16.msra.mxu1 %v2523_v4  ;;  %2743 = vmatprep.subr.bf16.mxu0 %v2529_v5  ;;  %v2585_v4 = vunpack.c.l.s8.bf16 %v2151_v17  ;;  %v2150_v5 = vld [vmem:[%s5443_s17 + $0x690] sm:$0xff] }
 0x5f9   :  { %2907 = vmatprep.subr.bf16.mxu1 %v2531_v7  ;;  %v2152_v7 = vld [vmem:[%s5443_s17 + $0x6a0] sm:$0xff]  ;;  %v2584_v56 = vunpack.c.l.s8.bf16 %v2150_v5  ;;  %v2591_v41 = vunpack.c.h.s8.bf16 %v2150_v5 }
 0x5fb   :  { %2744 = vmatpush1.bf16.msra.mxu0 %v2528_v20  ;;  %v2586_v20 = vunpack.c.l.s8.bf16 %v2152_v7 }
 0x5fc   :  { %2908 = vmatpush1.bf16.msra.mxu1 %v2530_v38  ;;  %2745 = vmatprep.subr.bf16.mxu0 %v2536_v39  ;;  %v2592_v38 = vunpack.c.h.s8.bf16 %v2151_v17  ;;  %v2594_v39 = vunpack.c.h.s8.bf16 %v2153_v46  ;;  %v1959_v17 = vld [vmem:[%s5443_s17 + $0x98] sm:$0xff]  ;;  %v2189_v46 = vunpack.c.h.s8.bf16 %v1951_v1 }
 0x5fd   :  { %2909 = vmatprep.subr.bf16.mxu1 %v2538_v51  ;;  %v2158_v51 = vld [vmem:[%s5443_s17 + $0x6d0] sm:$0xff] }
 0x5ff   :  { %2746 = vmatpush1.bf16.msra.mxu0 %v2535_v28  ;;  %v2593_v28 = vunpack.c.h.s8.bf16 %v2152_v7 }
 0x600   :  { %2910 = vmatpush1.bf16.msra.mxu1 %v2537_v60  ;;  %2747 = vmatprep.subr.bf16.mxu0 %v2543_v47  ;;  %v2599_v60 = vunpack.c.l.s8.bf16 %v2158_v51  ;;  %v2157_v47 = vld [vmem:[%s5443_s17 + $0x6c8] sm:$0xff] }
 0x601   :  { %2911 = vmatprep.subr.bf16.mxu1 %v2545_v27  ;;  %v2159_v27 = vld [vmem:[%s5443_s17 + $0x6d8] sm:$0xff]  ;;  %v2598_v10 = vunpack.c.l.s8.bf16 %v2157_v47  ;;  %v2605_v18 = vunpack.c.h.s8.bf16 %v2157_v47 }
 0x603   :  { %2748 = vmatpush1.bf16.msra.mxu0 %v2542_v12  ;;  %v2600_v12 = vunpack.c.l.s8.bf16 %v2159_v27 }
 0x604   :  { %2912 = vmatpush1.bf16.msra.mxu1 %v2544_v53  ;;  %2749 = vmatprep.subr.bf16.mxu0 %v2550_v31  ;;  %v2606_v53 = vunpack.c.h.s8.bf16 %v2158_v51  ;;  %v2608_v31 = vunpack.c.h.s8.bf16 %v2160_v40  ;;  %v1995_v51 = vld [vmem:[%s5443_s17 + $0x1b8] sm:$0xff] }
 0x605   :  { %2913 = vmatprep.subr.bf16.mxu1 %v2552_v45  ;;  %v1945_v45 = vld [vmem:[%s5443_s17 + $0x28] sm:$0xff]  ;;  %v2268_v47 = vunpack.c.l.s8.bf16 %v1995_v51 }
 0x607   :  { %2750 = vmatpush1.bf16.msra.mxu0 %v2549_v21  ;;  %v2607_v21 = vunpack.c.h.s8.bf16 %v2159_v27 }
 0x608   :  { %2914 = vmatpush1.bf16.msra.mxu1 %v2551_v50  ;;  %2751 = vmatprep.subr.bf16.mxu0 %v2557_v23  ;;  %v1930_v50 = vmax.f32 %v4773_v54, 0.0  ;;  %v2169_v23 = vunpack.c.l.s8.bf16 %v1945_v45  ;;  %v2176_v54 = vunpack.c.h.s8.bf16 %v1945_v45  ;;  %v2030_v45 = vld [vmem:[%s5443_s17 + $0x2d0] sm:$0xff] }
 0x609   :  { %2915 = vmatprep.subr.bf16.mxu1 %v2559_v19  ;;  %v2226_v19 = vunpack.c.l.s8.bf16 %v1974_v52 }
 0x60b   :  { %2752 = vmatpush1.bf16.msra.mxu0 %v2556_v42  ;;  %v2168_v42 = vunpack.c.l.s8.bf16 %v1944_v24 }
 0x60c   :  { %2916 = vmatpush1.bf16.msra.mxu1 %v2558_v55  ;;  %2753 = vmatprep.subr.bf16.mxu0 %v2564_v61  ;;  %v5080_v55 = vpack.c.bf16 %v1930_v50, %v1930_v50  ;;  %v2170_v61 = vunpack.c.l.s8.bf16 %v1946_v35  ;;  %v1972_v50 = vld [vmem:[%s5443_s17 + $0x100] sm:$0xff] }
 0x60d   :  { %2917 = vmatprep.subr.bf16.mxu1 %v2566_v11  ;;  %v1952_v11 = vld [vmem:[%s5443_s17 + $0x60] sm:$0xff] }
 0x60f   :  { %2754 = vmatpush1.bf16.msra.mxu0 %v2563_v14  ;;  %v2175_v14 = vunpack.c.h.s8.bf16 %v1944_v24  ;;  %v2002_v24 = vld [vmem:[%s5443_s17 + $0x1f0] sm:$0xff] }
 0x610   :  { %2918 = vmatpush1.bf16.msra.mxu1 %v2565_v36  ;;  %2755 = vmatprep.subr.bf16.mxu0 %v2571_v30  ;;  %v2177_v36 = vunpack.c.h.s8.bf16 %v1946_v35  ;;  %v2183_v30 = vunpack.c.l.s8.bf16 %v1952_v11  ;;  %v2282_v35 = vunpack.c.l.s8.bf16 %v2002_v24 }
 0x611   :  { %2919 = vmatprep.subr.bf16.mxu1 %v2573_v9  ;;  %v2240_v9 = vunpack.c.l.s8.bf16 %v1981_v57 }
 0x613   :  { %2756 = vmatpush1.bf16.msra.mxu0 %v2570_v2  ;;  %v2182_v2 = vunpack.c.l.s8.bf16 %v1951_v1  ;;  %v2009_v1 = vld [vmem:[%s5443_s17 + $0x228] sm:$0xff] }
 0x614   :  { %2920 = vmatpush1.bf16.msra.mxu1 %v2572_v16  ;;  %2757 = vmatprep.subr.bf16.mxu0 %v2578_v62  ;;  %v2184_v16 = vunpack.c.l.s8.bf16 %v1953_v58  ;;  %v2190_v62 = vunpack.c.h.s8.bf16 %v1952_v11  ;;  %v2037_v11 = vld [vmem:[%s5443_s17 + $0x308] sm:$0xff] }
 0x615   :  { %2921 = vmatprep.subr.bf16.mxu1 %v2580_v3  ;;  %v2247_v3 = vunpack.c.h.s8.bf16 %v1981_v57  ;;  %v2289_v57 = vunpack.c.h.s8.bf16 %v2002_v24 }
 0x617   :  { %2758 = vmatpush1.bf16.msra.mxu0 %v2577_v43  ;;  %v2191_v43 = vunpack.c.h.s8.bf16 %v1953_v58  ;;  %v2296_v58 = vunpack.c.l.s8.bf16 %v2009_v1 }
 0x618   :  { %2922 = vmatpush1.bf16.msra.mxu1 %v2579_v48  ;;  %2759 = vmatprep.subr.bf16.mxu0 %v2585_v4  ;;  %v2197_v48 = vunpack.c.l.s8.bf16 %v1959_v17  ;;  %v1958_v4 = vld [vmem:[%s5443_s17 + $0x90] sm:$0xff] }
 0x619   :  { %2923 = vmatprep.subr.bf16.mxu1 %v2587_v44  ;;  %v1960_v44 = vld [vmem:[%s5443_s17 + $0xa0] sm:$0xff]  ;;  %v2196_v7 = vunpack.c.l.s8.bf16 %v1958_v4  ;;  %v2203_v40 = vunpack.c.h.s8.bf16 %v1958_v4 }
 0x61a   :  { %v2016_v4 = vld [vmem:[%s5443_s17 + $0x260] sm:$0xff] }
 0x61b   :  { %2760 = vmatpush1.bf16.msra.mxu0 %v2584_v56  ;;  %v2198_v56 = vunpack.c.l.s8.bf16 %v1960_v44 }
 0x61c   :  { %2924 = vmatpush1.bf16.msra.mxu1 %v2586_v20  ;;  %2761 = vmatprep.subr.bf16.mxu0 %v2592_v38  ;;  %v2204_v20 = vunpack.c.h.s8.bf16 %v1959_v17 }
 0x61d   :  { %2925 = vmatprep.subr.bf16.mxu1 %v2594_v39  ;;  %v1966_v39 = vld [vmem:[%s5443_s17 + $0xd0] sm:$0xff] }
 0x61f   :  { %2762 = vmatpush1.bf16.msra.mxu0 %v2591_v41  ;;  %v2205_v41 = vunpack.c.h.s8.bf16 %v1960_v44  ;;  %v2310_v44 = vunpack.c.l.s8.bf16 %v2016_v4 }
 0x620   :  { %2926 = vmatpush1.bf16.msra.mxu1 %v2593_v28  ;;  %2763 = vmatprep.subr.bf16.mxu0 %v2599_v60  ;;  %v2211_v28 = vunpack.c.l.s8.bf16 %v1966_v39  ;;  %v1965_v60 = vld [vmem:[%s5443_s17 + $0xc8] sm:$0xff] }
 0x621   :  { %2927 = vmatprep.subr.bf16.mxu1 %v2601_v6  ;;  %v1967_v6 = vld [vmem:[%s5443_s17 + $0xd8] sm:$0xff]  ;;  %v2210_v27 = vunpack.c.l.s8.bf16 %v1965_v60  ;;  %v2217_v52 = vunpack.c.h.s8.bf16 %v1965_v60 }
 0x622   :  { %v2023_v60 = vld [vmem:[%s5443_s17 + $0x298] sm:$0xff] }
 0x623   :  { %2764 = vmatpush1.bf16.msra.mxu0 %v2598_v10  ;;  %v2212_v10 = vunpack.c.l.s8.bf16 %v1967_v6 }
 0x624   :  { %2928 = vmatpush1.bf16.msra.mxu1 %v2600_v12  ;;  %2765 = vmatprep.subr.bf16.mxu0 %v2606_v53  ;;  %v2218_v12 = vunpack.c.h.s8.bf16 %v1966_v39  ;;  %v2275_v53 = vunpack.c.h.s8.bf16 %v1995_v51  ;;  %v2317_v51 = vunpack.c.h.s8.bf16 %v2016_v4 }
 0x625   :  { %2929 = vmatprep.subr.bf16.mxu1 %v2608_v31  ;;  %v1973_v31 = vld [vmem:[%s5443_s17 + $0x108] sm:$0xff] }
 0x627   :  { %2766 = vmatpush1.bf16.msra.mxu0 %v2605_v18  ;;  %v2219_v18 = vunpack.c.h.s8.bf16 %v1967_v6  ;;  %v2324_v6 = vunpack.c.l.s8.bf16 %v2023_v60 }
 0x628   :  { %2930 = vmatpush1.bf16.msra.mxu1 %v2607_v21  ;;  %2940 = vmatprep.subr.bf16.mxu0 %v2169_v23  ;;  %v2225_v21 = vunpack.c.l.s8.bf16 %v1973_v31  ;;  %v2338_v23 = vunpack.c.l.s8.bf16 %v2030_v45 }
 0x629   :  { %3413 = vmatprep.subr.bf16.mxu1 %v2226_v19  ;;  %v2224_v19 = vunpack.c.l.s8.bf16 %v1972_v50 }
 0x62a   :  { %2768 = vmatmul.mubr.bf16.vlgmr.msra.gmra.mrb[12].mxu0 %v5080_v55 }
 0x62b   :  { %2932 = vmatmul.mubr.bf16.vlgmr.msra.gmra.mrb[20].mxu1 %v5080_v55  ;;  %2941 = vmatpush1.bf16.msra.mxu0 %v2168_v42  ;;  %v2232_v42 = vunpack.c.h.s8.bf16 %v1973_v31 }
 0x62c   :  { %2972 = vmatprep.mubr.bf16.mxu0 %v4751_v25  ;;  %3414 = vmatpush3.bf16.msra.mxu1 %v2170_v61  ;;  %v2345_v61 = vunpack.c.h.s8.bf16 %v2030_v45  ;;  %v2331_v45 = vunpack.c.h.s8.bf16 %v2023_v60 }
 0x62d   :  { %3136 = vmatprep.mubr.bf16.mxu1 %v4751_v25  ;;  %2942 = vmatprep.subr.bf16.mxu0 %v2176_v54  ;;  %v1988_v25 = vld [vmem:[%s5443_s17 + $0x180] sm:$0xff] }
 0x62e   :  { %3415 = vmatprep.subr.bf16.mxu1 %v2233_v15  ;;  %v2254_v5 = vunpack.c.l.s8.bf16 %v1988_v25  ;;  %v2261_v38 = vunpack.c.h.s8.bf16 %v1988_v25  ;;  %v1980_v54 = vld [vmem:[%s5443_s17 + $0x140] sm:$0xff]  ;;  %v2231_v15 = vunpack.c.h.s8.bf16 %v1972_v50  ;;  %v2303_v25 = vunpack.c.h.s8.bf16 %v2009_v1  ;;  %v2058_v50 = vld [vmem:[%s5443_s17 + $0x3b0] sm:$0xff] }
 0x62f   :  { %2943 = vmatpush1.bf16.msra.mxu0 %v2175_v14  ;;  %v2239_v14 = vunpack.c.l.s8.bf16 %v1980_v54  ;;  %v2394_v24 = vunpack.c.l.s8.bf16 %v2058_v50 }
 0x630   :  { %3416 = vmatpush3.bf16.msra.mxu1 %v2177_v36  ;;  %2944 = vmatprep.subr.bf16.mxu0 %v2183_v30  ;;  %v1979_v36 = vld [vmem:[%s5443_s17 + $0x138] sm:$0xff]  ;;  %v2352_v30 = vunpack.c.l.s8.bf16 %v2037_v11 }
 0x631   :  { %3417 = vmatprep.subr.bf16.mxu1 %v2240_v9  ;;  %v2238_v9 = vunpack.c.l.s8.bf16 %v1979_v36  ;;  %v2245_v17 = vunpack.c.h.s8.bf16 %v1979_v36 }
 0x633   :  { %2945 = vmatpush1.bf16.msra.mxu0 %v2182_v2  ;;  %v2246_v2 = vunpack.c.h.s8.bf16 %v1980_v54 }
 0x634   :  { %3418 = vmatpush3.bf16.msra.mxu1 %v2184_v16  ;;  %2946 = vmatprep.subr.bf16.mxu0 %v2190_v62  ;;  %v2359_v16 = vunpack.c.h.s8.bf16 %v2037_v11  ;;  %v1987_v62 = vld [vmem:[%s5443_s17 + $0x178] sm:$0xff]  ;;  %v2401_v11 = vunpack.c.h.s8.bf16 %v2058_v50 }
 0x635   :  { %3419 = vmatprep.subr.bf16.mxu1 %v2247_v3  ;;  %v2044_v3 = vld [vmem:[%s5443_s17 + $0x340] sm:$0xff] }
 0x637   :  { %2947 = vmatpush1.bf16.msra.mxu0 %v2189_v46  ;;  %v2253_v46 = vunpack.c.l.s8.bf16 %v1987_v62 }
 0x638   :  { %3420 = vmatpush3.bf16.msra.mxu1 %v2191_v43  ;;  %2948 = vmatprep.subr.bf16.mxu0 %v2197_v48  ;;  %v1986_v43 = vld [vmem:[%s5443_s17 + $0x170] sm:$0xff]  ;;  %v2366_v48 = vunpack.c.l.s8.bf16 %v2044_v3 }
 0x639   :  { %3421 = vmatprep.subr.bf16.mxu1 %v2254_v5  ;;  %v2252_v5 = vunpack.c.l.s8.bf16 %v1986_v43  ;;  %v2259_v39 = vunpack.c.h.s8.bf16 %v1986_v43 }
 0x63b   :  { %2949 = vmatpush1.bf16.msra.mxu0 %v2196_v7  ;;  %v2260_v7 = vunpack.c.h.s8.bf16 %v1987_v62 }
 0x63c   :  { %3422 = vmatpush3.bf16.msra.mxu1 %v2198_v56  ;;  %2950 = vmatprep.subr.bf16.mxu0 %v2204_v20  ;;  %v2373_v56 = vunpack.c.h.s8.bf16 %v2044_v3  ;;  %v1994_v20 = vld [vmem:[%s5443_s17 + $0x1b0] sm:$0xff] }
 0x63d   :  { %3423 = vmatprep.subr.bf16.mxu1 %v2261_v38  ;;  %v2051_v38 = vld [vmem:[%s5443_s17 + $0x378] sm:$0xff]  ;;  %v2014_v3 = vld [vmem:[%s5443_s17 + $0x250] sm:$0xff] }
 0x63f   :  { %2951 = vmatpush1.bf16.msra.mxu0 %v2203_v40  ;;  %v2267_v40 = vunpack.c.l.s8.bf16 %v1994_v20 }
 0x640   :  { %3424 = vmatpush3.bf16.msra.mxu1 %v2205_v41  ;;  %2952 = vmatprep.subr.bf16.mxu0 %v2211_v28  ;;  %v1993_v41 = vld [vmem:[%s5443_s17 + $0x1a8] sm:$0xff]  ;;  %v2380_v28 = vunpack.c.l.s8.bf16 %v2051_v38 }
 0x641   :  { %3425 = vmatprep.subr.bf16.mxu1 %v2268_v47  ;;  %v2266_v47 = vunpack.c.l.s8.bf16 %v1993_v41  ;;  %v2273_v31 = vunpack.c.h.s8.bf16 %v1993_v41 }
 0x643   :  { %2953 = vmatpush1.bf16.msra.mxu0 %v2210_v27  ;;  %v2274_v27 = vunpack.c.h.s8.bf16 %v1994_v20 }
 0x644   :  { %3426 = vmatpush3.bf16.msra.mxu1 %v2212_v10  ;;  %2954 = vmatprep.subr.bf16.mxu0 %v2218_v12  ;;  %v2387_v10 = vunpack.c.h.s8.bf16 %v2051_v38  ;;  %v2001_v12 = vld [vmem:[%s5443_s17 + $0x1e8] sm:$0xff] }
 0x645   :  { %3427 = vmatprep.subr.bf16.mxu1 %v2275_v53  ;;  %v2086_v53 = vld [vmem:[%s5443_s17 + $0x490] sm:$0xff]  ;;  %v2021_v38 = vld [vmem:[%s5443_s17 + $0x288] sm:$0xff] }
 0x647   :  { %2955 = vmatpush1.bf16.msra.mxu0 %v2217_v52  ;;  %v2281_v52 = vunpack.c.l.s8.bf16 %v2001_v12 }
 0x648   :  { %3428 = vmatpush3.bf16.msra.mxu1 %v2219_v18  ;;  %2956 = vmatprep.subr.bf16.mxu0 %v2225_v21  ;;  %v2000_v18 = vld [vmem:[%s5443_s17 + $0x1e0] sm:$0xff]  ;;  %v2450_v21 = vunpack.c.l.s8.bf16 %v2086_v53 }
 0x649   :  { %3435 = vmatprep.subr.bf16.mxu1 %v2338_v23  ;;  %v2280_v23 = vunpack.c.l.s8.bf16 %v2000_v18  ;;  %v2287_v54 = vunpack.c.h.s8.bf16 %v2000_v18 }
 0x64b   :  { %3137 = vmatmul.mubr.bf16.vlgmr.msra.gmra.mrb[24].mxu1 %v4753_v37  ;;  %2957 = vmatpush1.bf16.msra.mxu0 %v2224_v19  ;;  %v2288_v19 = vunpack.c.h.s8.bf16 %v2001_v12 }
 0x64c   :  { %3436 = vmatpush3.bf16.msra.mxu1 %v2282_v35  ;;  %3176 = vmatprep.mubr.bf16.mxu1 %v4769_v59  ;;  %v2008_v35 = vld [vmem:[%s5443_s17 + $0x220] sm:$0xff] }
 0x64d   :  { %2958 = vmatprep.subr.bf16.mxu0 %v2232_v42  ;;  %3437 = vmatprep.subr.bf16.mxu1 %v2345_v61  ;;  %v2457_v42 = vunpack.c.h.s8.bf16 %v2086_v53  ;;  %v2093_v61 = vld [vmem:[%s5443_s17 + $0x4c8] sm:$0xff]  ;;  %v2028_v53 = vld [vmem:[%s5443_s17 + $0x2c0] sm:$0xff] }
 0x64e   :  { %v2471_v1 = vunpack.c.h.s8.bf16 %v2093_v61 }
 0x64f   :  { %2959 = vmatpush1.bf16.msra.mxu0 %v2231_v15  ;;  %v2295_v15 = vunpack.c.l.s8.bf16 %v2008_v35 }
 0x650   :  { %3438 = vmatpush3.bf16.msra.mxu1 %v2289_v57  ;;  %2960 = vmatprep.subr.bf16.mxu0 %v2239_v14  ;;  %v2007_v57 = vld [vmem:[%s5443_s17 + $0x218] sm:$0xff]  ;;  %v2065_v14 = vld [vmem:[%s5443_s17 + $0x3e8] sm:$0xff] }
 0x651   :  { %3439 = vmatprep.subr.bf16.mxu1 %v2352_v30  ;;  %v2294_v36 = vunpack.c.l.s8.bf16 %v2007_v57  ;;  %v2302_v30 = vunpack.c.h.s8.bf16 %v2008_v35 }
 0x653   :  { %2961 = vmatpush1.bf16.msra.mxu0 %v2238_v9  ;;  %v2015_v9 = vld [vmem:[%s5443_s17 + $0x258] sm:$0xff] }
 0x654   :  { %3440 = vmatpush3.bf16.msra.mxu1 %v2296_v58  ;;  %2962 = vmatprep.subr.bf16.mxu0 %v2246_v2  ;;  %v2100_v58 = vld [vmem:[%s5443_s17 + $0x500] sm:$0xff]  ;;  %v2301_v2 = vunpack.c.h.s8.bf16 %v2007_v57  ;;  %v2309_v62 = vunpack.c.l.s8.bf16 %v2015_v9 }
 0x655   :  { %3441 = vmatprep.subr.bf16.mxu1 %v2359_v16  ;;  %v2415_v16 = vunpack.c.h.s8.bf16 %v2065_v14  ;;  %v2485_v4 = vunpack.c.h.s8.bf16 %v2100_v58 }
 0x657   :  { %2963 = vmatpush1.bf16.msra.mxu0 %v2245_v17  ;;  %v2478_v17 = vunpack.c.l.s8.bf16 %v2100_v58  ;;  %v2042_v58 = vld [vmem:[%s5443_s17 + $0x330] sm:$0xff] }
 0x658   :  { %3442 = vmatpush3.bf16.msra.mxu1 %v2303_v25  ;;  %2964 = vmatprep.subr.bf16.mxu0 %v2253_v46  ;;  %v2072_v25 = vld [vmem:[%s5443_s17 + $0x420] sm:$0xff]  ;;  %v2308_v46 = vunpack.c.l.s8.bf16 %v2014_v3 }
 0x659   :  { %3443 = vmatprep.subr.bf16.mxu1 %v2366_v48  ;;  %v2422_v43 = vunpack.c.l.s8.bf16 %v2072_v25  ;;  %v2316_v48 = vunpack.c.h.s8.bf16 %v2015_v9 }
 0x65b   :  { %2965 = vmatpush1.bf16.msra.mxu0 %v2252_v5  ;;  %v2022_v5 = vld [vmem:[%s5443_s17 + $0x290] sm:$0xff] }
 0x65c   :  { %3444 = vmatpush3.bf16.msra.mxu1 %v2310_v44  ;;  %2966 = vmatprep.subr.bf16.mxu0 %v2260_v7  ;;  %v2107_v44 = vld [vmem:[%s5443_s17 + $0x538] sm:$0xff]  ;;  %v2315_v7 = vunpack.c.h.s8.bf16 %v2014_v3  ;;  %v2323_v20 = vunpack.c.l.s8.bf16 %v2022_v5 }
 0x65d   :  { %3445 = vmatprep.subr.bf16.mxu1 %v2373_v56  ;;  %v2429_v56 = vunpack.c.h.s8.bf16 %v2072_v25  ;;  %v2499_v60 = vunpack.c.h.s8.bf16 %v2107_v44 }
 0x65f   :  { %2967 = vmatpush1.bf16.msra.mxu0 %v2259_v39  ;;  %v2492_v39 = vunpack.c.l.s8.bf16 %v2107_v44  ;;  %v2049_v44 = vld [vmem:[%s5443_s17 + $0x368] sm:$0xff] }
 0x660   :  { %3446 = vmatpush3.bf16.msra.mxu1 %v2317_v51  ;;  %2968 = vmatprep.subr.bf16.mxu0 %v2267_v40  ;;  %v2079_v51 = vld [vmem:[%s5443_s17 + $0x458] sm:$0xff]  ;;  %v2322_v40 = vunpack.c.l.s8.bf16 %v2021_v38 }
 0x661   :  { %3447 = vmatprep.subr.bf16.mxu1 %v2380_v28  ;;  %v2436_v41 = vunpack.c.l.s8.bf16 %v2079_v51  ;;  %v2330_v28 = vunpack.c.h.s8.bf16 %v2022_v5 }
 0x663   :  { %2969 = vmatpush1.bf16.msra.mxu0 %v2266_v47  ;;  %v2029_v47 = vld [vmem:[%s5443_s17 + $0x2c8] sm:$0xff] }
 0x664   :  { %3448 = vmatpush3.bf16.msra.mxu1 %v2324_v6  ;;  %2970 = vmatprep.subr.bf16.mxu0 %v2274_v27  ;;  %v2142_v6 = vld [vmem:[%s5443_s17 + $0x650] sm:$0xff]  ;;  %v2329_v27 = vunpack.c.h.s8.bf16 %v2021_v38  ;;  %v2337_v12 = vunpack.c.l.s8.bf16 %v2029_v47 }
 0x665   :  { %3449 = vmatprep.subr.bf16.mxu1 %v2387_v10  ;;  %v2443_v10 = vunpack.c.h.s8.bf16 %v2079_v51  ;;  %v2569_v50 = vunpack.c.h.s8.bf16 %v2142_v6 }
 0x667   :  { %2971 = vmatpush1.bf16.msra.mxu0 %v2273_v31  ;;  %v2562_v31 = vunpack.c.l.s8.bf16 %v2142_v6 }
 0x668   :  { %3450 = vmatpush3.bf16.msra.mxu1 %v2331_v45  ;;  %2981 = vmatprep.subr.bf16.mxu0 %v2281_v52  ;;  %v2114_v45 = vld [vmem:[%s5443_s17 + $0x570] sm:$0xff]  ;;  %v2336_v52 = vunpack.c.l.s8.bf16 %v2028_v53 }
 0x669   :  { %3457 = vmatprep.subr.bf16.mxu1 %v2450_v21  ;;  %v2506_v18 = vunpack.c.l.s8.bf16 %v2114_v45  ;;  %v2344_v21 = vunpack.c.h.s8.bf16 %v2029_v47  ;;  %v2513_v35 = vunpack.c.h.s8.bf16 %v2114_v45  ;;  %v2056_v47 = vld [vmem:[%s5443_s17 + $0x3a0] sm:$0xff] }
 0x66a   :  { %2973 = vmatmul.mubr.bf16.vlgmr.msra.gmra.mrb[16].mxu0 %v4753_v37  ;;  %v2464_v37 = vunpack.c.l.s8.bf16 %v2093_v61  ;;  %v2035_v61 = vld [vmem:[%s5443_s17 + $0x2f8] sm:$0xff]  ;;  %v2392_v6 = vunpack.c.l.s8.bf16 %v2056_v47 }
 0x66b   :  { %3177 = vmatmul.mubr.bf16.vlgmr.msra.gmra.mrb[28].mxu1 %v4869_v8  ;;  %2982 = vmatpush1.bf16.msra.mxu0 %v2280_v23  ;;  %v2036_v23 = vld [vmem:[%s5443_s17 + $0x300] sm:$0xff] }
 0x66c   :  { %3013 = vmatprep.mubr.bf16.mxu0 %v4769_v59  ;;  %3458 = vmatpush3.bf16.msra.mxu1 %v2394_v24  ;;  %v2408_v59 = vunpack.c.l.s8.bf16 %v2065_v14  ;;  %v2149_v24 = vld [vmem:[%s5443_s17 + $0x688] sm:$0xff] }
 0x66d   :  { %3216 = vmatprep.mubr.bf16.mxu1 %v4871_v26  ;;  %2983 = vmatprep.subr.bf16.mxu0 %v2288_v19  ;;  %v2343_v19 = vunpack.c.h.s8.bf16 %v2028_v53  ;;  %v2583_v14 = vunpack.c.h.s8.bf16 %v2149_v24 }
 0x66e   :  { %3459 = vmatprep.subr.bf16.mxu1 %v2457_v42  ;;  %v2351_v42 = vunpack.c.l.s8.bf16 %v2036_v23 }
 0x66f   :  { %2984 = vmatpush1.bf16.msra.mxu0 %v2287_v54  ;;  %v2576_v54 = vunpack.c.l.s8.bf16 %v2149_v24  ;;  %v2078_v24 = vld [vmem:[%s5443_s17 + $0x450] sm:$0xff] }
 0x670   :  { %3460 = vmatpush3.bf16.msra.mxu1 %v2401_v11  ;;  %2985 = vmatprep.subr.bf16.mxu0 %v2295_v15  ;;  %v2121_v11 = vld [vmem:[%s5443_s17 + $0x5a8] sm:$0xff]  ;;  %v2350_v15 = vunpack.c.l.s8.bf16 %v2035_v61 }
 0x671   :  { %3461 = vmatprep.subr.bf16.mxu1 %v2464_v37  ;;  %v2520_v57 = vunpack.c.l.s8.bf16 %v2121_v11  ;;  %v2358_v37 = vunpack.c.h.s8.bf16 %v2036_v23 }
 0x673   :  { %2986 = vmatpush1.bf16.msra.mxu0 %v2294_v36  ;;  %v2043_v36 = vld [vmem:[%s5443_s17 + $0x338] sm:$0xff] }
 0x674   :  { %3462 = vmatpush3.bf16.msra.mxu1 %v2408_v59  ;;  %2987 = vmatprep.subr.bf16.mxu0 %v2302_v30  ;;  %v2156_v59 = vld [vmem:[%s5443_s17 + $0x6c0] sm:$0xff]  ;;  %v2357_v30 = vunpack.c.h.s8.bf16 %v2035_v61  ;;  %v2365_v9 = vunpack.c.l.s8.bf16 %v2043_v36 }
 0x675   :  { %3463 = vmatprep.subr.bf16.mxu1 %v2471_v1  ;;  %v2527_v1 = vunpack.c.h.s8.bf16 %v2121_v11  ;;  %v2597_v25 = vunpack.c.h.s8.bf16 %v2156_v59  ;;  %v2085_v11 = vld [vmem:[%s5443_s17 + $0x488] sm:$0xff] }
 0x677   :  { %2988 = vmatpush1.bf16.msra.mxu0 %v2301_v2  ;;  %v2590_v2 = vunpack.c.l.s8.bf16 %v2156_v59  ;;  %v2092_v59 = vld [vmem:[%s5443_s17 + $0x4c0] sm:$0xff] }
 0x678   :  { %3464 = vmatpush3.bf16.msra.mxu1 %v2415_v16  ;;  %2989 = vmatprep.subr.bf16.mxu0 %v2309_v62  ;;  %v2128_v16 = vld [vmem:[%s5443_s17 + $0x5e0] sm:$0xff]  ;;  %v2364_v62 = vunpack.c.l.s8.bf16 %v2042_v58 }
 0x679   :  { %3465 = vmatprep.subr.bf16.mxu1 %v2478_v17  ;;  %v2534_v3 = vunpack.c.l.s8.bf16 %v2128_v16  ;;  %v2372_v17 = vunpack.c.h.s8.bf16 %v2043_v36  ;;  %v2456_v36 = vunpack.c.h.s8.bf16 %v2085_v11 }
 0x67b   :  { %2990 = vmatpush1.bf16.msra.mxu0 %v2308_v46  ;;  %v2050_v46 = vld [vmem:[%s5443_s17 + $0x370] sm:$0xff] }
 0x67c   :  { %3466 = vmatpush3.bf16.msra.mxu1 %v2422_v43  ;;  %2991 = vmatprep.subr.bf16.mxu0 %v2316_v48  ;;  %v2163_v43 = vld [vmem:[%s5443_s17 + $0x6f8] sm:$0xff]  ;;  %v2371_v48 = vunpack.c.h.s8.bf16 %v2042_v58  ;;  %v2379_v5 = vunpack.c.l.s8.bf16 %v2050_v46 }
 0x67d   :  { %3467 = vmatprep.subr.bf16.mxu1 %v2485_v4  ;;  %v2541_v4 = vunpack.c.h.s8.bf16 %v2128_v16  ;;  %v2611_v51 = vunpack.c.h.s8.bf16 %v2163_v43  ;;  %v2099_v16 = vld [vmem:[%s5443_s17 + $0x4f8] sm:$0xff] }
 0x67f   :  { %2992 = vmatpush1.bf16.msra.mxu0 %v2315_v7  ;;  %v2604_v7 = vunpack.c.l.s8.bf16 %v2163_v43  ;;  %v2106_v43 = vld [vmem:[%s5443_s17 + $0x530] sm:$0xff] }
 0x680   :  { %3468 = vmatpush3.bf16.msra.mxu1 %v2429_v56  ;;  %2993 = vmatprep.subr.bf16.mxu0 %v2323_v20  ;;  %v2135_v56 = vld [vmem:[%s5443_s17 + $0x618] sm:$0xff]  ;;  %v2378_v20 = vunpack.c.l.s8.bf16 %v2049_v44 }
 0x681   :  { %3469 = vmatprep.subr.bf16.mxu1 %v2492_v39  ;;  %v2548_v38 = vunpack.c.l.s8.bf16 %v2135_v56  ;;  %v2386_v39 = vunpack.c.h.s8.bf16 %v2050_v46  ;;  %v2484_v46 = vunpack.c.h.s8.bf16 %v2099_v16 }
 0x683   :  { %2994 = vmatpush1.bf16.msra.mxu0 %v2322_v40  ;;  %v2057_v40 = vld [vmem:[%s5443_s17 + $0x3a8] sm:$0xff] }
 0x684   :  { %3470 = vmatpush3.bf16.msra.mxu1 %v2436_v41  ;;  %2995 = vmatprep.subr.bf16.mxu0 %v2330_v28  ;;  %v2385_v41 = vunpack.c.h.s8.bf16 %v2049_v44  ;;  %v2555_v28 = vunpack.c.h.s8.bf16 %v2135_v56  ;;  %v2113_v56 = vld [vmem:[%s5443_s17 + $0x568] sm:$0xff] }
 0x685   :  { %3471 = vmatprep.subr.bf16.mxu1 %v2499_v60  ;;  %v2393_v60 = vunpack.c.l.s8.bf16 %v2057_v40 }
 0x687   :  { %2996 = vmatpush1.bf16.msra.mxu0 %v2329_v27  ;;  %v2400_v27 = vunpack.c.h.s8.bf16 %v2057_v40  ;;  %v2512_v40 = vunpack.c.h.s8.bf16 %v2113_v56 }
 0x688   :  { %3472 = vmatpush3.bf16.msra.mxu1 %v2443_v10  ;;  %2997 = vmatprep.subr.bf16.mxu0 %v2337_v12  ;;  %v2064_v10 = vld [vmem:[%s5443_s17 + $0x3e0] sm:$0xff]  ;;  %v2399_v12 = vunpack.c.h.s8.bf16 %v2056_v47  ;;  %v2119_v47 = vld [vmem:[%s5443_s17 + $0x598] sm:$0xff] }
 0x689   :  { %3479 = vmatprep.subr.bf16.mxu1 %v2562_v31  ;;  %v2407_v53 = vunpack.c.l.s8.bf16 %v2064_v10  ;;  %v2063_v31 = vld [vmem:[%s5443_s17 + $0x3d8] sm:$0xff] }
 0x68a   :  { %v2406_v45 = vunpack.c.l.s8.bf16 %v2063_v31 }
 0x68b   :  { %3217 = vmatmul.mubr.bf16.vlgmr.msra.gmra.mrb[32].mxu1 %v4975_v22  ;;  %2998 = vmatpush1.bf16.msra.mxu0 %v2336_v52  ;;  %v2414_v52 = vunpack.c.h.s8.bf16 %v2064_v10  ;;  %v2127_v10 = vld [vmem:[%s5443_s17 + $0x5d8] sm:$0xff] }
 0x68c   :  { %3480 = vmatpush3.bf16.msra.mxu1 %v2506_v18  ;;  %3256 = vmatprep.mubr.bf16.mxu1 %v4981_v29  ;;  %v2413_v18 = vunpack.c.h.s8.bf16 %v2063_v31  ;;  %v5348_v31 = vld [vmem:[%s5444_s18] sm:$0x7f] }
 0x68d   :  { %2999 = vmatprep.subr.bf16.mxu0 %v2344_v21  ;;  %3481 = vmatprep.subr.bf16.mxu1 %v2569_v50 }
 0x68f   :  { %3000 = vmatpush1.bf16.msra.mxu0 %v2343_v19 }
 0x690   :  { %3482 = vmatpush3.bf16.msra.mxu1 %v2513_v35  ;;  %3001 = vmatprep.subr.bf16.mxu0 %v2351_v42  ;;  %v2435_v35 = vunpack.c.l.s8.bf16 %v2078_v24  ;;  %v2077_v42 = vld [vmem:[%s5443_s17 + $0x448] sm:$0xff] }
 0x691   :  { %3483 = vmatprep.subr.bf16.mxu1 %v2576_v54  ;;  %v2434_v61 = vunpack.c.l.s8.bf16 %v2077_v42  ;;  %v2442_v54 = vunpack.c.h.s8.bf16 %v2078_v24  ;;  %v3281_v24 = vrot.slane %v5348_v31, %v4105_v63 }
 0x693   :  { %3002 = vmatpush1.bf16.msra.mxu0 %v2350_v15  ;;  %v2441_v15 = vunpack.c.h.s8.bf16 %v2077_v42 }
 0x694   :  { %3484 = vmatpush3.bf16.msra.mxu1 %v2520_v57  ;;  %3003 = vmatprep.subr.bf16.mxu0 %v2358_v37  ;;  %v2449_v57 = vunpack.c.l.s8.bf16 %v2085_v11  ;;  %v2084_v37 = vld [vmem:[%s5443_s17 + $0x480] sm:$0xff] }
 0x695   :  { %3485 = vmatprep.subr.bf16.mxu1 %v2583_v14  ;;  %v2448_v14 = vunpack.c.l.s8.bf16 %v2084_v37 }
 0x697   :  { %3004 = vmatpush1.bf16.msra.mxu0 %v2357_v30  ;;  %v2455_v30 = vunpack.c.h.s8.bf16 %v2084_v37 }
 0x698   :  { %3486 = vmatpush3.bf16.msra.mxu1 %v2527_v1  ;;  %3005 = vmatprep.subr.bf16.mxu0 %v2365_v9  ;;  %v2463_v1 = vunpack.c.l.s8.bf16 %v2092_v59  ;;  %v2091_v9 = vld [vmem:[%s5443_s17 + $0x4b8] sm:$0xff] }
 0x699   :  { %3487 = vmatprep.subr.bf16.mxu1 %v2590_v2  ;;  %v2462_v58 = vunpack.c.l.s8.bf16 %v2091_v9  ;;  %v2470_v2 = vunpack.c.h.s8.bf16 %v2092_v59 }
 0x69b   :  { %3006 = vmatpush1.bf16.msra.mxu0 %v2364_v62  ;;  %v2469_v62 = vunpack.c.h.s8.bf16 %v2091_v9 }
 0x69c   :  { %3488 = vmatpush3.bf16.msra.mxu1 %v2534_v3  ;;  %3007 = vmatprep.subr.bf16.mxu0 %v2372_v17  ;;  %v2477_v3 = vunpack.c.l.s8.bf16 %v2099_v16  ;;  %v2098_v17 = vld [vmem:[%s5443_s17 + $0x4f0] sm:$0xff] }
 0x69d   :  { %3489 = vmatprep.subr.bf16.mxu1 %v2597_v25  ;;  %v2476_v25 = vunpack.c.l.s8.bf16 %v2098_v17 }
 0x69f   :  { %3008 = vmatpush1.bf16.msra.mxu0 %v2371_v48  ;;  %v2483_v48 = vunpack.c.h.s8.bf16 %v2098_v17 }
 0x6a0   :  { %3490 = vmatpush3.bf16.msra.mxu1 %v2541_v4  ;;  %3009 = vmatprep.subr.bf16.mxu0 %v2379_v5  ;;  %v2491_v4 = vunpack.c.l.s8.bf16 %v2106_v43  ;;  %v2105_v5 = vld [vmem:[%s5443_s17 + $0x528] sm:$0xff] }
 0x6a1   :  { %3491 = vmatprep.subr.bf16.mxu1 %v2604_v7  ;;  %v2490_v44 = vunpack.c.l.s8.bf16 %v2105_v5  ;;  %v2498_v7 = vunpack.c.h.s8.bf16 %v2106_v43 }
 0x6a3   :  { %3010 = vmatpush1.bf16.msra.mxu0 %v2378_v20  ;;  %v2497_v20 = vunpack.c.h.s8.bf16 %v2105_v5 }
 0x6a4   :  { %3492 = vmatpush3.bf16.msra.mxu1 %v2548_v38  ;;  %3011 = vmatprep.subr.bf16.mxu0 %v2386_v39  ;;  %v2505_v38 = vunpack.c.l.s8.bf16 %v2113_v56  ;;  %v2112_v39 = vld [vmem:[%s5443_s17 + $0x560] sm:$0xff] }
 0x6a5   :  { %3493 = vmatprep.subr.bf16.mxu1 %v2611_v51  ;;  %v2504_v51 = vunpack.c.l.s8.bf16 %v2112_v39 }
 0x6a7   :  { %3012 = vmatpush1.bf16.msra.mxu0 %v2385_v41  ;;  %v2120_v41 = vld [vmem:[%s5443_s17 + $0x5a0] sm:$0xff] }
 0x6a8   :  { %3494 = vmatpush3.bf16.msra.mxu1 %v2555_v28  ;;  %3022 = vmatprep.subr.bf16.mxu0 %v2393_v60  ;;  %v2511_v28 = vunpack.c.h.s8.bf16 %v2112_v39  ;;  %v2519_v60 = vunpack.c.l.s8.bf16 %v2120_v41 }
 0x6aa   :  { %3014 = vmatmul.mubr.bf16.vlgmr.msra.gmra.mrb[16].mxu0 %v4869_v8  ;;  %v2071_v8 = vld [vmem:[%s5443_s17 + $0x418] sm:$0xff] }
 0x6ab   :  { %3257 = vmatmul.mubr.bf16.vlgmr.msra.gmra.mrb[36].mxu1 %v5080_v55  ;;  %3023 = vmatpush1.bf16.msra.mxu0 %v2392_v6  ;;  %v2421_v21 = vunpack.c.l.s8.bf16 %v2071_v8  ;;  %v2428_v23 = vunpack.c.h.s8.bf16 %v2071_v8  ;;  %v2518_v6 = vunpack.c.l.s8.bf16 %v2119_v47  ;;  %v2134_v8 = vld [vmem:[%s5443_s17 + $0x610] sm:$0xff] }
 0x6ac   :  { %3054 = vmatprep.mubr.bf16.mxu0 %v4871_v26  ;;  %3024 = vmatprep.subr.bf16.mxu0 %v2400_v27  ;;  %v2070_v26 = vld [vmem:[%s5443_s17 + $0x410] sm:$0xff]  ;;  %v2526_v27 = vunpack.c.h.s8.bf16 %v2120_v41 }
 0x6ad   :  { %v2420_v50 = vunpack.c.l.s8.bf16 %v2070_v26  ;;  %v2427_v19 = vunpack.c.h.s8.bf16 %v2070_v26  ;;  %v3273_v26 = vrot.slane %v5348_v31, %v3875_v34 }
 0x6af   :  { %3025 = vmatpush1.bf16.msra.mxu0 %v2399_v12  ;;  %v2533_v12 = vunpack.c.l.s8.bf16 %v2127_v10 }
 0x6b0   :  { %3026 = vmatprep.subr.bf16.mxu0 %v2407_v53 }
 0x6b3   :  { %3027 = vmatpush1.bf16.msra.mxu0 %v2406_v45  ;;  %v2540_v45 = vunpack.c.h.s8.bf16 %v2127_v10 }
 0x6b4   :  { %3028 = vmatprep.subr.bf16.mxu0 %v2414_v52  ;;  %v5353_v52 = vld [vmem:[%s5445_s19] sm:$0x7f] }
 0x6b7   :  { %3029 = vmatpush1.bf16.msra.mxu0 %v2413_v18  ;;  %v3269_v18 = vrot.slane %v5348_v31, %v3798_v0 }
 0x6b8   :  { %3030 = vmatprep.subr.bf16.mxu0 %v2421_v21  ;;  %v3277_v21 = vrot.slane %v5348_v31, %v4102_v13 }
 0x6bb   :  { %3031 = vmatpush1.bf16.msra.mxu0 %v2420_v50 }
 0x6bc   :  { %3032 = vmatprep.subr.bf16.mxu0 %v2428_v23  ;;  %v3313_v23 = vrot.slane %v5353_v52, %v3798_v0  ;;  %v3325_v0 = vrot.slane %v5353_v52, %v4105_v63 }
 0x6bf   :  { %3033 = vmatpush1.bf16.msra.mxu0 %v2427_v19  ;;  %v2547_v19 = vunpack.c.l.s8.bf16 %v2134_v8 }
 0x6c0   :  { %3034 = vmatprep.subr.bf16.mxu0 %v2435_v35  ;;  %v2133_v35 = vld [vmem:[%s5443_s17 + $0x608] sm:$0xff] }
 0x6c1   :  { %v2553_v43 = vunpack.c.h.s8.bf16 %v2133_v35 }
 0x6c3   :  { %3035 = vmatpush1.bf16.msra.mxu0 %v2434_v61  ;;  %v3321_v61 = vrot.slane %v5353_v52, %v4102_v13  ;;  %v2554_v13 = vunpack.c.h.s8.bf16 %v2134_v8 }
 0x6c4   :  { %3036 = vmatprep.subr.bf16.mxu0 %v2442_v54  ;;  %v3317_v54 = vrot.slane %v5353_v52, %v3875_v34 }
 0x6c7   :  { %3037 = vmatpush1.bf16.msra.mxu0 %v2441_v15 }
 0x6c8   :  { %3038 = vmatprep.subr.bf16.mxu0 %v2449_v57 }
 0x6cb   :  { %3039 = vmatpush1.bf16.msra.mxu0 %v2448_v14 }
 0x6cc   :  { %3040 = vmatprep.subr.bf16.mxu0 %v2456_v36 }
 0x6cf   :  { %3041 = vmatpush1.bf16.msra.mxu0 %v2455_v30  ;;  %v2546_v30 = vunpack.c.l.s8.bf16 %v2133_v35 }
 0x6d0   :  { %3042 = vmatprep.subr.bf16.mxu0 %v2463_v1 }
 0x6d3   :  { %3043 = vmatpush1.bf16.msra.mxu0 %v2462_v58 }
 0x6d4   :  { %3044 = vmatprep.subr.bf16.mxu0 %v2470_v2 }
 0x6d7   :  { %3045 = vmatpush1.bf16.msra.mxu0 %v2469_v62 }
 0x6d8   :  { %3046 = vmatprep.subr.bf16.mxu0 %v2477_v3  ;;  %v2141_v3 = vld [vmem:[%s5443_s17 + $0x648] sm:$0xff] }
 0x6d9   :  { %v2561_v5 = vunpack.c.l.s8.bf16 %v2141_v3  ;;  %v2568_v39 = vunpack.c.h.s8.bf16 %v2141_v3 }
 0x6db   :  { %3047 = vmatpush1.bf16.msra.mxu0 %v2476_v25 }
 0x6dc   :  { %3048 = vmatprep.subr.bf16.mxu0 %v2484_v46 }
 0x6df   :  { %3049 = vmatpush1.bf16.msra.mxu0 %v2483_v48 }
 0x6e0   :  { %3050 = vmatprep.subr.bf16.mxu0 %v2491_v4 }
 0x6e3   :  { %3051 = vmatpush1.bf16.msra.mxu0 %v2490_v44  ;;  %v2140_v44 = vld [vmem:[%s5443_s17 + $0x640] sm:$0xff] }
 0x6e4   :  { %3052 = vmatprep.subr.bf16.mxu0 %v2498_v7 }
 0x6e7   :  { %3053 = vmatpush1.bf16.msra.mxu0 %v2497_v20 }
 0x6e8   :  { %3063 = vmatprep.subr.bf16.mxu0 %v2505_v38  ;;  %v2560_v38 = vunpack.c.l.s8.bf16 %v2140_v44 }
 0x6ea   :  { %3055 = vmatmul.mubr.bf16.vlgmr.msra.gmra.mrb[16].mxu0 %v4975_v22  ;;  %v2525_v22 = vunpack.c.h.s8.bf16 %v2119_v47 }
 0x6eb   :  { %3064 = vmatpush1.bf16.msra.mxu0 %v2504_v51  ;;  %3095 = vmatprep.mubr.bf16.mxu0 %v4981_v29  ;;  %v2126_v29 = vld [vmem:[%s5443_s17 + $0x5d0] sm:$0xff]  ;;  %v2148_v51 = vld [vmem:[%s5443_s17 + $0x680] sm:$0xff] }
 0x6ec   :  { %3065 = vmatprep.subr.bf16.mxu0 %v2512_v40  ;;  %v2532_v53 = vunpack.c.l.s8.bf16 %v2126_v29  ;;  %v2539_v50 = vunpack.c.h.s8.bf16 %v2126_v29  ;;  %v2567_v40 = vunpack.c.h.s8.bf16 %v2140_v44  ;;  %v2575_v41 = vunpack.c.l.s8.bf16 %v2148_v51 }
 0x6ef   :  { %3066 = vmatpush1.bf16.msra.mxu0 %v2511_v28  ;;  %v2147_v28 = vld [vmem:[%s5443_s17 + $0x678] sm:$0xff] }
 0x6f0   :  { %3067 = vmatprep.subr.bf16.mxu0 %v2519_v60  ;;  %v2574_v60 = vunpack.c.l.s8.bf16 %v2147_v28  ;;  %v2581_v8 = vunpack.c.h.s8.bf16 %v2147_v28 }
 0x6f3   :  { %3068 = vmatpush1.bf16.msra.mxu0 %v2518_v6  ;;  %v2582_v6 = vunpack.c.h.s8.bf16 %v2148_v51 }
 0x6f4   :  { %3069 = vmatprep.subr.bf16.mxu0 %v2526_v27 }
 0x6f7   :  { %3070 = vmatpush1.bf16.msra.mxu0 %v2525_v22  ;;  %v2155_v22 = vld [vmem:[%s5443_s17 + $0x6b8] sm:$0xff] }
 0x6f8   :  { %3071 = vmatprep.subr.bf16.mxu0 %v2533_v12 }
 0x6fb   :  { %3072 = vmatpush1.bf16.msra.mxu0 %v2532_v53 }
 0x6fc   :  { %3073 = vmatprep.subr.bf16.mxu0 %v2540_v45 }
 0x6fd   :  { %v2769_v42 = vpop.f32.mrb[12].mxu0 }
 0x6fe   :  { %v3301_v11 = vmul.f32 %v3269_v18, %v2769_v42  ;;  %v2933_v15 = vpop.f32.mrb[20].mxu1  ;;  %v2771_v57 = vpop.f32.mrb[13].mxu0  ;;  %v2161_v42 = vld [vmem:[%s5443_s17 + $0x6e8] sm:$0xff] }
 0x6ff   :  { %v3303_v37 = vmul.f32 %v3277_v21, %v2933_v15  ;;  %v3302_v14 = vmul.f32 %v3273_v26, %v2771_v57  ;;  %v2935_v36 = vpop.f32.mrb[21].mxu1  ;;  %v2773_v59 = vpop.f32.mrb[14].mxu0  ;;  %3074 = vmatpush1.bf16.msra.mxu0 %v2539_v50  ;;  %v2589_v21 = vunpack.c.l.s8.bf16 %v2155_v22  ;;  %v2154_v26 = vld [vmem:[%s5443_s17 + $0x6b0] sm:$0xff] }
 0x700   :  { %v3345_v1 = vadd.f32 %v3313_v23, %v3301_v11  ;;  %v3304_v9 = vmul.f32 %v3281_v24, %v2935_v36  ;;  %v2937_v58 = vpop.f32.mrb[22].mxu1  ;;  %v2774_v2 = vpop.f32.mrb[15].mxu0  ;;  %3075 = vmatprep.subr.bf16.mxu0 %v2547_v19  ;;  %v2588_v50 = vunpack.c.l.s8.bf16 %v2154_v26  ;;  %v2596_v23 = vunpack.c.h.s8.bf16 %v2155_v22  ;;  %v2162_v24 = vld [vmem:[%s5443_s17 + $0x6f0] sm:$0xff]  ;;  %s3650_s17 = smov [#allocation2]  }
 0x701   :  { %v3347_v16 = vadd.f32 %v3321_v61, %v3303_v37  ;;  %v3346_v34 = vadd.f32 %v3317_v54, %v3302_v14  ;;  %v2938_v62 = vpop.f32.mrb[23].mxu1  ;;  %v2595_v19 = vunpack.c.h.s8.bf16 %v2154_v26  ;;  %v2603_v35 = vunpack.c.l.s8.bf16 %v2162_v24  ;;  %s3401_s30 = sshll.u32 %s3650_s17, 4  ;;  %s3402_s30 = int_to_ptr.vmem [resolvable:$true] %s3401_s30 }
 0x702   :  { %v3352_v63 = vsub.f32 0.0, %v3345_v1  ;;  %v3348_v17 = vadd.f32 %v3325_v0, %v3304_v9  ;;  %v2602_v0 = vunpack.c.l.s8.bf16 %v2161_v42  ;;  %v2610_v59 = vunpack.c.h.s8.bf16 %v2162_v24  ;;  %s3622_s14 = scalar_lea.vmem %s3402_s30, 896  ;;  %p3627_p1 = scmp.lt.s32.totalorder %s3402_s30, %s3402_s30 }
 0x703   :  { %v3354_v25 = vsub.f32 0.0, %v3347_v16  ;;  %v3353_v46 = vsub.f32 0.0, %v3346_v34  ;;  %3076 = vmatpush1.bf16.msra.mxu0 %v2546_v30  ;;  %v2609_v1 = vunpack.c.h.s8.bf16 %v2161_v42  ;;  %p3623_p0 = scmp.ne.s32.totalorder %s3402_s30, %s3622_s14  ;;  %p3628_p2 = scmp.lt.s32.totalorder %s3622_s14, %s3622_s14 }
 0x704   :  { %v3359_v48 = vmul.f32 1.442695, %v3352_v63  ;;  %v3355_v4 = vsub.f32 0.0, %v3348_v17  ;;  %3077 = vmatprep.subr.bf16.mxu0 %v2554_v13 }
 0x705   :  { %v3363_v7 = vmul.f32 1.442695, %v3354_v25  ;;  %v3361_v56 = vmul.f32 1.442695, %v3353_v46  ;;  %p3629_p3 = por %p3628_p2, %p3627_p1 }
 0x706   :  { %3594 = vpow2.f32 %v3359_v48  ;;  %v3365_v20 = vmul.f32 1.442695, %v3355_v4 }
 0x707   :  { %3596 = vpow2.f32 %v3363_v7  ;;  %3078 = vmatpush1.bf16.msra.mxu0 %v2553_v43  ;;  %p3630_p4 = pnand %p3629_p3, %p3623_p0 }
 0x708   :  { %3598 = vpow2.f32 %v3361_v56  ;;  %3079 = vmatprep.subr.bf16.mxu0 %v2561_v5  ;;  %v3293_v5 = vrot.slane %v5348_v31, %v4640_v33  ;;  %v3337_v56 = vrot.slane %v5353_v52, %v4640_v33  ;;  %v3329_v33 = vrot.slane %v5353_v52, %v4637_v32 }
 0x709   :  { %3600 = vpow2.f32 %v3365_v20 }
 0x70b   :  { %3080 = vmatpush1.bf16.msra.mxu0 %v2560_v38 }
 0x70c   :  { %3081 = vmatprep.subr.bf16.mxu0 %v2568_v39 }
 0x70f   :  { %3082 = vmatpush1.bf16.msra.mxu0 %v2567_v40 }
 0x710   :  { %v3595_v47 = vpop.eup %3594  ;;  %3083 = vmatprep.subr.bf16.mxu0 %v2575_v41 }
 0x711   :  { %v3597_v27 = vpop.eup %3596  ;;  %v3373_v10 = vadd.f32 1.0, %v3595_v47  ;;  %v3289_v47 = vrot.slane %v5348_v31, %v4650_v49 }
 0x712   :  { %v3599_v12 = vpop.eup %3598  ;;  %v3375_v29 = vadd.f32 1.0, %v3597_v27  ;;  %v3333_v27 = vrot.slane %v5353_v52, %v4650_v49 }
 0x713   :  { %v3601_v53 = vpop.eup %3600  ;;  %3602 = vrcp.f32 %v3373_v10  ;;  %v3374_v45 = vadd.f32 1.0, %v3599_v12  ;;  %3084 = vmatpush1.bf16.msra.mxu0 %v2574_v60  ;;  %v3285_v60 = vrot.slane %v5348_v31, %v4637_v32 }
 0x714   :  { %3604 = vrcp.f32 %v3375_v29  ;;  %v3376_v18 = vadd.f32 1.0, %v3601_v53  ;;  %3085 = vmatprep.subr.bf16.mxu0 %v2582_v6 }
 0x715   :  { %3606 = vrcp.f32 %v3374_v45 }
 0x716   :  { %3608 = vrcp.f32 %v3376_v18 }
 0x717   :  { %3086 = vmatpush1.bf16.msra.mxu0 %v2581_v8 }
 0x718   :  { %3087 = vmatprep.subr.bf16.mxu0 %v2589_v21 }
 0x71b   :  { %3088 = vmatpush1.bf16.msra.mxu0 %v2588_v50 }
 0x71c   :  { %3089 = vmatprep.subr.bf16.mxu0 %v2596_v23 }
 0x71d   :  { %v3603_v61 = vpop.eup %3602 }
 0x71e   :  { %v3605_v54 = vpop.eup %3604  ;;  %3387 = vst [vmem:[#allocation2] sm:$0xff] %v3603_v61  ;;  %v3429_v11 = vpop.f32.mrb[24].mxu1 }
 0x71f   :  { %v3607_v15 = vpop.eup %3606  ;;  %3389 = vst [vmem:[#allocation2 + $0x10] sm:$0xff] %v3605_v54  ;;  %v3430_v57 = vpop.f32.mrb[25].mxu1  ;;  %3090 = vmatpush1.bf16.msra.mxu0 %v2595_v19 }
 0x720   :  { %v3609_v37 = vpop.eup %3608  ;;  %3388 = vst [vmem:[#allocation2 + $0x8] sm:$0xff] %v3607_v15  ;;  %v3431_v14 = vadd.f32 %v3430_v57, %v3429_v11  ;;  %v3432_v36 = vpop.f32.mrb[26].mxu1  ;;  %3091 = vmatprep.subr.bf16.mxu0 %v2603_v35 }
 0x721   :  { %3390 = vst [vmem:[#allocation2 + $0x18] sm:$0xff] %v3609_v37  ;;  %v3433_v30 = vpop.f32.mrb[27].mxu1 }
 0x723   :  { %3092 = vmatpush1.bf16.msra.mxu0 %v2602_v0 }
 0x724   :  { %3093 = vmatprep.subr.bf16.mxu0 %v2610_v59 }
 0x727   :  { %3094 = vmatpush1.bf16.msra.mxu0 %v2609_v1 }
 0x72a   :  { %3096 = vmatmul.mubr.bf16.vlgmr.msra.gmra.mrb[16].mxu0 %v5080_v55 }
 0x73e   :  { %v3451_v9 = vpop.f32.mrb[28].mxu1 }
 0x73f   :  { %v3452_v58 = vpop.f32.mrb[29].mxu1 }
 0x740   :  { %v3453_v2 = vadd.f32 %v3452_v58, %v3451_v9  ;;  %v3454_v13 = vpop.f32.mrb[30].mxu1 }
 0x741   :  { %v3455_v16 = vpop.f32.mrb[31].mxu1 }
 0x742   :  { %v3179_v34 = vadd.f32 %v3453_v2, %v3431_v14 }
 0x75e   :  { %v3473_v62 = vpop.f32.mrb[32].mxu1 }
 0x75f   :  { %v3474_v3 = vpop.f32.mrb[33].mxu1 }
 0x760   :  { %v3475_v63 = vadd.f32 %v3474_v3, %v3473_v62  ;;  %v3476_v17 = vpop.f32.mrb[34].mxu1 }
 0x761   :  { %v3477_v25 = vpop.f32.mrb[35].mxu1 }
 0x762   :  { %v3219_v46 = vadd.f32 %v3475_v63, %v3179_v34 }
 0x77e   :  { %v3495_v43 = vpop.f32.mrb[36].mxu1 }
 0x77f   :  { %v3496_v48 = vpop.f32.mrb[37].mxu1 }
 0x780   :  { %v3497_v4 = vadd.f32 %v3496_v48, %v3495_v43  ;;  %v3498_v44 = vpop.f32.mrb[38].mxu1 }
 0x781   :  { %v3499_v55 = vpop.f32.mrb[39].mxu1 }
 0x782   :  { %v3259_v7 = vadd.f32 %v3497_v4, %v3219_v46 }
 0x784   :  { %v3307_v20 = vmul.f32 %v3293_v5, %v3259_v7 }
 0x786   :  { %v3351_v38 = vadd.f32 %v3337_v56, %v3307_v20 }
 0x788   :  { %v3358_v39 = vsub.f32 0.0, %v3351_v38 }
 0x78a   :  { %v3371_v51 = vmul.f32 1.442695, %v3358_v39 }
 0x78c   :  { %3610 = vpow2.f32 %v3371_v51 }
 0x796   :  { %v3611_v40 = vpop.eup %3610 }
 0x797   :  { %v3379_v41 = vadd.f32 1.0, %v3611_v40 }
 0x799   :  { %3612 = vrcp.f32 %v3379_v41 }
 0x7a3   :  { %v3613_v28 = vpop.eup %3612 }
 0x7a4   :  { %3394 = vst.msk [vmem:[#allocation2 + $0x30] sm:$0xff] %vm3393_vm3, %v3613_v28 }
 0x7fd   :  { %v3097_v6 = vpop.f32.mrb[16].mxu0 }
 0x7fe   :  { %v3305_v10 = vmul.f32 %v3285_v60, %v3097_v6  ;;  %v3099_v22 = vpop.f32.mrb[17].mxu0 }
 0x7ff   :  { %v3306_v12 = vmul.f32 %v3289_v47, %v3099_v22  ;;  %v3101_v29 = vpop.f32.mrb[18].mxu0 }
 0x800   :  { %v3349_v53 = vadd.f32 %v3329_v33, %v3305_v10  ;;  %v3102_v45 = vpop.f32.mrb[19].mxu0 }
 0x801   :  { %v3350_v8 = vadd.f32 %v3333_v27, %v3306_v12 }
 0x802   :  { %v3356_v18 = vsub.f32 0.0, %v3349_v53 }
 0x803   :  { %v3357_v21 = vsub.f32 0.0, %v3350_v8 }
 0x804   :  { %v3367_v26 = vmul.f32 1.442695, %v3356_v18 }
 0x805   :  { %v3369_v50 = vmul.f32 1.442695, %v3357_v21 }
 0x806   :  { %3614 = vpow2.f32 %v3367_v26 }
 0x807   :  { %3616 = vpow2.f32 %v3369_v50 }
 0x810   :  { %v3615_v31 = vpop.eup %3614 }
 0x811   :  { %v3617_v23 = vpop.eup %3616  ;;  %v3377_v32 = vadd.f32 1.0, %v3615_v31 }
 0x812   :  { %v3378_v24 = vadd.f32 1.0, %v3617_v23 }
 0x813   :  { %3618 = vrcp.f32 %v3377_v32 }
 0x814   :  { %3620 = vrcp.f32 %v3378_v24 }
 0x81d   :  { %v3619_v49 = vpop.eup %3618 }
 0x81e   :  { %v3621_v52 = vpop.eup %3620  ;;  %3391 = vst [vmem:[#allocation2 + $0x20] sm:$0xff] %v3619_v49 }
 0x81f   :  { %3392 = vst [vmem:[#allocation2 + $0x28] sm:$0xff] %v3621_v52 }
 0x820   :  { %3633 = shalt.err (!%p3630_p4)
}
 0x821   :  { %s3634_s1 = scalar_lea.hbm %s5446_s20, 896 }
 0x822   :  { %p3635_p5 = scmp.ne.s32.totalorder %s5446_s20, %s3634_s1  ;;  %p3638_p6 = scmp.lt.u32.totalorder %s3634_s1, %s5446_s20 }
 0x824   :  { %p3640_p7 = pnand %p3638_p6, %p3635_p5 }
 0x826   :  { %3643 = shalt.err (!%p3640_p7)
}
 0x827   :  { %3404 = dma.vmem_to_hbm [thread:$0]  %s3402_s30, 896, %s5446_s20, [#allocation3]  }
 0x828   :  { %3644 = dma.done.wait [#allocation3], 896  }
 0x829   :  { %3645 = vsyncadd [#allocation3], 4294966400 }
 0x82a   :  { %3408 = vsyncpa [#allocation3], 1 }

</bundles_post_ra>
